<compile_context>
chip_gen: v7x
topology: tpu7x:2x2x1
jax: 0.10.0
libtpu: 0.0.40
codegen_flags: <defaults>
</compile_context>

<pallas_src>
import functools

import numpy as np
import jax
import jax.numpy as jnp
from jax.experimental import pallas as pl
from jax.experimental.pallas import tpu as pltpu


# ----------------------------------------------------------------------------
# small helper (used inside the kernel)
# ----------------------------------------------------------------------------
def _layernorm(x, g, b, eps):
    mu = jnp.mean(x, axis=-1, keepdims=True)
    xc = x - mu
    var = jnp.mean(xc * xc, axis=-1, keepdims=True)
    return xc * jax.lax.rsqrt(var + eps) * g + b


# ----------------------------------------------------------------------------
# The fused kernel: grid=(depth,)
#   l == 0        : patch-proj matmul + (cls / pos-embed / conv-bias) base add
#   every l       : one post-norm TransformerEncoderLayer (MHA + FFN)
#   l == depth-1  : final LayerNorm + masked mean pooling + Linear1 + ReLU
# Activation (B*S_pad, E) is carried across layers in a VMEM scratch.
# ----------------------------------------------------------------------------
def _fused_forward_kernel(
    patches_ref, base_ref, pw_ref,                      # patch-embed inputs
    wqkv_ref, bqkv_ref, wout_ref, bout_ref,             # per-layer attention weights
    ln1g_ref, ln1b_ref,
    w1_ref, b1_ref, w2_ref, b2_ref,                     # per-layer FFN weights
    ln2g_ref, ln2b_ref,
    ng_ref, nb_ref, pw1_ref, pb1_ref,                   # final LN + positioning Linear1
    o_ref,                                              # (B, E) output
    act_ref,                                            # VMEM scratch (B*S_pad, E) f32
    *, batch, s_pad, s_valid, num_heads, eps,
):
    l = pl.program_id(0)
    depth = pl.num_programs(0)

    # ---- layer 0: patch projection + additive base (cls + pos-embed + conv bias) ----
    @pl.when(l == 0)
    def _():
        tok = jnp.dot(patches_ref[...].astype(jnp.bfloat16), pw_ref[...],
                      preferred_element_type=jnp.float32)           # (M, E)
        act_ref[...] = tok + base_ref[...]

    x = act_ref[...]                                                # (M, E) f32
    M, E = x.shape
    H = num_heads
    Dh = E // H
    scale = 1.0 / float(np.sqrt(Dh))

    # ---- QKV projection (bf16 operands, f32 accumulate) ----
    qkv = jnp.dot(x.astype(jnp.bfloat16), wqkv_ref[0],
                  preferred_element_type=jnp.float32) + bqkv_ref[0]  # (M, 3E)

    # key-padding bias: padded key positions contribute exp(-inf)=0
    key_ids = jax.lax.broadcasted_iota(jnp.int32, (1, s_pad), 1)
    key_bias = jnp.where(key_ids < s_valid, 0.0, -1e30).astype(jnp.float32)

    # ---- attention, all heads of all batches, straight from the QKV slab ----
    attn_rows = []
    for b in range(batch):                                           # static loop
        qkv_b = qkv[b * s_pad:(b + 1) * s_pad, :]                    # (S_pad, 3E)
        heads = []
        for h in range(H):                                           # static loop
            q = qkv_b[:, h * Dh:(h + 1) * Dh]
            k = qkv_b[:, E + h * Dh:E + (h + 1) * Dh]
            v = qkv_b[:, 2 * E + h * Dh:2 * E + (h + 1) * Dh]
            s = jnp.dot(q.astype(jnp.bfloat16), k.astype(jnp.bfloat16).T,
                        preferred_element_type=jnp.float32) * scale + key_bias
            m = jnp.max(s, axis=-1, keepdims=True)
            p = jnp.exp(s - m)
            denom = jnp.sum(p, axis=-1, keepdims=True)
            p = p * pl.reciprocal(denom, approx=True)
            heads.append(jnp.dot(p.astype(jnp.bfloat16), v.astype(jnp.bfloat16),
                                 preferred_element_type=jnp.float32))
        attn_rows.append(jnp.concatenate(heads, axis=-1))            # (S_pad, E)
    attn = jnp.concatenate(attn_rows, axis=0)                        # (M, E)

    # ---- output projection + residual + LayerNorm1 (post-norm) ----
    attn_out = jnp.dot(attn.astype(jnp.bfloat16), wout_ref[0],
                       preferred_element_type=jnp.float32) + bout_ref[0]
    h1 = _layernorm(x + attn_out, ln1g_ref[0], ln1b_ref[0], eps)

    # ---- FFN (ReLU) + residual + LayerNorm2 ----
    f = jnp.dot(h1.astype(jnp.bfloat16), w1_ref[0],
                preferred_element_type=jnp.float32) + b1_ref[0]
    f = jnp.maximum(f, 0.0)
    f = jnp.dot(f.astype(jnp.bfloat16), w2_ref[0],
                preferred_element_type=jnp.float32) + b2_ref[0]
    h2 = _layernorm(h1 + f, ln2g_ref[0], ln2b_ref[0], eps)

    act_ref[...] = h2

    # ---- last layer: final LN + masked mean pooling + positioning Linear1 + ReLU ----
    @pl.when(l == depth - 1)
    def _():
        hn = _layernorm(h2, ng_ref[...], nb_ref[...], eps)           # (M, E)
        inv = 1.0 / float(s_valid)
        pooled = []
        for b in range(batch):                                       # static loop
            hb = hn[b * s_pad:b * s_pad + s_valid, :]                # valid tokens only
            pooled.append(jnp.sum(hb, axis=0, keepdims=True) * inv)
        pooled = jnp.concatenate(pooled, axis=0)                     # (B, E)
        p1 = jnp.dot(pooled.astype(jnp.bfloat16), pw1_ref[...],
                     preferred_element_type=jnp.float32) + pb1_ref[...]
        o_ref[...] = jnp.maximum(p1, 0.0).astype(o_ref.dtype)


def fused_forward(patches_padded, base, params, cfg, batch, s_pad, s_valid, eps=1e-5):
    """patches_padded:(B*S_pad, K) f32, base:(B*S_pad, E) f32 -> (B, E) f32."""
    M, K = patches_padded.shape
    E = cfg["embed_dim"]
    FF = cfg["dim_feedforward"]
    depth = cfg["depth"]
    H = cfg["num_heads"]
    sw = params["stacked"]

    kernel = functools.partial(
        _fused_forward_kernel, batch=batch, s_pad=s_pad, s_valid=s_valid,
        num_heads=H, eps=eps)

    def const(shape):
        return pl.BlockSpec(shape, lambda l: (0, 0))

    def per_layer(shape):
        return pl.BlockSpec((1,) + shape, lambda l: (l, 0, 0))

    grid_spec = pltpu.PrefetchScalarGridSpec(
        num_scalar_prefetch=0,
        grid=(depth,),
        in_specs=[
            const((M, K)),                 # padded patches
            const((M, E)),                 # additive base (cls + pos + conv bias)
            const((K, E)),                 # patch projection weight
            per_layer((E, 3 * E)), per_layer((1, 3 * E)),
            per_layer((E, E)), per_layer((1, E)),
            per_layer((1, E)), per_layer((1, E)),
            per_layer((E, FF)), per_layer((1, FF)),
            per_layer((FF, E)), per_layer((1, E)),
            per_layer((1, E)), per_layer((1, E)),
            const((1, E)), const((1, E)),  # final LN gamma / beta
            const((E, E)), const((1, E)),  # positioning Linear1 W / b
        ],
        out_specs=pl.BlockSpec((batch, E), lambda l: (0, 0)),
        scratch_shapes=[pltpu.VMEM((M, E), jnp.float32)],
    )
    return pl.pallas_call(
        kernel,
        out_shape=jax.ShapeDtypeStruct((batch, E), jnp.float32),
        grid_spec=grid_spec,
        compiler_params=pltpu.CompilerParams(
            dimension_semantics=("arbitrary",)),       # layers are sequential
    )(patches_padded, base, params["patch_w"],
      sw["wqkv"], sw["bqkv"], sw["wout"], sw["bout"],
      sw["ln1_g"], sw["ln1_b"], sw["w1"], sw["b1"],
      sw["w2"], sw["b2"], sw["ln2_g"], sw["ln2_b"],
      params["norm_g"].reshape(1, E), params["norm_b"].reshape(1, E),
      params["pos_w1"], params["pos_b1"].reshape(1, E))


# ----------------------------------------------------------------------------
# Parameters / glue
# ----------------------------------------------------------------------------
def get_sinusoid_encoding(n_position, d_hid):
    pos = np.arange(n_position, dtype=np.float64)[:, None]
    hid = np.arange(d_hid, dtype=np.float64)[None, :]
    angle = pos / np.power(10000.0, 2.0 * (np.floor(hid / 2.0)) / d_hid)
    table = np.zeros((n_position, d_hid), dtype=np.float64)
    table[:, 0::2] = np.sin(angle[:, 0::2])
    table[:, 1::2] = np.cos(angle[:, 1::2])
    return jnp.asarray(table[None], dtype=jnp.float32)   # (1, n_position, d_hid)


def init_params(key, cfg, num_patches):
    E = cfg["embed_dim"]
    FF = cfg["dim_feedforward"]
    depth = cfg["depth"]
    C, fs, ts = cfg["input_fmap"], cfg["fshape"], cfg["tshape"]
    K = C * fs * ts

    def w(k, shape, scale=0.02, dtype=jnp.bfloat16):
        return (scale * jax.random.normal(k, shape, jnp.float32)).astype(dtype)

    keys = jax.random.split(key, 8)
    p = {}
    # PatchEmbed: Conv2d(C, E, kernel=patch, stride=patch) == patches @ W + b
    p["patch_w"] = w(keys[0], (K, E))
    p["patch_b"] = jnp.zeros((E,), jnp.float32)
    p["cls_token"] = jnp.zeros((1, 1, E), jnp.float32)
    p["pos_embed"] = get_sinusoid_encoding(num_patches + 1, E)

    # stacked per-layer encoder weights (layer axis leading) -> one fused pallas_call
    p["stacked"] = dict(
        wqkv=w(keys[1], (depth, E, 3 * E)),
        bqkv=jnp.zeros((depth, 1, 3 * E), jnp.float32),
        wout=w(keys[2], (depth, E, E)),
        bout=jnp.zeros((depth, 1, E), jnp.float32),
        ln1_g=jnp.ones((depth, 1, E), jnp.float32),
        ln1_b=jnp.zeros((depth, 1, E), jnp.float32),
        w1=w(keys[3], (depth, E, FF)),
        b1=jnp.zeros((depth, 1, FF), jnp.float32),
        w2=w(keys[4], (depth, FF, E)),
        b2=jnp.zeros((depth, 1, E), jnp.float32),
        ln2_g=jnp.ones((depth, 1, E), jnp.float32),
        ln2_b=jnp.zeros((depth, 1, E), jnp.float32),
    )

    p["norm_g"] = jnp.ones((E,), jnp.float32)
    p["norm_b"] = jnp.zeros((E,), jnp.float32)
    # positioninglayer: Linear(E,E) -> ReLU -> Linear(E,2)
    p["pos_w1"] = w(keys[5], (E, E))
    p["pos_b1"] = jnp.zeros((E,), jnp.float32)
    p["pos_w2"] = w(keys[6], (E, 2), dtype=jnp.float32)
    p["pos_b2"] = jnp.zeros((2,), jnp.float32)
    return p


def forward(params, x, y_position, cfg, task="woFT_SingleBSLoc"):
    """x: (B, input_fmap, input_tdim, input_fdim), same convention as PyTorch forward."""
    if task not in ("woFT_SingleBSLoc", "FT_SingleBSLoc"):
        raise ValueError(f"Unsupported task in this Pallas port: {task}")

    # x.transpose(2, 3) in PyTorch -> (B, C, F, T)
    x = jnp.transpose(x, (0, 1, 3, 2))
    B, C, F, T = x.shape
    fs, ts = cfg["fshape"], cfg["tshape"]
    E = cfg["embed_dim"]
    Pf, Pt = F // fs, T // ts
    P = Pf * Pt
    S = P + 1                             # +CLS
    S_pad = -(-S // 8) * 8                # pad sequence to multiple of 8 (17 -> 24)
    M = B * S_pad
    K = C * fs * ts

    # PatchEmbed (stride==kernel conv): patch extraction via XLA reshape/transpose
    patches = (
        x.reshape(B, C, Pf, fs, Pt, ts)
        .transpose(0, 2, 4, 1, 3, 5)               # (B, Pf, Pt, C, fs, ts)
        .reshape(B, P, K)
    )
    # rows: [0]=CLS slot (zeros), [1..P]=patches, [P+1..]=sequence padding (zeros)
    patches_padded = jnp.pad(
        patches, ((0, 0), (1, S_pad - P - 1), (0, 0))).reshape(M, K)

    # additive base slab: CLS row = cls_token + pos[0]; token rows = pos + conv bias;
    # padded rows = 0 (padded keys masked out of softmax / pooling inside the kernel)
    pos = params["pos_embed"][0, :S, :]                               # (S, E)
    cls = params["cls_token"][0, 0]                                   # (E,)
    base = jnp.concatenate(
        [(cls + pos[0])[None, :],
         pos[1:] + params["patch_b"][None, :],
         jnp.zeros((S_pad - S, E), jnp.float32)], axis=0)             # (S_pad, E)
    base = jnp.broadcast_to(base[None], (B, S_pad, E)).reshape(M, E)

    # ONE fused pallas_call: patch-proj -> encoder stack -> LN -> pool -> Linear1+ReLU
    p1 = fused_forward(patches_padded, base, params, cfg, B, S_pad, S)  # (B, E)

    # 2-wide final linear + MSE in plain JAX (lane-sparse, not worth a kernel)
    pred = p1 @ params["pos_w2"] + params["pos_b2"]                     # (B, 2)
    mse = jnp.mean((pred - y_position) ** 2)
    return mse


# ----------------------------------------------------------------------------
if __name__ == "__main__":
    cfg = dict(
        embed_dim=128, depth=2, num_heads=4, dim_feedforward=256,
        input_fmap=2, input_fdim=16, input_tdim=16,
        fshape=4, tshape=4, fstride=4, tstride=4,
    )
    B = 2
    num_patches = (cfg["input_fdim"] // cfg["fshape"]) * (cfg["input_tdim"] // cfg["tshape"])

    key = jax.random.PRNGKey(0)
    kx, ky, kp = jax.random.split(key, 3)
    x = jax.random.normal(
        kx, (B, cfg["input_fmap"], cfg["input_tdim"], cfg["input_fdim"]), jnp.float32
    )
    y_position = jax.random.normal(ky, (B, 2), jnp.float32)
    params = init_params(kp, cfg, num_patches)

    fwd = jax.jit(functools.partial(forward, cfg=cfg, task="woFT_SingleBSLoc"))
    mse = fwd(params, x, y_position)
    jax.block_until_ready(mse)
    print("KERNEL_OK")
</pallas_src>

<mosaic_0001>
module attributes {stable_mosaic.version = 11 : i64} {
  func.func @_fused_forward_kernel(%arg0: i32, %arg1: memref<48x32xf32, #tpu.memory_space<vmem>>, %arg2: memref<48x128xf32, #tpu.memory_space<vmem>>, %arg3: memref<32x128xbf16, #tpu.memory_space<vmem>>, %arg4: memref<1x128x384xbf16, #tpu.memory_space<vmem>>, %arg5: memref<1x1x384xf32, #tpu.memory_space<vmem>>, %arg6: memref<1x128x128xbf16, #tpu.memory_space<vmem>>, %arg7: memref<1x1x128xf32, #tpu.memory_space<vmem>>, %arg8: memref<1x1x128xf32, #tpu.memory_space<vmem>>, %arg9: memref<1x1x128xf32, #tpu.memory_space<vmem>>, %arg10: memref<1x128x256xbf16, #tpu.memory_space<vmem>>, %arg11: memref<1x1x256xf32, #tpu.memory_space<vmem>>, %arg12: memref<1x256x128xbf16, #tpu.memory_space<vmem>>, %arg13: memref<1x1x128xf32, #tpu.memory_space<vmem>>, %arg14: memref<1x1x128xf32, #tpu.memory_space<vmem>>, %arg15: memref<1x1x128xf32, #tpu.memory_space<vmem>>, %arg16: memref<1x128xf32, #tpu.memory_space<vmem>>, %arg17: memref<1x128xf32, #tpu.memory_space<vmem>>, %arg18: memref<128x128xbf16, #tpu.memory_space<vmem>>, %arg19: memref<1x128xf32, #tpu.memory_space<vmem>>, %arg20: memref<2x128xf32, #tpu.memory_space<vmem>>, %arg21: memref<48x128xf32, #tpu.memory_space<vmem>>) attributes {dimension_semantics = [#tpu.dimension_semantics<arbitrary>], iteration_bounds = array<i64: 2>, scalar_prefetch = 0 : i64, scratch_operands = 1 : i64, tpu.core_type = #tpu.core_type<tc>, window_params = [{pipeline_mode = #tpu.pipeline_mode<synchronous>, transform_indices = @transform_0, window_bounds = array<i64: 48, 32>}, {pipeline_mode = #tpu.pipeline_mode<synchronous>, transform_indices = @transform_1, window_bounds = array<i64: 48, 128>}, {pipeline_mode = #tpu.pipeline_mode<synchronous>, transform_indices = @transform_2, window_bounds = array<i64: 32, 128>}, {transform_indices = @transform_3, window_bounds = array<i64: 1, 128, 384>}, {transform_indices = @transform_4, window_bounds = array<i64: 1, 1, 384>}, {transform_indices = @transform_5, window_bounds = array<i64: 1, 128, 128>}, {transform_indices = @transform_6, window_bounds = array<i64: 1, 1, 128>}, {transform_indices = @transform_7, window_bounds = array<i64: 1, 1, 128>}, {transform_indices = @transform_8, window_bounds = array<i64: 1, 1, 128>}, {transform_indices = @transform_9, window_bounds = array<i64: 1, 128, 256>}, {transform_indices = @transform_10, window_bounds = array<i64: 1, 1, 256>}, {transform_indices = @transform_11, window_bounds = array<i64: 1, 256, 128>}, {transform_indices = @transform_12, window_bounds = array<i64: 1, 1, 128>}, {transform_indices = @transform_13, window_bounds = array<i64: 1, 1, 128>}, {transform_indices = @transform_14, window_bounds = array<i64: 1, 1, 128>}, {pipeline_mode = #tpu.pipeline_mode<synchronous>, transform_indices = @transform_15, window_bounds = array<i64: 1, 128>}, {pipeline_mode = #tpu.pipeline_mode<synchronous>, transform_indices = @transform_16, window_bounds = array<i64: 1, 128>}, {pipeline_mode = #tpu.pipeline_mode<synchronous>, transform_indices = @transform_17, window_bounds = array<i64: 128, 128>}, {pipeline_mode = #tpu.pipeline_mode<synchronous>, transform_indices = @transform_18, window_bounds = array<i64: 1, 128>}, {pipeline_mode = #tpu.pipeline_mode<synchronous>, transform_indices = @transform_19, window_bounds = array<i64: 2, 128>}]} {
    %c0_i32 = arith.constant 0 : i32
    %0 = arith.cmpi eq, %arg0, %c0_i32 : i32
    %1 = arith.extui %0 : i1 to i32
    %c0_i32_0 = arith.constant 0 : i32
    %2 = arith.cmpi ne, %1, %c0_i32_0 : i32
    scf.if %2 {
      %c0_97 = arith.constant 0 : index
      %c0_98 = arith.constant 0 : index
      %295 = vector.load %arg1[%c0_97, %c0_98] : memref<48x32xf32, #tpu.memory_space<vmem>>, vector<48x32xf32>
      %296 = arith.truncf %295 : vector<48x32xf32> to vector<48x32xbf16>
      %c0_99 = arith.constant 0 : index
      %c0_100 = arith.constant 0 : index
      %297 = vector.load %arg3[%c0_99, %c0_100] : memref<32x128xbf16, #tpu.memory_space<vmem>>, vector<32x128xbf16>
      %cst_101 = arith.constant dense<0.000000e+00> : vector<48x128xf32>
      %298 = tpu.matmul %296, %297, %cst_101 {dimension_numbers = #tpu.dot_dimension_numbers<[1], [0], [0], [1], [0, 0, 1, 1], [], []>} : vector<48x32xbf16>, vector<32x128xbf16>, vector<48x128xf32> -> vector<48x128xf32>
      %c0_102 = arith.constant 0 : index
      %c0_103 = arith.constant 0 : index
      %299 = vector.load %arg2[%c0_102, %c0_103] : memref<48x128xf32, #tpu.memory_space<vmem>>, vector<48x128xf32>
      %300 = arith.addf %298, %299 : vector<48x128xf32>
      %c0_104 = arith.constant 0 : index
      %c0_105 = arith.constant 0 : index
      %301 = vector.load %arg21[%c0_104, %c0_105] : memref<48x128xf32, #tpu.memory_space<vmem>>, vector<48x128xf32>
      tpu.vector_store %arg21[%c0_104, %c0_105], %300 {strides = array<i32>} : memref<48x128xf32, #tpu.memory_space<vmem>>, vector<48x128xf32>,
    } else {
    }
    %c0 = arith.constant 0 : index
    %c0_1 = arith.constant 0 : index
    %3 = vector.load %arg21[%c0, %c0_1] : memref<48x128xf32, #tpu.memory_space<vmem>>, vector<48x128xf32>
    %4 = arith.truncf %3 : vector<48x128xf32> to vector<48x128xbf16>
    %c0_2 = arith.constant 0 : index
    %c0_3 = arith.constant 0 : index
    %c0_4 = arith.constant 0 : index
    %5 = vector.load %arg4[%c0_2, %c0_3, %c0_4] : memref<1x128x384xbf16, #tpu.memory_space<vmem>>, vector<1x128x384xbf16>
    %6 = vector.shape_cast %5 : vector<1x128x384xbf16> to vector<128x384xbf16>
    %cst = arith.constant dense<0.000000e+00> : vector<48x384xf32>
    %7 = tpu.matmul %4, %6, %cst {dimension_numbers = #tpu.dot_dimension_numbers<[1], [0], [0], [1], [0, 0, 1, 1], [], []>} : vector<48x128xbf16>, vector<128x384xbf16>, vector<48x384xf32> -> vector<48x384xf32>
    %c0_5 = arith.constant 0 : index
    %c0_6 = arith.constant 0 : index
    %c0_7 = arith.constant 0 : index
    %8 = vector.load %arg5[%c0_5, %c0_6, %c0_7] : memref<1x1x384xf32, #tpu.memory_space<vmem>>, vector<1x1x384xf32>
    %9 = vector.shape_cast %8 : vector<1x1x384xf32> to vector<1x384xf32>
    %10 = vector.broadcast %9 : vector<1x384xf32> to vector<48x384xf32>
    %11 = arith.addf %7, %10 : vector<48x384xf32>
    %12 = tpu.iota {dimensions = array<i32: 1>} : vector<1x24xi32>
    %c17_i32 = arith.constant 17 : i32
    %13 = vector.broadcast %c17_i32 : i32 to vector<1x24xi32>
    %14 = arith.cmpi slt, %12, %13 : vector<1x24xi32>
    %cst_8 = arith.constant 0.000000e+00 : f32
    %cst_9 = arith.constant -1.000000e+30 : f32
    %15 = vector.broadcast %cst_8 : f32 to vector<1x24xf32>
    %16 = vector.broadcast %cst_9 : f32 to vector<1x24xf32>
    %17 = arith.select %14, %15, %16 : vector<1x24xi1>, vector<1x24xf32>
    %18 = vector.extract_strided_slice %11 {offsets = [0, 0], sizes = [24, 384], strides = [1, 1]} : vector<48x384xf32> to vector<24x384xf32>
    %19 = vector.extract_strided_slice %18 {offsets = [0, 0], sizes = [24, 32], strides = [1, 1]} : vector<24x384xf32> to vector<24x32xf32>
    %20 = vector.extract_strided_slice %18 {offsets = [0, 128], sizes = [24, 32], strides = [1, 1]} : vector<24x384xf32> to vector<24x32xf32>
    %21 = vector.extract_strided_slice %18 {offsets = [0, 256], sizes = [24, 32], strides = [1, 1]} : vector<24x384xf32> to vector<24x32xf32>
    %22 = arith.truncf %19 : vector<24x32xf32> to vector<24x32xbf16>
    %23 = arith.truncf %20 : vector<24x32xf32> to vector<24x32xbf16>
    %24 = tpu.transpose %23, [1, 0] : vector<24x32xbf16> -> vector<32x24xbf16>
    %cst_10 = arith.constant dense<0.000000e+00> : vector<24x24xf32>
    %25 = tpu.matmul %22, %24, %cst_10 {dimension_numbers = #tpu.dot_dimension_numbers<[1], [0], [0], [1], [0, 0, 1, 1], [], []>} : vector<24x32xbf16>, vector<32x24xbf16>, vector<24x24xf32> -> vector<24x24xf32>
    %cst_11 = arith.constant 0.176776692 : f32
    %26 = vector.broadcast %cst_11 : f32 to vector<24x24xf32>
    %27 = arith.mulf %25, %26 : vector<24x24xf32>
    %28 = vector.broadcast %17 : vector<1x24xf32> to vector<24x24xf32>
    %29 = arith.addf %27, %28 : vector<24x24xf32>
    %cst_12 = arith.constant dense<0xFF800000> : vector<24xf32>
    %30 = vector.multi_reduction <maximumf>, %29, %cst_12 [1] : vector<24x24xf32> to vector<24xf32>
    %31 = vector.shape_cast %30 : vector<24xf32> to vector<24x1xf32>
    %32 = vector.broadcast %31 : vector<24x1xf32> to vector<24x24xf32>
    %33 = arith.subf %29, %32 : vector<24x24xf32>
    %34 = math.exp %33 : vector<24x24xf32>
    %cst_13 = arith.constant dense<0.000000e+00> : vector<24xf32>
    %35 = vector.multi_reduction <add>, %34, %cst_13 [1] : vector<24x24xf32> to vector<24xf32>
    %36 = vector.shape_cast %35 : vector<24xf32> to vector<24x1xf32>
    %37 = tpu.reciprocal %36 {approx = true} : vector<24x1xf32> -> vector<24x1xf32>
    %38 = vector.broadcast %37 : vector<24x1xf32> to vector<24x24xf32>
    %39 = arith.mulf %34, %38 : vector<24x24xf32>
    %40 = arith.truncf %39 : vector<24x24xf32> to vector<24x24xbf16>
    %41 = arith.truncf %21 : vector<24x32xf32> to vector<24x32xbf16>
    %cst_14 = arith.constant dense<0.000000e+00> : vector<24x32xf32>
    %42 = tpu.matmul %40, %41, %cst_14 {dimension_numbers = #tpu.dot_dimension_numbers<[1], [0], [0], [1], [0, 0, 1, 1], [], []>} : vector<24x24xbf16>, vector<24x32xbf16>, vector<24x32xf32> -> vector<24x32xf32>
    %43 = vector.extract_strided_slice %18 {offsets = [0, 32], sizes = [24, 32], strides = [1, 1]} : vector<24x384xf32> to vector<24x32xf32>
    %44 = vector.extract_strided_slice %18 {offsets = [0, 160], sizes = [24, 32], strides = [1, 1]} : vector<24x384xf32> to vector<24x32xf32>
    %45 = vector.extract_strided_slice %18 {offsets = [0, 288], sizes = [24, 32], strides = [1, 1]} : vector<24x384xf32> to vector<24x32xf32>
    %46 = arith.truncf %43 : vector<24x32xf32> to vector<24x32xbf16>
    %47 = arith.truncf %44 : vector<24x32xf32> to vector<24x32xbf16>
    %48 = tpu.transpose %47, [1, 0] : vector<24x32xbf16> -> vector<32x24xbf16>
    %cst_15 = arith.constant dense<0.000000e+00> : vector<24x24xf32>
    %49 = tpu.matmul %46, %48, %cst_15 {dimension_numbers = #tpu.dot_dimension_numbers<[1], [0], [0], [1], [0, 0, 1, 1], [], []>} : vector<24x32xbf16>, vector<32x24xbf16>, vector<24x24xf32> -> vector<24x24xf32>
    %cst_16 = arith.constant 0.176776692 : f32
    %50 = vector.broadcast %cst_16 : f32 to vector<24x24xf32>
    %51 = arith.mulf %49, %50 : vector<24x24xf32>
    %52 = vector.broadcast %17 : vector<1x24xf32> to vector<24x24xf32>
    %53 = arith.addf %51, %52 : vector<24x24xf32>
    %cst_17 = arith.constant dense<0xFF800000> : vector<24xf32>
    %54 = vector.multi_reduction <maximumf>, %53, %cst_17 [1] : vector<24x24xf32> to vector<24xf32>
    %55 = vector.shape_cast %54 : vector<24xf32> to vector<24x1xf32>
    %56 = vector.broadcast %55 : vector<24x1xf32> to vector<24x24xf32>
    %57 = arith.subf %53, %56 : vector<24x24xf32>
    %58 = math.exp %57 : vector<24x24xf32>
    %cst_18 = arith.constant dense<0.000000e+00> : vector<24xf32>
    %59 = vector.multi_reduction <add>, %58, %cst_18 [1] : vector<24x24xf32> to vector<24xf32>
    %60 = vector.shape_cast %59 : vector<24xf32> to vector<24x1xf32>
    %61 = tpu.reciprocal %60 {approx = true} : vector<24x1xf32> -> vector<24x1xf32>
    %62 = vector.broadcast %61 : vector<24x1xf32> to vector<24x24xf32>
    %63 = arith.mulf %58, %62 : vector<24x24xf32>
    %64 = arith.truncf %63 : vector<24x24xf32> to vector<24x24xbf16>
    %65 = arith.truncf %45 : vector<24x32xf32> to vector<24x32xbf16>
    %cst_19 = arith.constant dense<0.000000e+00> : vector<24x32xf32>
    %66 = tpu.matmul %64, %65, %cst_19 {dimension_numbers = #tpu.dot_dimension_numbers<[1], [0], [0], [1], [0, 0, 1, 1], [], []>} : vector<24x24xbf16>, vector<24x32xbf16>, vector<24x32xf32> -> vector<24x32xf32>
    %67 = vector.extract_strided_slice %18 {offsets = [0, 64], sizes = [24, 32], strides = [1, 1]} : vector<24x384xf32> to vector<24x32xf32>
    %68 = vector.extract_strided_slice %18 {offsets = [0, 192], sizes = [24, 32], strides = [1, 1]} : vector<24x384xf32> to vector<24x32xf32>
    %69 = vector.extract_strided_slice %18 {offsets = [0, 320], sizes = [24, 32], strides = [1, 1]} : vector<24x384xf32> to vector<24x32xf32>
    %70 = arith.truncf %67 : vector<24x32xf32> to vector<24x32xbf16>
    %71 = arith.truncf %68 : vector<24x32xf32> to vector<24x32xbf16>
    %72 = tpu.transpose %71, [1, 0] : vector<24x32xbf16> -> vector<32x24xbf16>
    %cst_20 = arith.constant dense<0.000000e+00> : vector<24x24xf32>
    %73 = tpu.matmul %70, %72, %cst_20 {dimension_numbers = #tpu.dot_dimension_numbers<[1], [0], [0], [1], [0, 0, 1, 1], [], []>} : vector<24x32xbf16>, vector<32x24xbf16>, vector<24x24xf32> -> vector<24x24xf32>
    %cst_21 = arith.constant 0.176776692 : f32
    %74 = vector.broadcast %cst_21 : f32 to vector<24x24xf32>
    %75 = arith.mulf %73, %74 : vector<24x24xf32>
    %76 = vector.broadcast %17 : vector<1x24xf32> to vector<24x24xf32>
    %77 = arith.addf %75, %76 : vector<24x24xf32>
    %cst_22 = arith.constant dense<0xFF800000> : vector<24xf32>
    %78 = vector.multi_reduction <maximumf>, %77, %cst_22 [1] : vector<24x24xf32> to vector<24xf32>
    %79 = vector.shape_cast %78 : vector<24xf32> to vector<24x1xf32>
    %80 = vector.broadcast %79 : vector<24x1xf32> to vector<24x24xf32>
    %81 = arith.subf %77, %80 : vector<24x24xf32>
    %82 = math.exp %81 : vector<24x24xf32>
    %cst_23 = arith.constant dense<0.000000e+00> : vector<24xf32>
    %83 = vector.multi_reduction <add>, %82, %cst_23 [1] : vector<24x24xf32> to vector<24xf32>
    %84 = vector.shape_cast %83 : vector<24xf32> to vector<24x1xf32>
    %85 = tpu.reciprocal %84 {approx = true} : vector<24x1xf32> -> vector<24x1xf32>
    %86 = vector.broadcast %85 : vector<24x1xf32> to vector<24x24xf32>
    %87 = arith.mulf %82, %86 : vector<24x24xf32>
    %88 = arith.truncf %87 : vector<24x24xf32> to vector<24x24xbf16>
    %89 = arith.truncf %69 : vector<24x32xf32> to vector<24x32xbf16>
    %cst_24 = arith.constant dense<0.000000e+00> : vector<24x32xf32>
    %90 = tpu.matmul %88, %89, %cst_24 {dimension_numbers = #tpu.dot_dimension_numbers<[1], [0], [0], [1], [0, 0, 1, 1], [], []>} : vector<24x24xbf16>, vector<24x32xbf16>, vector<24x32xf32> -> vector<24x32xf32>
    %91 = vector.extract_strided_slice %18 {offsets = [0, 96], sizes = [24, 32], strides = [1, 1]} : vector<24x384xf32> to vector<24x32xf32>
    %92 = vector.extract_strided_slice %18 {offsets = [0, 224], sizes = [24, 32], strides = [1, 1]} : vector<24x384xf32> to vector<24x32xf32>
    %93 = vector.extract_strided_slice %18 {offsets = [0, 352], sizes = [24, 32], strides = [1, 1]} : vector<24x384xf32> to vector<24x32xf32>
    %94 = arith.truncf %91 : vector<24x32xf32> to vector<24x32xbf16>
    %95 = arith.truncf %92 : vector<24x32xf32> to vector<24x32xbf16>
    %96 = tpu.transpose %95, [1, 0] : vector<24x32xbf16> -> vector<32x24xbf16>
    %cst_25 = arith.constant dense<0.000000e+00> : vector<24x24xf32>
    %97 = tpu.matmul %94, %96, %cst_25 {dimension_numbers = #tpu.dot_dimension_numbers<[1], [0], [0], [1], [0, 0, 1, 1], [], []>} : vector<24x32xbf16>, vector<32x24xbf16>, vector<24x24xf32> -> vector<24x24xf32>
    %cst_26 = arith.constant 0.176776692 : f32
    %98 = vector.broadcast %cst_26 : f32 to vector<24x24xf32>
    %99 = arith.mulf %97, %98 : vector<24x24xf32>
    %100 = vector.broadcast %17 : vector<1x24xf32> to vector<24x24xf32>
    %101 = arith.addf %99, %100 : vector<24x24xf32>
    %cst_27 = arith.constant dense<0xFF800000> : vector<24xf32>
    %102 = vector.multi_reduction <maximumf>, %101, %cst_27 [1] : vector<24x24xf32> to vector<24xf32>
    %103 = vector.shape_cast %102 : vector<24xf32> to vector<24x1xf32>
    %104 = vector.broadcast %103 : vector<24x1xf32> to vector<24x24xf32>
    %105 = arith.subf %101, %104 : vector<24x24xf32>
    %106 = math.exp %105 : vector<24x24xf32>
    %cst_28 = arith.constant dense<0.000000e+00> : vector<24xf32>
    %107 = vector.multi_reduction <add>, %106, %cst_28 [1] : vector<24x24xf32> to vector<24xf32>
    %108 = vector.shape_cast %107 : vector<24xf32> to vector<24x1xf32>
    %109 = tpu.reciprocal %108 {approx = true} : vector<24x1xf32> -> vector<24x1xf32>
    %110 = vector.broadcast %109 : vector<24x1xf32> to vector<24x24xf32>
    %111 = arith.mulf %106, %110 : vector<24x24xf32>
    %112 = arith.truncf %111 : vector<24x24xf32> to vector<24x24xbf16>
    %113 = arith.truncf %93 : vector<24x32xf32> to vector<24x32xbf16>
    %cst_29 = arith.constant dense<0.000000e+00> : vector<24x32xf32>
    %114 = tpu.matmul %112, %113, %cst_29 {dimension_numbers = #tpu.dot_dimension_numbers<[1], [0], [0], [1], [0, 0, 1, 1], [], []>} : vector<24x24xbf16>, vector<24x32xbf16>, vector<24x32xf32> -> vector<24x32xf32>
    %115 = tpu.concatenate %42, %66, %90, %114 in 1 : vector<24x32xf32>, vector<24x32xf32>, vector<24x32xf32>, vector<24x32xf32> -> vector<24x128xf32>
    %116 = vector.extract_strided_slice %11 {offsets = [24, 0], sizes = [24, 384], strides = [1, 1]} : vector<48x384xf32> to vector<24x384xf32>
    %117 = vector.extract_strided_slice %116 {offsets = [0, 0], sizes = [24, 32], strides = [1, 1]} : vector<24x384xf32> to vector<24x32xf32>
    %118 = vector.extract_strided_slice %116 {offsets = [0, 128], sizes = [24, 32], strides = [1, 1]} : vector<24x384xf32> to vector<24x32xf32>
    %119 = vector.extract_strided_slice %116 {offsets = [0, 256], sizes = [24, 32], strides = [1, 1]} : vector<24x384xf32> to vector<24x32xf32>
    %120 = arith.truncf %117 : vector<24x32xf32> to vector<24x32xbf16>
    %121 = arith.truncf %118 : vector<24x32xf32> to vector<24x32xbf16>
    %122 = tpu.transpose %121, [1, 0] : vector<24x32xbf16> -> vector<32x24xbf16>
    %cst_30 = arith.constant dense<0.000000e+00> : vector<24x24xf32>
    %123 = tpu.matmul %120, %122, %cst_30 {dimension_numbers = #tpu.dot_dimension_numbers<[1], [0], [0], [1], [0, 0, 1, 1], [], []>} : vector<24x32xbf16>, vector<32x24xbf16>, vector<24x24xf32> -> vector<24x24xf32>
    %cst_31 = arith.constant 0.176776692 : f32
    %124 = vector.broadcast %cst_31 : f32 to vector<24x24xf32>
    %125 = arith.mulf %123, %124 : vector<24x24xf32>
    %126 = vector.broadcast %17 : vector<1x24xf32> to vector<24x24xf32>
    %127 = arith.addf %125, %126 : vector<24x24xf32>
    %cst_32 = arith.constant dense<0xFF800000> : vector<24xf32>
    %128 = vector.multi_reduction <maximumf>, %127, %cst_32 [1] : vector<24x24xf32> to vector<24xf32>
    %129 = vector.shape_cast %128 : vector<24xf32> to vector<24x1xf32>
    %130 = vector.broadcast %129 : vector<24x1xf32> to vector<24x24xf32>
    %131 = arith.subf %127, %130 : vector<24x24xf32>
    %132 = math.exp %131 : vector<24x24xf32>
    %cst_33 = arith.constant dense<0.000000e+00> : vector<24xf32>
    %133 = vector.multi_reduction <add>, %132, %cst_33 [1] : vector<24x24xf32> to vector<24xf32>
    %134 = vector.shape_cast %133 : vector<24xf32> to vector<24x1xf32>
    %135 = tpu.reciprocal %134 {approx = true} : vector<24x1xf32> -> vector<24x1xf32>
    %136 = vector.broadcast %135 : vector<24x1xf32> to vector<24x24xf32>
    %137 = arith.mulf %132, %136 : vector<24x24xf32>
    %138 = arith.truncf %137 : vector<24x24xf32> to vector<24x24xbf16>
    %139 = arith.truncf %119 : vector<24x32xf32> to vector<24x32xbf16>
    %cst_34 = arith.constant dense<0.000000e+00> : vector<24x32xf32>
    %140 = tpu.matmul %138, %139, %cst_34 {dimension_numbers = #tpu.dot_dimension_numbers<[1], [0], [0], [1], [0, 0, 1, 1], [], []>} : vector<24x24xbf16>, vector<24x32xbf16>, vector<24x32xf32> -> vector<24x32xf32>
    %141 = vector.extract_strided_slice %116 {offsets = [0, 32], sizes = [24, 32], strides = [1, 1]} : vector<24x384xf32> to vector<24x32xf32>
    %142 = vector.extract_strided_slice %116 {offsets = [0, 160], sizes = [24, 32], strides = [1, 1]} : vector<24x384xf32> to vector<24x32xf32>
    %143 = vector.extract_strided_slice %116 {offsets = [0, 288], sizes = [24, 32], strides = [1, 1]} : vector<24x384xf32> to vector<24x32xf32>
    %144 = arith.truncf %141 : vector<24x32xf32> to vector<24x32xbf16>
    %145 = arith.truncf %142 : vector<24x32xf32> to vector<24x32xbf16>
    %146 = tpu.transpose %145, [1, 0] : vector<24x32xbf16> -> vector<32x24xbf16>
    %cst_35 = arith.constant dense<0.000000e+00> : vector<24x24xf32>
    %147 = tpu.matmul %144, %146, %cst_35 {dimension_numbers = #tpu.dot_dimension_numbers<[1], [0], [0], [1], [0, 0, 1, 1], [], []>} : vector<24x32xbf16>, vector<32x24xbf16>, vector<24x24xf32> -> vector<24x24xf32>
    %cst_36 = arith.constant 0.176776692 : f32
    %148 = vector.broadcast %cst_36 : f32 to vector<24x24xf32>
    %149 = arith.mulf %147, %148 : vector<24x24xf32>
    %150 = vector.broadcast %17 : vector<1x24xf32> to vector<24x24xf32>
    %151 = arith.addf %149, %150 : vector<24x24xf32>
    %cst_37 = arith.constant dense<0xFF800000> : vector<24xf32>
    %152 = vector.multi_reduction <maximumf>, %151, %cst_37 [1] : vector<24x24xf32> to vector<24xf32>
    %153 = vector.shape_cast %152 : vector<24xf32> to vector<24x1xf32>
    %154 = vector.broadcast %153 : vector<24x1xf32> to vector<24x24xf32>
    %155 = arith.subf %151, %154 : vector<24x24xf32>
    %156 = math.exp %155 : vector<24x24xf32>
    %cst_38 = arith.constant dense<0.000000e+00> : vector<24xf32>
    %157 = vector.multi_reduction <add>, %156, %cst_38 [1] : vector<24x24xf32> to vector<24xf32>
    %158 = vector.shape_cast %157 : vector<24xf32> to vector<24x1xf32>
    %159 = tpu.reciprocal %158 {approx = true} : vector<24x1xf32> -> vector<24x1xf32>
    %160 = vector.broadcast %159 : vector<24x1xf32> to vector<24x24xf32>
    %161 = arith.mulf %156, %160 : vector<24x24xf32>
    %162 = arith.truncf %161 : vector<24x24xf32> to vector<24x24xbf16>
    %163 = arith.truncf %143 : vector<24x32xf32> to vector<24x32xbf16>
    %cst_39 = arith.constant dense<0.000000e+00> : vector<24x32xf32>
    %164 = tpu.matmul %162, %163, %cst_39 {dimension_numbers = #tpu.dot_dimension_numbers<[1], [0], [0], [1], [0, 0, 1, 1], [], []>} : vector<24x24xbf16>, vector<24x32xbf16>, vector<24x32xf32> -> vector<24x32xf32>
    %165 = vector.extract_strided_slice %116 {offsets = [0, 64], sizes = [24, 32], strides = [1, 1]} : vector<24x384xf32> to vector<24x32xf32>
    %166 = vector.extract_strided_slice %116 {offsets = [0, 192], sizes = [24, 32], strides = [1, 1]} : vector<24x384xf32> to vector<24x32xf32>
    %167 = vector.extract_strided_slice %116 {offsets = [0, 320], sizes = [24, 32], strides = [1, 1]} : vector<24x384xf32> to vector<24x32xf32>
    %168 = arith.truncf %165 : vector<24x32xf32> to vector<24x32xbf16>
    %169 = arith.truncf %166 : vector<24x32xf32> to vector<24x32xbf16>
    %170 = tpu.transpose %169, [1, 0] : vector<24x32xbf16> -> vector<32x24xbf16>
    %cst_40 = arith.constant dense<0.000000e+00> : vector<24x24xf32>
    %171 = tpu.matmul %168, %170, %cst_40 {dimension_numbers = #tpu.dot_dimension_numbers<[1], [0], [0], [1], [0, 0, 1, 1], [], []>} : vector<24x32xbf16>, vector<32x24xbf16>, vector<24x24xf32> -> vector<24x24xf32>
    %cst_41 = arith.constant 0.176776692 : f32
    %172 = vector.broadcast %cst_41 : f32 to vector<24x24xf32>
    %173 = arith.mulf %171, %172 : vector<24x24xf32>
    %174 = vector.broadcast %17 : vector<1x24xf32> to vector<24x24xf32>
    %175 = arith.addf %173, %174 : vector<24x24xf32>
    %cst_42 = arith.constant dense<0xFF800000> : vector<24xf32>
    %176 = vector.multi_reduction <maximumf>, %175, %cst_42 [1] : vector<24x24xf32> to vector<24xf32>
    %177 = vector.shape_cast %176 : vector<24xf32> to vector<24x1xf32>
    %178 = vector.broadcast %177 : vector<24x1xf32> to vector<24x24xf32>
    %179 = arith.subf %175, %178 : vector<24x24xf32>
    %180 = math.exp %179 : vector<24x24xf32>
    %cst_43 = arith.constant dense<0.000000e+00> : vector<24xf32>
    %181 = vector.multi_reduction <add>, %180, %cst_43 [1] : vector<24x24xf32> to vector<24xf32>
    %182 = vector.shape_cast %181 : vector<24xf32> to vector<24x1xf32>
    %183 = tpu.reciprocal %182 {approx = true} : vector<24x1xf32> -> vector<24x1xf32>
    %184 = vector.broadcast %183 : vector<24x1xf32> to vector<24x24xf32>
    %185 = arith.mulf %180, %184 : vector<24x24xf32>
    %186 = arith.truncf %185 : vector<24x24xf32> to vector<24x24xbf16>
    %187 = arith.truncf %167 : vector<24x32xf32> to vector<24x32xbf16>
    %cst_44 = arith.constant dense<0.000000e+00> : vector<24x32xf32>
    %188 = tpu.matmul %186, %187, %cst_44 {dimension_numbers = #tpu.dot_dimension_numbers<[1], [0], [0], [1], [0, 0, 1, 1], [], []>} : vector<24x24xbf16>, vector<24x32xbf16>, vector<24x32xf32> -> vector<24x32xf32>
    %189 = vector.extract_strided_slice %116 {offsets = [0, 96], sizes = [24, 32], strides = [1, 1]} : vector<24x384xf32> to vector<24x32xf32>
    %190 = vector.extract_strided_slice %116 {offsets = [0, 224], sizes = [24, 32], strides = [1, 1]} : vector<24x384xf32> to vector<24x32xf32>
    %191 = vector.extract_strided_slice %116 {offsets = [0, 352], sizes = [24, 32], strides = [1, 1]} : vector<24x384xf32> to vector<24x32xf32>
    %192 = arith.truncf %189 : vector<24x32xf32> to vector<24x32xbf16>
    %193 = arith.truncf %190 : vector<24x32xf32> to vector<24x32xbf16>
    %194 = tpu.transpose %193, [1, 0] : vector<24x32xbf16> -> vector<32x24xbf16>
    %cst_45 = arith.constant dense<0.000000e+00> : vector<24x24xf32>
    %195 = tpu.matmul %192, %194, %cst_45 {dimension_numbers = #tpu.dot_dimension_numbers<[1], [0], [0], [1], [0, 0, 1, 1], [], []>} : vector<24x32xbf16>, vector<32x24xbf16>, vector<24x24xf32> -> vector<24x24xf32>
    %cst_46 = arith.constant 0.176776692 : f32
    %196 = vector.broadcast %cst_46 : f32 to vector<24x24xf32>
    %197 = arith.mulf %195, %196 : vector<24x24xf32>
    %198 = vector.broadcast %17 : vector<1x24xf32> to vector<24x24xf32>
    %199 = arith.addf %197, %198 : vector<24x24xf32>
    %cst_47 = arith.constant dense<0xFF800000> : vector<24xf32>
    %200 = vector.multi_reduction <maximumf>, %199, %cst_47 [1] : vector<24x24xf32> to vector<24xf32>
    %201 = vector.shape_cast %200 : vector<24xf32> to vector<24x1xf32>
    %202 = vector.broadcast %201 : vector<24x1xf32> to vector<24x24xf32>
    %203 = arith.subf %199, %202 : vector<24x24xf32>
    %204 = math.exp %203 : vector<24x24xf32>
    %cst_48 = arith.constant dense<0.000000e+00> : vector<24xf32>
    %205 = vector.multi_reduction <add>, %204, %cst_48 [1] : vector<24x24xf32> to vector<24xf32>
    %206 = vector.shape_cast %205 : vector<24xf32> to vector<24x1xf32>
    %207 = tpu.reciprocal %206 {approx = true} : vector<24x1xf32> -> vector<24x1xf32>
    %208 = vector.broadcast %207 : vector<24x1xf32> to vector<24x24xf32>
    %209 = arith.mulf %204, %208 : vector<24x24xf32>
    %210 = arith.truncf %209 : vector<24x24xf32> to vector<24x24xbf16>
    %211 = arith.truncf %191 : vector<24x32xf32> to vector<24x32xbf16>
    %cst_49 = arith.constant dense<0.000000e+00> : vector<24x32xf32>
    %212 = tpu.matmul %210, %211, %cst_49 {dimension_numbers = #tpu.dot_dimension_numbers<[1], [0], [0], [1], [0, 0, 1, 1], [], []>} : vector<24x24xbf16>, vector<24x32xbf16>, vector<24x32xf32> -> vector<24x32xf32>
    %213 = tpu.concatenate %140, %164, %188, %212 in 1 : vector<24x32xf32>, vector<24x32xf32>, vector<24x32xf32>, vector<24x32xf32> -> vector<24x128xf32>
    %214 = tpu.concatenate %115, %213 in 0 : vector<24x128xf32>, vector<24x128xf32> -> vector<48x128xf32>
    %215 = arith.truncf %214 : vector<48x128xf32> to vector<48x128xbf16>
    %c0_50 = arith.constant 0 : index
    %c0_51 = arith.constant 0 : index
    %c0_52 = arith.constant 0 : index
    %216 = vector.load %arg6[%c0_50, %c0_51, %c0_52] : memref<1x128x128xbf16, #tpu.memory_space<vmem>>, vector<1x128x128xbf16>
    %217 = vector.shape_cast %216 : vector<1x128x128xbf16> to vector<128x128xbf16>
    %cst_53 = arith.constant dense<0.000000e+00> : vector<48x128xf32>
    %218 = tpu.matmul %215, %217, %cst_53 {dimension_numbers = #tpu.dot_dimension_numbers<[1], [0], [0], [1], [0, 0, 1, 1], [], []>} : vector<48x128xbf16>, vector<128x128xbf16>, vector<48x128xf32> -> vector<48x128xf32>
    %c0_54 = arith.constant 0 : index
    %c0_55 = arith.constant 0 : index
    %c0_56 = arith.constant 0 : index
    %219 = vector.load %arg7[%c0_54, %c0_55, %c0_56] : memref<1x1x128xf32, #tpu.memory_space<vmem>>, vector<1x1x128xf32>
    %220 = vector.shape_cast %219 : vector<1x1x128xf32> to vector<1x128xf32>
    %221 = vector.broadcast %220 : vector<1x128xf32> to vector<48x128xf32>
    %222 = arith.addf %218, %221 : vector<48x128xf32>
    %223 = arith.addf %3, %222 : vector<48x128xf32>
    %c0_57 = arith.constant 0 : index
    %c0_58 = arith.constant 0 : index
    %c0_59 = arith.constant 0 : index
    %224 = vector.load %arg8[%c0_57, %c0_58, %c0_59] : memref<1x1x128xf32, #tpu.memory_space<vmem>>, vector<1x1x128xf32>
    %225 = vector.shape_cast %224 : vector<1x1x128xf32> to vector<1x128xf32>
    %c0_60 = arith.constant 0 : index
    %c0_61 = arith.constant 0 : index
    %c0_62 = arith.constant 0 : index
    %226 = vector.load %arg9[%c0_60, %c0_61, %c0_62] : memref<1x1x128xf32, #tpu.memory_space<vmem>>, vector<1x1x128xf32>
    %227 = vector.shape_cast %226 : vector<1x1x128xf32> to vector<1x128xf32>
    %cst_63 = arith.constant dense<0.000000e+00> : vector<48xf32>
    %228 = vector.multi_reduction <add>, %223, %cst_63 [1] : vector<48x128xf32> to vector<48xf32>
    %229 = vector.shape_cast %228 : vector<48xf32> to vector<48x1xf32>
    %cst_64 = arith.constant 1.280000e+02 : f32
    %230 = vector.broadcast %cst_64 : f32 to vector<48x1xf32>
    %231 = arith.divf %229, %230 : vector<48x1xf32>
    %232 = vector.broadcast %231 : vector<48x1xf32> to vector<48x128xf32>
    %233 = arith.subf %223, %232 : vector<48x128xf32>
    %234 = arith.mulf %233, %233 : vector<48x128xf32>
    %cst_65 = arith.constant dense<0.000000e+00> : vector<48xf32>
    %235 = vector.multi_reduction <add>, %234, %cst_65 [1] : vector<48x128xf32> to vector<48xf32>
    %236 = vector.shape_cast %235 : vector<48xf32> to vector<48x1xf32>
    %cst_66 = arith.constant 1.280000e+02 : f32
    %237 = vector.broadcast %cst_66 : f32 to vector<48x1xf32>
    %238 = arith.divf %236, %237 : vector<48x1xf32>
    %cst_67 = arith.constant 9.99999974E-6 : f32
    %239 = vector.broadcast %cst_67 : f32 to vector<48x1xf32>
    %240 = arith.addf %238, %239 : vector<48x1xf32>
    %241 = math.rsqrt %240 : vector<48x1xf32>
    %242 = vector.broadcast %241 : vector<48x1xf32> to vector<48x128xf32>
    %243 = arith.mulf %233, %242 : vector<48x128xf32>
    %244 = vector.broadcast %225 : vector<1x128xf32> to vector<48x128xf32>
    %245 = arith.mulf %243, %244 : vector<48x128xf32>
    %246 = vector.broadcast %227 : vector<1x128xf32> to vector<48x128xf32>
    %247 = arith.addf %245, %246 : vector<48x128xf32>
    %248 = arith.truncf %247 : vector<48x128xf32> to vector<48x128xbf16>
    %c0_68 = arith.constant 0 : index
    %c0_69 = arith.constant 0 : index
    %c0_70 = arith.constant 0 : index
    %249 = vector.load %arg10[%c0_68, %c0_69, %c0_70] : memref<1x128x256xbf16, #tpu.memory_space<vmem>>, vector<1x128x256xbf16>
    %250 = vector.shape_cast %249 : vector<1x128x256xbf16> to vector<128x256xbf16>
    %cst_71 = arith.constant dense<0.000000e+00> : vector<48x256xf32>
    %251 = tpu.matmul %248, %250, %cst_71 {dimension_numbers = #tpu.dot_dimension_numbers<[1], [0], [0], [1], [0, 0, 1, 1], [], []>} : vector<48x128xbf16>, vector<128x256xbf16>, vector<48x256xf32> -> vector<48x256xf32>
    %c0_72 = arith.constant 0 : index
    %c0_73 = arith.constant 0 : index
    %c0_74 = arith.constant 0 : index
    %252 = vector.load %arg11[%c0_72, %c0_73, %c0_74] : memref<1x1x256xf32, #tpu.memory_space<vmem>>, vector<1x1x256xf32>
    %253 = vector.shape_cast %252 : vector<1x1x256xf32> to vector<1x256xf32>
    %254 = vector.broadcast %253 : vector<1x256xf32> to vector<48x256xf32>
    %255 = arith.addf %251, %254 : vector<48x256xf32>
    %cst_75 = arith.constant 0.000000e+00 : f32
    %256 = vector.broadcast %cst_75 : f32 to vector<48x256xf32>
    %257 = arith.maximumf %255, %256 : vector<48x256xf32>
    %258 = arith.truncf %257 : vector<48x256xf32> to vector<48x256xbf16>
    %c0_76 = arith.constant 0 : index
    %c0_77 = arith.constant 0 : index
    %c0_78 = arith.constant 0 : index
    %259 = vector.load %arg12[%c0_76, %c0_77, %c0_78] : memref<1x256x128xbf16, #tpu.memory_space<vmem>>, vector<1x256x128xbf16>
    %260 = vector.shape_cast %259 : vector<1x256x128xbf16> to vector<256x128xbf16>
    %cst_79 = arith.constant dense<0.000000e+00> : vector<48x128xf32>
    %261 = tpu.matmul %258, %260, %cst_79 {dimension_numbers = #tpu.dot_dimension_numbers<[1], [0], [0], [1], [0, 0, 1, 1], [], []>} : vector<48x256xbf16>, vector<256x128xbf16>, vector<48x128xf32> -> vector<48x128xf32>
    %c0_80 = arith.constant 0 : index
    %c0_81 = arith.constant 0 : index
    %c0_82 = arith.constant 0 : index
    %262 = vector.load %arg13[%c0_80, %c0_81, %c0_82] : memref<1x1x128xf32, #tpu.memory_space<vmem>>, vector<1x1x128xf32>
    %263 = vector.shape_cast %262 : vector<1x1x128xf32> to vector<1x128xf32>
    %264 = vector.broadcast %263 : vector<1x128xf32> to vector<48x128xf32>
    %265 = arith.addf %261, %264 : vector<48x128xf32>
    %266 = arith.addf %247, %265 : vector<48x128xf32>
    %c0_83 = arith.constant 0 : index
    %c0_84 = arith.constant 0 : index
    %c0_85 = arith.constant 0 : index
    %267 = vector.load %arg14[%c0_83, %c0_84, %c0_85] : memref<1x1x128xf32, #tpu.memory_space<vmem>>, vector<1x1x128xf32>
    %268 = vector.shape_cast %267 : vector<1x1x128xf32> to vector<1x128xf32>
    %c0_86 = arith.constant 0 : index
    %c0_87 = arith.constant 0 : index
    %c0_88 = arith.constant 0 : index
    %269 = vector.load %arg15[%c0_86, %c0_87, %c0_88] : memref<1x1x128xf32, #tpu.memory_space<vmem>>, vector<1x1x128xf32>
    %270 = vector.shape_cast %269 : vector<1x1x128xf32> to vector<1x128xf32>
    %cst_89 = arith.constant dense<0.000000e+00> : vector<48xf32>
    %271 = vector.multi_reduction <add>, %266, %cst_89 [1] : vector<48x128xf32> to vector<48xf32>
    %272 = vector.shape_cast %271 : vector<48xf32> to vector<48x1xf32>
    %cst_90 = arith.constant 1.280000e+02 : f32
    %273 = vector.broadcast %cst_90 : f32 to vector<48x1xf32>
    %274 = arith.divf %272, %273 : vector<48x1xf32>
    %275 = vector.broadcast %274 : vector<48x1xf32> to vector<48x128xf32>
    %276 = arith.subf %266, %275 : vector<48x128xf32>
    %277 = arith.mulf %276, %276 : vector<48x128xf32>
    %cst_91 = arith.constant dense<0.000000e+00> : vector<48xf32>
    %278 = vector.multi_reduction <add>, %277, %cst_91 [1] : vector<48x128xf32> to vector<48xf32>
    %279 = vector.shape_cast %278 : vector<48xf32> to vector<48x1xf32>
    %cst_92 = arith.constant 1.280000e+02 : f32
    %280 = vector.broadcast %cst_92 : f32 to vector<48x1xf32>
    %281 = arith.divf %279, %280 : vector<48x1xf32>
    %cst_93 = arith.constant 9.99999974E-6 : f32
    %282 = vector.broadcast %cst_93 : f32 to vector<48x1xf32>
    %283 = arith.addf %281, %282 : vector<48x1xf32>
    %284 = math.rsqrt %283 : vector<48x1xf32>
    %285 = vector.broadcast %284 : vector<48x1xf32> to vector<48x128xf32>
    %286 = arith.mulf %276, %285 : vector<48x128xf32>
    %287 = vector.broadcast %268 : vector<1x128xf32> to vector<48x128xf32>
    %288 = arith.mulf %286, %287 : vector<48x128xf32>
    %289 = vector.broadcast %270 : vector<1x128xf32> to vector<48x128xf32>
    %290 = arith.addf %288, %289 : vector<48x128xf32>
    %c0_94 = arith.constant 0 : index
    %c0_95 = arith.constant 0 : index
    %291 = vector.load %arg21[%c0_94, %c0_95] : memref<48x128xf32, #tpu.memory_space<vmem>>, vector<48x128xf32>
    tpu.vector_store %arg21[%c0_94, %c0_95], %290 {strides = array<i32>} : memref<48x128xf32, #tpu.memory_space<vmem>>, vector<48x128xf32>,
    %c1_i32 = arith.constant 1 : i32
    %292 = arith.cmpi eq, %arg0, %c1_i32 : i32
    %293 = arith.extui %292 : i1 to i32
    %c0_i32_96 = arith.constant 0 : i32
    %294 = arith.cmpi ne, %293, %c0_i32_96 : i32
    scf.if %294 {
      %c0_97 = arith.constant 0 : index
      %c0_98 = arith.constant 0 : index
      %295 = vector.load %arg16[%c0_97, %c0_98] : memref<1x128xf32, #tpu.memory_space<vmem>>, vector<1x128xf32>
      %c0_99 = arith.constant 0 : index
      %c0_100 = arith.constant 0 : index
      %296 = vector.load %arg17[%c0_99, %c0_100] : memref<1x128xf32, #tpu.memory_space<vmem>>, vector<1x128xf32>
      %cst_101 = arith.constant dense<0.000000e+00> : vector<48xf32>
      %297 = vector.multi_reduction <add>, %290, %cst_101 [1] : vector<48x128xf32> to vector<48xf32>
      %298 = vector.shape_cast %297 : vector<48xf32> to vector<48x1xf32>
      %cst_102 = arith.constant 1.280000e+02 : f32
      %299 = vector.broadcast %cst_102 : f32 to vector<48x1xf32>
      %300 = arith.divf %298, %299 : vector<48x1xf32>
      %301 = vector.broadcast %300 : vector<48x1xf32> to vector<48x128xf32>
      %302 = arith.subf %290, %301 : vector<48x128xf32>
      %303 = arith.mulf %302, %302 : vector<48x128xf32>
      %cst_103 = arith.constant dense<0.000000e+00> : vector<48xf32>
      %304 = vector.multi_reduction <add>, %303, %cst_103 [1] : vector<48x128xf32> to vector<48xf32>
      %305 = vector.shape_cast %304 : vector<48xf32> to vector<48x1xf32>
      %cst_104 = arith.constant 1.280000e+02 : f32
      %306 = vector.broadcast %cst_104 : f32 to vector<48x1xf32>
      %307 = arith.divf %305, %306 : vector<48x1xf32>
      %cst_105 = arith.constant 9.99999974E-6 : f32
      %308 = vector.broadcast %cst_105 : f32 to vector<48x1xf32>
      %309 = arith.addf %307, %308 : vector<48x1xf32>
      %310 = math.rsqrt %309 : vector<48x1xf32>
      %311 = vector.broadcast %310 : vector<48x1xf32> to vector<48x128xf32>
      %312 = arith.mulf %302, %311 : vector<48x128xf32>
      %313 = vector.broadcast %295 : vector<1x128xf32> to vector<48x128xf32>
      %314 = arith.mulf %312, %313 : vector<48x128xf32>
      %315 = vector.broadcast %296 : vector<1x128xf32> to vector<48x128xf32>
      %316 = arith.addf %314, %315 : vector<48x128xf32>
      %317 = vector.extract_strided_slice %316 {offsets = [0, 0], sizes = [17, 128], strides = [1, 1]} : vector<48x128xf32> to vector<17x128xf32>
      %cst_106 = arith.constant dense<0.000000e+00> : vector<128xf32>
      %318 = vector.multi_reduction <add>, %317, %cst_106 [0] : vector<17x128xf32> to vector<128xf32>
      %319 = vector.shape_cast %318 : vector<128xf32> to vector<1x128xf32>
      %cst_107 = arith.constant 0.0588235296 : f32
      %320 = vector.broadcast %cst_107 : f32 to vector<1x128xf32>
      %321 = arith.mulf %319, %320 : vector<1x128xf32>
      %322 = vector.extract_strided_slice %316 {offsets = [24, 0], sizes = [17, 128], strides = [1, 1]} : vector<48x128xf32> to vector<17x128xf32>
      %cst_108 = arith.constant dense<0.000000e+00> : vector<128xf32>
      %323 = vector.multi_reduction <add>, %322, %cst_108 [0] : vector<17x128xf32> to vector<128xf32>
      %324 = vector.shape_cast %323 : vector<128xf32> to vector<1x128xf32>
      %cst_109 = arith.constant 0.0588235296 : f32
      %325 = vector.broadcast %cst_109 : f32 to vector<1x128xf32>
      %326 = arith.mulf %324, %325 : vector<1x128xf32>
      %327 = tpu.concatenate %321, %326 in 0 : vector<1x128xf32>, vector<1x128xf32> -> vector<2x128xf32>
      %328 = arith.truncf %327 : vector<2x128xf32> to vector<2x128xbf16>
      %c0_110 = arith.constant 0 : index
      %c0_111 = arith.constant 0 : index
      %329 = vector.load %arg18[%c0_110, %c0_111] : memref<128x128xbf16, #tpu.memory_space<vmem>>, vector<128x128xbf16>
      %cst_112 = arith.constant dense<0.000000e+00> : vector<2x128xf32>
      %330 = tpu.matmul %328, %329, %cst_112 {dimension_numbers = #tpu.dot_dimension_numbers<[1], [0], [0], [1], [0, 0, 1, 1], [], []>} : vector<2x128xbf16>, vector<128x128xbf16>, vector<2x128xf32> -> vector<2x128xf32>
      %c0_113 = arith.constant 0 : index
      %c0_114 = arith.constant 0 : index
      %331 = vector.load %arg19[%c0_113, %c0_114] : memref<1x128xf32, #tpu.memory_space<vmem>>, vector<1x128xf32>
      %332 = vector.broadcast %331 : vector<1x128xf32> to vector<2x128xf32>
      %333 = arith.addf %330, %332 : vector<2x128xf32>
      %cst_115 = arith.constant 0.000000e+00 : f32
      %334 = vector.broadcast %cst_115 : f32 to vector<2x128xf32>
      %335 = arith.maximumf %333, %334 : vector<2x128xf32>
      %c0_116 = arith.constant 0 : index
      %c0_117 = arith.constant 0 : index
      %336 = vector.load %arg20[%c0_116, %c0_117] : memref<2x128xf32, #tpu.memory_space<vmem>>, vector<2x128xf32>
      tpu.vector_store %arg20[%c0_116, %c0_117], %335 {strides = array<i32>} : memref<2x128xf32, #tpu.memory_space<vmem>>, vector<2x128xf32>,
    } else {
    }
    return
  }
  func.func @transform_0(%arg0: i32) -> (i32, i32) {
    %c0_i32 = arith.constant 0 : i32
    %c0_i32_0 = arith.constant 0 : i32
    %c0_i32_1 = arith.constant 0 : i32
    return %c0_i32, %c0_i32_0 : i32, i32
  }
  func.func @transform_1(%arg0: i32) -> (i32, i32) {
    %c0_i32 = arith.constant 0 : i32
    %c0_i32_0 = arith.constant 0 : i32
    %c0_i32_1 = arith.constant 0 : i32
    return %c0_i32, %c0_i32_0 : i32, i32
  }
  func.func @transform_2(%arg0: i32) -> (i32, i32) {
    %c0_i32 = arith.constant 0 : i32
    %c0_i32_0 = arith.constant 0 : i32
    %c0_i32_1 = arith.constant 0 : i32
    return %c0_i32, %c0_i32_0 : i32, i32
  }
  func.func @transform_3(%arg0: i32) -> (i32, i32, i32) {
    %c0_i32 = arith.constant 0 : i32
    %c0_i32_0 = arith.constant 0 : i32
    %c0_i32_1 = arith.constant 0 : i32
    return %arg0, %c0_i32, %c0_i32_0 : i32, i32, i32
  }
  func.func @transform_4(%arg0: i32) -> (i32, i32, i32) {
    %c0_i32 = arith.constant 0 : i32
    %c0_i32_0 = arith.constant 0 : i32
    %c0_i32_1 = arith.constant 0 : i32
    return %arg0, %c0_i32, %c0_i32_0 : i32, i32, i32
  }
  func.func @transform_5(%arg0: i32) -> (i32, i32, i32) {
    %c0_i32 = arith.constant 0 : i32
    %c0_i32_0 = arith.constant 0 : i32
    %c0_i32_1 = arith.constant 0 : i32
    return %arg0, %c0_i32, %c0_i32_0 : i32, i32, i32
  }
  func.func @transform_6(%arg0: i32) -> (i32, i32, i32) {
    %c0_i32 = arith.constant 0 : i32
    %c0_i32_0 = arith.constant 0 : i32
    %c0_i32_1 = arith.constant 0 : i32
    return %arg0, %c0_i32, %c0_i32_0 : i32, i32, i32
  }
  func.func @transform_7(%arg0: i32) -> (i32, i32, i32) {
    %c0_i32 = arith.constant 0 : i32
    %c0_i32_0 = arith.constant 0 : i32
    %c0_i32_1 = arith.constant 0 : i32
    return %arg0, %c0_i32, %c0_i32_0 : i32, i32, i32
  }
  func.func @transform_8(%arg0: i32) -> (i32, i32, i32) {
    %c0_i32 = arith.constant 0 : i32
    %c0_i32_0 = arith.constant 0 : i32
    %c0_i32_1 = arith.constant 0 : i32
    return %arg0, %c0_i32, %c0_i32_0 : i32, i32, i32
  }
  func.func @transform_9(%arg0: i32) -> (i32, i32, i32) {
    %c0_i32 = arith.constant 0 : i32
    %c0_i32_0 = arith.constant 0 : i32
    %c0_i32_1 = arith.constant 0 : i32
    return %arg0, %c0_i32, %c0_i32_0 : i32, i32, i32
  }
  func.func @transform_10(%arg0: i32) -> (i32, i32, i32) {
    %c0_i32 = arith.constant 0 : i32
    %c0_i32_0 = arith.constant 0 : i32
    %c0_i32_1 = arith.constant 0 : i32
    return %arg0, %c0_i32, %c0_i32_0 : i32, i32, i32
  }
  func.func @transform_11(%arg0: i32) -> (i32, i32, i32) {
    %c0_i32 = arith.constant 0 : i32
    %c0_i32_0 = arith.constant 0 : i32
    %c0_i32_1 = arith.constant 0 : i32
    return %arg0, %c0_i32, %c0_i32_0 : i32, i32, i32
  }
  func.func @transform_12(%arg0: i32) -> (i32, i32, i32) {
    %c0_i32 = arith.constant 0 : i32
    %c0_i32_0 = arith.constant 0 : i32
    %c0_i32_1 = arith.constant 0 : i32
    return %arg0, %c0_i32, %c0_i32_0 : i32, i32, i32
  }
  func.func @transform_13(%arg0: i32) -> (i32, i32, i32) {
    %c0_i32 = arith.constant 0 : i32
    %c0_i32_0 = arith.constant 0 : i32
    %c0_i32_1 = arith.constant 0 : i32
    return %arg0, %c0_i32, %c0_i32_0 : i32, i32, i32
  }
  func.func @transform_14(%arg0: i32) -> (i32, i32, i32) {
    %c0_i32 = arith.constant 0 : i32
    %c0_i32_0 = arith.constant 0 : i32
    %c0_i32_1 = arith.constant 0 : i32
    return %arg0, %c0_i32, %c0_i32_0 : i32, i32, i32
  }
  func.func @transform_15(%arg0: i32) -> (i32, i32) {
    %c0_i32 = arith.constant 0 : i32
    %c0_i32_0 = arith.constant 0 : i32
    %c0_i32_1 = arith.constant 0 : i32
    return %c0_i32, %c0_i32_0 : i32, i32
  }
  func.func @transform_16(%arg0: i32) -> (i32, i32) {
    %c0_i32 = arith.constant 0 : i32
    %c0_i32_0 = arith.constant 0 : i32
    %c0_i32_1 = arith.constant 0 : i32
    return %c0_i32, %c0_i32_0 : i32, i32
  }
  func.func @transform_17(%arg0: i32) -> (i32, i32) {
    %c0_i32 = arith.constant 0 : i32
    %c0_i32_0 = arith.constant 0 : i32
    %c0_i32_1 = arith.constant 0 : i32
    return %c0_i32, %c0_i32_0 : i32, i32
  }
  func.func @transform_18(%arg0: i32) -> (i32, i32) {
    %c0_i32 = arith.constant 0 : i32
    %c0_i32_0 = arith.constant 0 : i32
    %c0_i32_1 = arith.constant 0 : i32
    return %c0_i32, %c0_i32_0 : i32, i32
  }
  func.func @transform_19(%arg0: i32) -> (i32, i32) {
    %c0_i32 = arith.constant 0 : i32
    %c0_i32_0 = arith.constant 0 : i32
    %c0_i32_1 = arith.constant 0 : i32
    return %c0_i32, %c0_i32_0 : i32, i32
  }
}

</mosaic_0001>

<bundles_post_ra>
// kernel: forward.1
= control target key start
LH: loop header
LB: loop body
LE: loop exit
PB: predicated region body
PF: predicated region fallthrough
CT: control target
= control target key end

     0   :  { %s5497_s0 = inlined_call_operand.vmem [shape: f32[48,32], index: 0, kind: input, shape index: {}]   ;;  %s5498_s1 = inlined_call_operand.vmem [shape: f32[48,128], index: 1, kind: input, shape index: {}]   ;;  %s5499_s2 = inlined_call_operand.vmem [shape: bf16[32,128], index: 2, kind: input, shape index: {}]   ;;  %s5500_s3 = inlined_call_operand.vmem [shape: bf16[2,128,384], index: 3, kind: input, shape index: {}]   ;;  %s5501_s4 = inlined_call_operand.vmem [shape: f32[2,1,384], index: 4, kind: input, shape index: {}]   ;;  %s5502_s5 = inlined_call_operand.vmem [shape: bf16[2,128,128], index: 5, kind: input, shape index: {}]   ;;  %s5503_s6 = inlined_call_operand.vmem [shape: f32[2,1,128], index: 6, kind: input, shape index: {}]   ;;  %s5504_s7 = inlined_call_operand.vmem [shape: f32[2,1,128], index: 7, kind: input, shape index: {}]   ;;  %s5505_s8 = inlined_call_operand.vmem [shape: f32[2,1,128], index: 8, kind: input, shape index: {}]   ;;  %s5506_s9 = inlined_call_operand.vmem [shape: bf16[2,128,256], index: 9, kind: input, shape index: {}]   ;;  %s5507_s10 = inlined_call_operand.vmem [shape: f32[2,1,256], index: 10, kind: input, shape index: {}]   ;;  %s5508_s11 = inlined_call_operand.vmem [shape: bf16[2,256,128], index: 11, kind: input, shape index: {}]   ;;  %s5509_s12 = inlined_call_operand.vmem [shape: f32[2,1,128], index: 12, kind: input, shape index: {}]   ;;  %s5510_s13 = inlined_call_operand.vmem [shape: f32[2,1,128], index: 13, kind: input, shape index: {}]   ;;  %s5511_s14 = inlined_call_operand.vmem [shape: f32[2,1,128], index: 14, kind: input, shape index: {}]   ;;  %s5512_s15 = inlined_call_operand.vmem [shape: f32[1,128], index: 15, kind: input, shape index: {}]   ;;  %s5513_s16 = inlined_call_operand.vmem [shape: f32[1,128], index: 16, kind: input, shape index: {}]   ;;  %s5514_s17 = inlined_call_operand.vmem [shape: bf16[128,128], index: 17, kind: input, shape index: {}]   ;;  %s5515_s18 = inlined_call_operand.vmem [shape: f32[1,128], index: 18, kind: input, shape index: {}]   ;;  %s5516_s19 = inlined_call_operand.vmem [shape: f32[2,128], index: 19, kind: output, shape index: {}]  }
   0x1   :  { %5522 = sst [smem:[#allocation4_spill]] %s5497_s0  ;;  %s4670_s0 = smov 0  }
   0x2   :  { %5523 = sst [smem:[#allocation5_spill]] %s5498_s1 }
   0x3   :  { %5524 = sst [smem:[#allocation6_spill]] %s5499_s2 }
   0x4   :  { %5525 = sst [smem:[#allocation7_spill]] %s5500_s3 }
   0x5   :  { %5526 = sst [smem:[#allocation8_spill]] %s5501_s4 }
   0x6   :  { %5527 = sst [smem:[#allocation9_spill]] %s5502_s5 }
   0x7   :  { %5528 = sst [smem:[#allocation10_spill]] %s5506_s9 }
   0x8   :  { %5529 = sst [smem:[#allocation11_spill]] %s5512_s15 }
   0x9   :  { %5530 = sst [smem:[#allocation12_spill]] %s5513_s16 }
   0xa   :  { %5531 = sst [smem:[#allocation13_spill]] %s5514_s17 }
   0xb   :  { %5532 = sst [smem:[#allocation14_spill]] %s5515_s18 }
   0xc   :  { %5533 = sst [smem:[#allocation15_spill]] %s5516_s19 }
   0xd LB: > { %5534 = sst [smem:[#allocation3_spill]] %s4557_s0  ;;  %s4676_s30 = sadd.s32 4294967295, %s4557_s0   ;;  %s4557_s0 = sphi %s4670_s0, %s29_s0  }
   0xe   : > { %p3741_p0 = scmp.ge.s32.totalorder %s4557_s0, 1  ;;  %p628_p1 = scmp.lt.s32.totalorder %s4557_s0, 3 }
  0x10   : > { %p629_p2 = pnand %p3741_p0, %p628_p1 }
  0x11   : > { %p720_p3 = scmp.lt.s32.totalorder (!%p629_p2), %s4676_s30, 1  ;;  %s5535_s5 = sld [smem:[#allocation9_spill]] (!%p629_p2) }
  0x12   : > { %632 = sbr.rel (%p629_p2) target bundleno = 7139 (0x1be3), region = 96  ;;  %s5536_s26 = sld [smem:[#allocation7_spill]] (!%p629_p2) }
  0x13   : > { %s5537_s4 = sld [smem:[#allocation8_spill]] (!%p629_p2)  ;;  %s5538_s9 = sld [smem:[#allocation10_spill]] (!%p629_p2) }
  0x14   : > { %p3750_p4 = scmp.ne.s32.totalorder (!%p629_p2), %s4676_s30, 0 }
  0x19   : > { %s4682_s20 = scalar_select %p720_p3, %s4676_s30, 1 }
  0x1a   : > { %s5539_s29 = sld [smem:[#allocation6_spill]] (!%p3750_p4)  ;;  %v4559_v1 = vmov (!%p3750_p4), 0.0   ;;  %vm4560_vm0 = vmmov (!%p3750_p4), 0   ;;  %vm802_vm1 = vcmask (!%p3750_p4), 261120  }
  0x1b   : > { %s4257_s21 = smul.u32 192, %s4682_s20  ;;  %s3872_s1 = sshll.u32 %s4682_s20, 6  ;;  %4229 = vmatprep.subr.bf16.mxu1 (!%p3750_p4), %v4559_v1  ;;  %4009 = vmatprep.subr.bf16.mxu0 (!%p3750_p4), %v4559_v1 }
  0x1c   : > { %s4258_s22 = smul.u32 3, %s4682_s20  ;;  %s4690_s24 = scalar_lea.vmem %s5535_s5, %s3872_s1  ;;  %4017 = vmatprep.mubr.msk.bf16.mxu1 (!%p3750_p4), %vm4560_vm0, %v4559_v1  ;;  %4013 = vmatprep.mubr.msk.bf16.mxu0 (!%p3750_p4), %vm4560_vm0, %v4559_v1 }
  0x1d   : > { %s4695_s27 = scalar_lea.vmem %s5536_s26, %s4257_s21  ;;  %s3873_s25 = sshll.u32 %s4682_s20, 7 }
  0x1e   : > { %s4704_s16 = scalar_lea.vmem %s5537_s4, %s4258_s22  ;;  %s4718_s26 = scalar_lea.vmem %s5538_s9, %s3873_s25 }
  0x1f   : > { %s3747_s28 = sshll.u32 %s4682_s20, 1  ;;  %s4729_s15 = scalar_lea.vmem %s5508_s11, %s3873_s25 }
  0x20   : > { %s4724_s18 = scalar_lea.vmem %s5507_s10, %s3747_s28  ;;  %s759_s23 = scalar_lea.vmem %s5509_s12, %s4682_s20  ;;  %v4278_v0 = vld [vmem:[%s5539_s29] sm:$0xff] (!%p3750_p4)   ;;  %v4279_v2 = vld [vmem:[%s5539_s29 + $0x8] sm:$0xff] (!%p3750_p4)  }
  0x21   : > { %s762_s21 = scalar_lea.vmem %s5510_s13, %s4682_s20  ;;  %770 = sbr.rel (%p3750_p4) target bundleno = 268 (0x10c), region = 100  ;;  %4231 = vmatpush3.bf16.msra.mxu1 (!%p3750_p4), %v4278_v0  ;;  %4010 = vmatpush3.bf16.msra.mxu0 (!%p3750_p4), %v4278_v0 }
  0x22   : > { %s5540_s4 = sld [smem:[#allocation4_spill]] (!%p3750_p4)  ;;  %4230 = vmatprep.subr.bf16.mxu1 (!%p3750_p4), %v4559_v1  ;;  %4011 = vmatprep.subr.bf16.mxu0 (!%p3750_p4), %v4559_v1  ;;  %s5541_s1 = sld [smem:[#allocation5_spill]] (!%p3750_p4) }
  0x25   : > { %4232 = vmatpush3.bf16.msra.mxu1 (!%p3750_p4), %v4279_v2  ;;  %4012 = vmatpush3.bf16.msra.mxu0 (!%p3750_p4), %v4279_v2 }
  0x28   : > { %v773_v3 = vld [vmem:[%s5540_s4 + $0x10] sm:$0xff]  ;;  %v774_v4 = vld [vmem:[%s5540_s4 + $0x18] sm:$0xff]  ;;  %v771_v5 = vld [vmem:[%s5540_s4] sm:$0xff] }
  0x29   : > { %v772_v6 = vld [vmem:[%s5540_s4 + $0x8] sm:$0xff]  ;;  %v778_v7 = vpack.c.bf16 %v774_v4, %v773_v3  ;;  %v775_v9 = vld [vmem:[%s5540_s4 + $0x20] sm:$0xff]  ;;  %v786_v12 = vld [vmem:[%s5541_s1 + $0x10] sm:$0xff] }
  0x2a   : > { %v777_v8 = vpack.c.bf16 %v772_v6, %v771_v5  ;;  %v776_v10 = vld [vmem:[%s5540_s4 + $0x28] sm:$0xff]  ;;  %v784_v13 = vld [vmem:[%s5541_s1] sm:$0xff]  ;;  %v787_v15 = vld [vmem:[%s5541_s1 + $0x18] sm:$0xff] }
  0x2b   : > { %4018 = vmatmul.mubr.msk.bf16.vlgmr.msra.gmra.mrb[0].mxu1 %vm802_vm1, %v778_v7  ;;  %v779_v11 = vpack.c.bf16 %v776_v10, %v775_v9  ;;  %v785_v17 = vld [vmem:[%s5541_s1 + $0x8] sm:$0xff]  ;;  %v788_v28 = vld [vmem:[%s5541_s1 + $0x20] sm:$0xff] }
  0x2c   : > { %4014 = vmatmul.mubr.msk.bf16.vlgmr.msra.gmra.mrb[0].mxu0 %vm802_vm1, %v777_v8  ;;  %4021 = vmatprep.mubr.msk.bf16.mxu1 %vm4560_vm0, %v4559_v1  ;;  %v789_v30 = vld [vmem:[%s5541_s1 + $0x28] sm:$0xff] }
  0x33   : > { %4022 = vmatmul.mubr.msk.bf16.gmra.mrb[4].mxu1 %vm802_vm1, %v779_v11 }
  0xfe   : > { %v854_v14 = vpop.f32.mrb[0].mxu1 }
  0xff   : > { %v846_v16 = vpop.f32.mrb[0].mxu0  ;;  %v855_v18 = vadd.f32 %v854_v14, %v786_v12  ;;  %v4019_v19 = vpop.f32.mrb[1].mxu1 }
 0x100   : > { %v847_v20 = vadd.f32 %v846_v16, %v784_v13  ;;  %v4015_v21 = vpop.f32.mrb[1].mxu0  ;;  %v857_v22 = vpop.f32.mrb[2].mxu1 }
 0x101   : > { %v849_v23 = vpop.f32.mrb[2].mxu0  ;;  %871 = vst [vmem:[#allocation2 + $0x10] sm:$0xff] %v855_v18  ;;  %v858_v24 = vadd.f32 %v857_v22, %v787_v15  ;;  %v4020_v25 = vpop.f32.mrb[3].mxu1 }
 0x102   : > { %869 = vst [vmem:[#allocation2] sm:$0xff] %v847_v20  ;;  %v850_v26 = vadd.f32 %v849_v23, %v785_v17  ;;  %v4016_v27 = vpop.f32.mrb[3].mxu0 }
 0x103   : > { %872 = vst [vmem:[#allocation2 + $0x18] sm:$0xff] %v858_v24 }
 0x104   : > { %870 = vst [vmem:[#allocation2 + $0x8] sm:$0xff] %v850_v26 }
 0x106   : > { %v862_v29 = vpop.f32.mrb[4].mxu1 }
 0x107   : > { %v863_v31 = vadd.f32 %v862_v29, %v788_v28  ;;  %v4023_v32 = vpop.f32.mrb[5].mxu1 }
 0x108   : > { %v865_v33 = vpop.f32.mrb[6].mxu1 }
 0x109   : > { %873 = vst [vmem:[#allocation2 + $0x20] sm:$0xff] %v863_v31  ;;  %v866_v34 = vadd.f32 %v865_v33, %v789_v30  ;;  %v4024_v35 = vpop.f32.mrb[7].mxu1 }
 0x10b   : > { %874 = vst [vmem:[#allocation2 + $0x28] sm:$0xff] %v866_v34 }
 0x10c PF: > { %v4325_v36 = vld [vmem:[%s4695_s27 + $0x4] ss:$12 sps:$4 sm:$0xff]   ;;  %v4327_v37 = vld [vmem:[%s4695_s27] ss:$12 sps:$4 sm:$0xff]   ;;  %v4561_v38 = vmov 0   ;;  %v878_v57 = vld [vmem:[#allocation2 + $0x18] sm:$0xff]  ;;  %v918_v62 = vlaneseq  ;;  %s5542_s0 = scalar_lea.vmem %s5503_s6, %s4682_s20  ;;  %s5543_s25 = scalar_lea.vmem %s5504_s7, %s4682_s20 }
 0x10d   : > { %1093 = vmatprep.mubr.bf16.mxu0 %v4561_v38  ;;  %1061 = vmatprep.subr.bf16.mxu0 %v4325_v36  ;;  %v4328_v39 = vld [vmem:[%s4695_s27 + $0x1c] ss:$12 sps:$4 sm:$0xff]   ;;  %v4330_v40 = vld [vmem:[%s4695_s27 + $0x18] ss:$12 sps:$4 sm:$0xff]   ;;  %v4331_v41 = vld [vmem:[%s4695_s27 + $0x34] ss:$12 sps:$4 sm:$0xff]   ;;  %s5544_s5 = scalar_lea.vmem %s5505_s8, %s4682_s20 }
 0x10e   : > { %1062 = vmatpush1.bf16.msra.mxu0 %v4327_v37  ;;  %v4333_v42 = vld [vmem:[%s4695_s27 + $0x30] ss:$12 sps:$4 sm:$0xff]   ;;  %v4334_v43 = vld [vmem:[%s4695_s27 + $0x4c] ss:$12 sps:$4 sm:$0xff]   ;;  %v4336_v44 = vld [vmem:[%s4695_s27 + $0x48] ss:$12 sps:$4 sm:$0xff]  }
 0x10f   : > { %1063 = vmatprep.subr.bf16.mxu0 %v4328_v39  ;;  %v4337_v45 = vld [vmem:[%s4695_s27 + $0x64] ss:$12 sps:$4 sm:$0xff]   ;;  %v4339_v46 = vld [vmem:[%s4695_s27 + $0x60] ss:$12 sps:$4 sm:$0xff]   ;;  %v4340_v47 = vld [vmem:[%s4695_s27 + $0x7c] ss:$12 sps:$4 sm:$0xff]  }
 0x110   : > { %v4342_v48 = vld [vmem:[%s4695_s27 + $0x78] ss:$12 sps:$4 sm:$0xff]   ;;  %v4343_v49 = vld [vmem:[%s4695_s27 + $0x94] ss:$12 sps:$4 sm:$0xff]   ;;  %v4345_v50 = vld [vmem:[%s4695_s27 + $0x90] ss:$12 sps:$4 sm:$0xff]  }
 0x111   : > { %v4346_v51 = vld [vmem:[%s4695_s27 + $0xac] ss:$12 sps:$4 sm:$0xff]   ;;  %v4348_v52 = vld [vmem:[%s4695_s27 + $0xa8] ss:$12 sps:$4 sm:$0xff]   ;;  %v875_v53 = vld [vmem:[#allocation2] sm:$0xff]  ;;  %v4815_v63 = vshrl.u32 %v918_v62, 7 }
 0x112   : > { %1064 = vmatpush1.bf16.msra.mxu0 %v4330_v40  ;;  %v876_v54 = vld [vmem:[#allocation2 + $0x8] sm:$0xff]  ;;  %v877_v56 = vld [vmem:[#allocation2 + $0x10] sm:$0xff]  ;;  %v879_v59 = vld [vmem:[#allocation2 + $0x20] sm:$0xff]  ;;  %vm1189_vm2 = vcmask 261120   ;;  %v4562_v39 = vmov 0.0   ;;  %vm4563_vm3 = vmmov 0  }
 0x113   : > { %1065 = vmatprep.subr.bf16.mxu0 %v4331_v41  ;;  %v4803_v55 = vpack.c.bf16 %v876_v54, %v875_v53  ;;  %v4807_v58 = vpack.c.bf16 %v878_v57, %v877_v56  ;;  %v880_v60 = vld [vmem:[#allocation2 + $0x28] sm:$0xff]  ;;  %v920_v0 = vsub.s32 0, %v4815_v63  ;;  %v4819_v1 = vld [vmem:[%s4704_s16] sm:$0x7]  ;;  %v924_v2 = vsub.s32 1, %v4815_v63  ;;  %4025 = vmatprep.subr.bf16.mxu1 %v4562_v39  ;;  %s4565_s16 = smov 96  }
 0x114   : > { %v4811_v61 = vpack.c.bf16 %v880_v60, %v879_v59  ;;  %v4349_v37 = vld [vmem:[%s4695_s27 + $0x8] ss:$12 sps:$4 sm:$0xff]   ;;  %4041 = vmatprep.mubr.msk.bf16.mxu1 %vm4563_vm3, %v4562_v39  ;;  %v4350_v40 = vld [vmem:[%s4695_s27 + $0x20] ss:$12 sps:$4 sm:$0xff]   ;;  %v4351_v41 = vld [vmem:[%s4695_s27 + $0x38] ss:$12 sps:$4 sm:$0xff]  }
 0x115   : > { %v921_v3 = vrot.slane %v4819_v1, %v920_v0  ;;  %v925_v5 = vrot.slane %v4819_v1, %v924_v2  ;;  %4026 = vmatpush3.bf16.msra.mxu1 %v4349_v37  ;;  %vm1256_vm5 = vcmask 195584   ;;  %vm1300_vm6 = vcmask 1043456   ;;  %s4567_s17 = smov 32   ;;  %p3858_p5 = scmp.ne.s32.totalorder %s4676_s30, 1 }
 0x116   : > { %1066 = vmatpush1.bf16.msra.mxu0 %v4333_v42  ;;  %4027 = vmatprep.subr.bf16.mxu1 %v4562_v39  ;;  %v4352_v42 = vld [vmem:[%s4695_s27 + $0x50] ss:$12 sps:$4 sm:$0xff]   ;;  %vm1910_vm7 = vcmask 523264   ;;  %vm1914_vm8 = vcmask 785408   ;;  %vm4569_vm9 = vmmov (!%p3858_p5), 0   ;;  %vm3461_vm10 = vcmask (!%p3858_p5), 1040384  }
 0x117   : > { %1067 = vmatprep.subr.bf16.mxu0 %v4334_v43  ;;  %v4353_v43 = vld [vmem:[%s4695_s27 + $0x68] ss:$12 sps:$4 sm:$0xff]  }
 0x119   : > { %4028 = vmatpush3.bf16.msra.mxu1 %v4350_v40 }
 0x11a   : > { %1068 = vmatpush1.bf16.msra.mxu0 %v4336_v44  ;;  %4029 = vmatprep.subr.bf16.mxu1 %v4562_v39  ;;  %v4354_v44 = vld [vmem:[%s4695_s27 + $0x80] ss:$12 sps:$4 sm:$0xff]  }
 0x11b   : > { %1069 = vmatprep.subr.bf16.mxu0 %v4337_v45  ;;  %v4355_v45 = vld [vmem:[%s4695_s27 + $0x98] ss:$12 sps:$4 sm:$0xff]  }
 0x11d   : > { %4030 = vmatpush3.bf16.msra.mxu1 %v4351_v41 }
 0x11e   : > { %1070 = vmatpush1.bf16.msra.mxu0 %v4339_v46  ;;  %4031 = vmatprep.subr.bf16.mxu1 %v4562_v39  ;;  %v4356_v46 = vld [vmem:[%s4695_s27 + $0xb0] ss:$12 sps:$4 sm:$0xff]   ;;  %s4566_s27 = smov 64  }
 0x11f   : > { %1071 = vmatprep.subr.bf16.mxu0 %v4340_v47  ;;  %v1182_v47 = vand.u32 127, %v918_v62 }
 0x121   : > { %4032 = vmatpush3.bf16.msra.mxu1 %v4352_v42  ;;  %vm1183_vm4 = vcmp.lt.s32.totalorder %v1182_v47, 17 }
 0x122   : > { %1072 = vmatpush1.bf16.msra.mxu0 %v4342_v48  ;;  %4033 = vmatprep.subr.bf16.mxu1 %v4562_v39  ;;  %v4564_v48 = vmov -1e+30  }
 0x123   : > { %1073 = vmatprep.subr.bf16.mxu0 %v4343_v49  ;;  %v4882_v49 = vsel %vm1183_vm4, 0.0, %v4564_v48 }
 0x125   : > { %4034 = vmatpush3.bf16.msra.mxu1 %v4353_v43 }
 0x126   : > { %1074 = vmatpush1.bf16.msra.mxu0 %v4345_v50  ;;  %4035 = vmatprep.subr.bf16.mxu1 %v4562_v39 }
 0x127   : > { %1075 = vmatprep.subr.bf16.mxu0 %v4346_v51 }
 0x129   : > { %4036 = vmatpush3.bf16.msra.mxu1 %v4354_v44 }
 0x12a   : > { %1076 = vmatpush1.bf16.msra.mxu0 %v4348_v52  ;;  %4037 = vmatprep.subr.bf16.mxu1 %v4562_v39 }
 0x12d   : > { %1094 = vmatmul.mubr.bf16.vlgmr.msra.gmra.mrb[0].mxu0 %v4803_v55  ;;  %4038 = vmatpush3.bf16.msra.mxu1 %v4355_v45 }
 0x12e   : > { %1103 = vmatprep.mubr.bf16.mxu0 %v4561_v38  ;;  %4039 = vmatprep.subr.bf16.mxu1 %v4562_v39 }
 0x131   : > { %4040 = vmatpush3.bf16.msra.mxu1 %v4356_v46 }
 0x134   : > { %4042 = vmatmul.mubr.bf16.vlgmr.msra.gmra.mrb[0].mxu1 %v4803_v55 }
 0x135   : > { %1104 = vmatmul.mubr.bf16.gmra.mrb[4].mxu0 %v4807_v58  ;;  %4045 = vmatprep.mubr.msk.bf16.mxu1 %vm4563_vm3, %v4562_v39 }
 0x136   : > { %1113 = vmatprep.mubr.bf16.mxu0 %v4561_v38 }
 0x13c   : > { %4046 = vmatmul.mubr.bf16.gmra.mrb[4].mxu1 %v4807_v58 }
 0x13d   : > { %1114 = vmatmul.mubr.bf16.gmra.mrb[8].mxu0 %v4811_v61  ;;  %4049 = vmatprep.mubr.msk.bf16.mxu1 %vm4563_vm3, %v4562_v39 }
 0x144   : > { %4050 = vmatmul.mubr.bf16.gmra.mrb[8].mxu1 %v4811_v61 }
 0x200   : > { %v1095_v4 = vpop.f32.mrb[0].mxu0 }
 0x201   : > { %v1097_v6 = vpop.f32.mrb[1].mxu0  ;;  %v1096_v8 = vadd.f32 %v1095_v4, %v921_v3 }
 0x202   : > { %v1099_v7 = vpop.f32.mrb[2].mxu0  ;;  %v1098_v11 = vadd.f32 %v1097_v6, %v925_v5 }
 0x203   : > { %v1100_v9 = vadd.f32 %v1099_v7, %v921_v3  ;;  %v1101_v10 = vpop.f32.mrb[3].mxu0 }
 0x204   : > { %v1102_v12 = vadd.f32 %v1101_v10, %v925_v5 }
 0x205   : > { %v4828_v13 = vpack.c.bf16 %v1100_v9, %v1096_v8 }
 0x206   : > { %v4830_v14 = vpack.c.bf16 %v1102_v12, %v1098_v11 }
 0x207   : > { %4057 = vmatprep.mubr.msk.bf16.mxu0 %vm1189_vm2, %v4828_v13 }
 0x208   : > { %v1105_v15 = vpop.f32.mrb[4].mxu0  ;;  %4233 = vmatprep.subr.msk.bf16.mxu0 %vm1189_vm2, %v4830_v14  ;;  %v1197_v16 = vsel %vm1189_vm2, %v4830_v14, 0 }
 0x209   : > { %v1107_v17 = vpop.f32.mrb[5].mxu0  ;;  %4054 = vmatpush3.bf16.xpose.msra.mxu0 %v1197_v16  ;;  %v1106_v28 = vadd.f32 %v1105_v15, %v921_v3 }
 0x20a   : > { %v1108_v18 = vadd.f32 %v1107_v17, %v925_v5  ;;  %v1109_v19 = vpop.f32.mrb[6].mxu0 }
 0x20b   : > { %v1110_v20 = vadd.f32 %v1109_v19, %v921_v3  ;;  %v1111_v21 = vpop.f32.mrb[7].mxu0  ;;  %v4852_v36 = vpack.c.bf16 %v1106_v28, %v1106_v28 }
 0x20c   : > { %v4838_v22 = vpack.c.bf16 %v1108_v18, %v1108_v18  ;;  %v1112_v23 = vadd.f32 %v1111_v21, %v925_v5 }
 0x20e   : > { %4234 = vmatprep.subr.msk.bf16.mxu0 %vm1189_vm2, %v4838_v22  ;;  %v1200_v24 = vsel %vm1189_vm2, %v4838_v22, 0 }
 0x210   : > { %v1115_v25 = vpop.f32.mrb[8].mxu0 }
 0x211   : > { %v1116_v26 = vadd.f32 %v1115_v25, %v921_v3  ;;  %v1117_v27 = vpop.f32.mrb[9].mxu0  ;;  %4056 = vmatpush3.bf16.xpose.msra.mxu0 %v1200_v24 }
 0x212   : > { %v1118_v29 = vadd.f32 %v1117_v27, %v925_v5  ;;  %v1119_v30 = vpop.f32.mrb[10].mxu0 }
 0x213   : > { %v4844_v31 = vpack.c.bf16 %v1116_v26, %v1110_v20  ;;  %v4846_v32 = vadd.f32 %v1119_v30, %v921_v3  ;;  %v1121_v33 = vpop.f32.mrb[11].mxu0  ;;  %v928_v3 = vsub.s32 2, %v4815_v63 }
 0x214   : > { %v4848_v34 = vpack.c.bf16 %v1118_v29, %v1112_v23  ;;  %v4850_v35 = vadd.f32 %v1121_v33, %v925_v5  ;;  %v1158_v5 = vpop.f32.mrb[0].mxu1 }
 0x215   : > { %v4892_v4 = vrot.slane %v4819_v1, %v928_v3  ;;  %v4043_v7 = vpop.f32.mrb[1].mxu1 }
 0x216   : > { %v1161_v8 = vpop.f32.mrb[2].mxu1 }
 0x217   : > { %v1159_v6 = vadd.f32 %v1158_v5, %v4892_v4  ;;  %v1162_v9 = vadd.f32 %v1161_v8, %v4892_v4  ;;  %v4044_v10 = vpop.f32.mrb[3].mxu1 }
 0x218   : > { %4058 = vmatmul.mubr.msk.bf16.vlgmr.msra.gmra.mrb[12].mxu0 %vm1189_vm2, %v4852_v36  ;;  %v1166_v29 = vpop.f32.mrb[4].mxu1 }
 0x219   : > { %v4896_v11 = vpack.c.bf16 %v1162_v9, %v1159_v6  ;;  %v1167_v30 = vadd.f32 %v1166_v29, %v4892_v4  ;;  %v4047_v33 = vpop.f32.mrb[5].mxu1 }
 0x21a   : > { %v1169_v37 = vpop.f32.mrb[6].mxu1 }
 0x21b   : > { %4061 = vmatprep.subr.bf16.mxu0 %v4896_v11  ;;  %v4904_v40 = vpack.c.bf16 %v1167_v30, %v1167_v30  ;;  %v4048_v41 = vpop.f32.mrb[7].mxu1  ;;  %v1170_v42 = vadd.f32 %v1169_v37, %v4892_v4 }
 0x21c   : > { %4062 = vmatpush3.bf16.msra.mxu0 %v4896_v11  ;;  %v1174_v43 = vpop.f32.mrb[8].mxu1 }
 0x21d   : > { %v1175_v44 = vadd.f32 %v1174_v43, %v4892_v4  ;;  %4235 = vmatprep.subr.msk.bf16.mxu0 %vm1300_vm6, %v4904_v40  ;;  %v1302_v45 = vsel %vm1300_vm6, %v4904_v40, 0  ;;  %v4051_v46 = vpop.f32.mrb[9].mxu1 }
 0x21f   : > { %v4914_v47 = vpack.c.bf16 %v1175_v44, %v1170_v42 }
 0x220   : > { %4064 = vmatpush3.bf16.msra.mxu0 %v1302_v45 }
 0x2eb   : > { %v4059_v50 = vpop.f32.mrb[12].mxu0 }
 0x2ec   : > { %v1252_v51 = vmul.f32 0.17677669, %v4059_v50  ;;  %v1236_v52 = vpop.f32.mrb[13].mxu0 }
 0x2ed   : > { %v1250_v53 = vmul.f32 0.17677669, %v1236_v52  ;;  %v4060_v54 = vpop.f32.mrb[14].mxu0 }
 0x2ee   : > { %v1239_v55 = vpop.f32.mrb[15].mxu0  ;;  %v1255_v56 = vadd.f32 %v1252_v51, %v4882_v49 }
 0x2ef   : > { %v1251_v57 = vmul.f32 0.17677669, %v1239_v55  ;;  %v1253_v58 = vadd.f32 %v1250_v53, %v4882_v49 }
 0x2f0   : > { %v1263_v59 = vsel %vm1256_vm5, %v1255_v56, -inf }
 0x2f1   : > { %1264 = vmax.xlane.f32.xlu1 %v1263_v59  ;;  %v1257_v60 = vsel %vm1256_vm5, %v1253_v58, -inf  ;;  %v1254_v61 = vadd.f32 %v1251_v57, %v4882_v49 }
 0x2f2   : > { %1258 = vmax.xlane.f32.xlu0 %v1257_v60 }
 0x2f3   : > { %v1260_v62 = vsel %vm1256_vm5, %v1254_v61, -inf }
 0x2f6   : > { %1261 = vmax.xlane.f32.xlu0 %v1260_v62 }
 0x37e   : > { %v1265_v12 = vpop.xlane.xlu1 %1264 }
 0x37f   : > { %v1268_v15 = vsub.f32 %v1255_v56, %v1265_v12  ;;  %v1259_v16 = vpop.xlane.xlu0 %1258 }
 0x380   : > { %v1266_v17 = vsub.f32 %v1253_v58, %v1259_v16 }
 0x381   : > { %v1273_v1 = vmul.f32 1.442695, %v1268_v15 }
 0x382   : > { %v1269_v18 = vmul.f32 1.442695, %v1266_v17 }
 0x383   : > { %v1262_v19 = vpop.xlane.xlu0 %1261 }
 0x384   : > { %4405 = vpow2.f32 %v1269_v18  ;;  %v1267_v20 = vsub.f32 %v1254_v61, %v1262_v19 }
 0x385   : > { %4407 = vpow2.f32 %v1273_v1 }
 0x386   : > { %v1271_v21 = vmul.f32 1.442695, %v1267_v20 }
 0x388   : > { %4409 = vpow2.f32 %v1271_v21 }
 0x38e   : > { %v4406_v23 = vpop.eup %4405 }
 0x38f   : > { %v1275_v24 = vsel %vm1256_vm5, %v4406_v23, 0.0  ;;  %v4408_v25 = vpop.eup %4407 }
 0x390   : > { %1276 = vadd.xlane.f32.xlu1 %v1275_v24  ;;  %v1281_v27 = vsel %vm1256_vm5, %v4408_v25, 0.0 }
 0x392   : > { %v4410_v26 = vpop.eup %4409 }
 0x393   : > { %v1278_v28 = vsel %vm1256_vm5, %v4410_v26, 0.0 }
 0x394   : > { %1282 = vadd.xlane.f32.xlu1 %v1281_v27  ;;  %1279 = vadd.xlane.f32.xlu0 %v1278_v28 }
 0x3a5   : > { %1362 = vrot.lane.b32.xlu1 %v4838_v22, %s4565_s16 }
 0x3a9   : > { %1354 = vrot.lane.b32.xlu1 %v4828_v13, %s4565_s16 }
 0x3aa   : > { %1360 = vrot.lane.b32.xlu0 %v4830_v14, %s4565_s16 }
 0x3ad   : > { %1356 = vrot.lane.b32.xlu1 %v4852_v36, %s4565_s16 }
 0x41d   : > { %v1277_v48 = vpop.xlane.xlu1 %1276 }
 0x41e   : > { %4411 = vrcp.f32 %v1277_v48 }
 0x421   : > { %v1283_v50 = vpop.xlane.xlu1 %1282  ;;  %v1280_v51 = vpop.xlane.xlu0 %1279 }
 0x422   : > { %4413 = vrcp.f32 %v1283_v50 }
 0x423   : > { %4415 = vrcp.f32 %v1280_v51 }
 0x425   : > { %v1361_v52 = vpop.permute.xlu0 %1360  ;;  %v1363_v56 = vpop.permute.xlu1 %1362 }
 0x426   : > { %4236 = vmatprep.subr.msk.bf16.mxu0 %vm1189_vm2, %v1361_v52  ;;  %v1371_v3 = vsel %vm1189_vm2, %v1361_v52, 0  ;;  %v1374_v5 = vsel %vm1189_vm2, %v1363_v56, 0  ;;  %v4957_v52 = vpop.f32.mrb[10].mxu1 }
 0x428   : > { %v4412_v53 = vpop.eup %4411 }
 0x429   : > { %v1287_v58 = vmul.f32 %v4412_v53, %v4406_v23  ;;  %v1355_v62 = vpop.permute.xlu1 %1354  ;;  %v4052_v53 = vpop.f32.mrb[11].mxu1 }
 0x42c   : > { %v4414_v54 = vpop.eup %4413 }
 0x42d   : > { %v4416_v55 = vpop.eup %4415  ;;  %v1289_v57 = vmul.f32 %v4414_v54, %v4408_v25  ;;  %v1357_v6 = vpop.permute.xlu1 %1356 }
 0x42e   : > { %v1288_v59 = vmul.f32 %v4416_v55, %v4410_v26 }
 0x42f   : > { %v1291_v60 = vpack.c.bf16 %v1289_v57, %v1289_v57 }
 0x430   : > { %v1290_v61 = vpack.c.bf16 %v1288_v59, %v1287_v58 }
 0x432   : > { %4065 = vmatprep.mubr.msk.bf16.mxu0 %vm1256_vm5, %v1290_v61 }
 0x433   : > { %4066 = vmatmul.mubr.msk.bf16.vlgmr.msra.gmra.mrb[16].mxu0 %vm1256_vm5, %v1291_v60 }
 0x434   : > { %4070 = vmatpush3.bf16.xpose.msra.mxu0 %v1371_v3  ;;  %4073 = vmatprep.mubr.msk.bf16.mxu0 %vm1189_vm2, %v1355_v62 }
 0x435   : > { %4237 = vmatprep.subr.msk.bf16.mxu0 %vm1189_vm2, %v1363_v56 }
 0x43c   : > { %4072 = vmatpush3.bf16.xpose.msra.mxu0 %v1374_v5 }
 0x443   : > { %4074 = vmatmul.mubr.msk.bf16.vlgmr.msra.gmra.mrb[20].mxu0 %vm1189_vm2, %v1357_v6 }
 0x506   : > { %v4930_v7 = vpop.f32.mrb[16].mxu0 }
 0x507   : > { %v4932_v8 = vpop.f32.mrb[17].mxu0 }
 0x508   : > { %v4068_v9 = vpop.f32.mrb[18].mxu0 }
 0x509   : > { %v4934_v10 = vpop.f32.mrb[19].mxu0 }
 0x516   : > { %v4075_v12 = vpop.f32.mrb[20].mxu0 }
 0x517   : > { %v1410_v15 = vpop.f32.mrb[21].mxu0  ;;  %v1426_v16 = vmul.f32 0.17677669, %v4075_v12 }
 0x518   : > { %v1424_v17 = vmul.f32 0.17677669, %v1410_v15  ;;  %v4076_v1 = vpop.f32.mrb[22].mxu0 }
 0x519   : > { %v1413_v18 = vpop.f32.mrb[23].mxu0  ;;  %v1429_v24 = vadd.f32 %v1426_v16, %v4882_v49 }
 0x51a   : > { %v1425_v19 = vmul.f32 0.17677669, %v1413_v18  ;;  %v1427_v20 = vadd.f32 %v1424_v17, %v4882_v49 }
 0x51b   : > { %v1436_v26 = vsel %vm1256_vm5, %v1429_v24, -inf }
 0x51c   : > { %v1430_v21 = vsel %vm1256_vm5, %v1427_v20, -inf  ;;  %v1428_v23 = vadd.f32 %v1425_v19, %v4882_v49 }
 0x51d   : > { %1431 = vmax.xlane.f32.xlu0 %v1430_v21 }
 0x51e   : > { %v1433_v25 = vsel %vm1256_vm5, %v1428_v23, -inf }
 0x51f   : > { %1434 = vmax.xlane.f32.xlu1 %v1433_v25 }
 0x521   : > { %1437 = vmax.xlane.f32.xlu0 %v1436_v26 }
 0x5aa   : > { %v1432_v27 = vpop.xlane.xlu0 %1431 }
 0x5ab   : > { %v1439_v28 = vsub.f32 %v1427_v20, %v1432_v27 }
 0x5ac   : > { %v1435_v29 = vpop.xlane.xlu1 %1434 }
 0x5ad   : > { %v1442_v30 = vmul.f32 1.442695, %v1439_v28  ;;  %v1440_v33 = vsub.f32 %v1428_v23, %v1435_v29 }
 0x5ae   : > { %v1438_v37 = vpop.xlane.xlu0 %1437 }
 0x5af   : > { %4417 = vpow2.f32 %v1442_v30  ;;  %v1444_v41 = vmul.f32 1.442695, %v1440_v33  ;;  %v1441_v42 = vsub.f32 %v1429_v24, %v1438_v37 }
 0x5b1   : > { %4419 = vpow2.f32 %v1444_v41  ;;  %v1446_v43 = vmul.f32 1.442695, %v1441_v42 }
 0x5b3   : > { %4421 = vpow2.f32 %v1446_v43 }
 0x5b9   : > { %v4418_v44 = vpop.eup %4417 }
 0x5ba   : > { %v1448_v45 = vsel %vm1256_vm5, %v4418_v44, 0.0 }
 0x5bb   : > { %v4420_v46 = vpop.eup %4419  ;;  %1449 = vadd.xlane.f32.xlu0 %v1448_v45 }
 0x5bc   : > { %v1451_v51 = vsel %vm1256_vm5, %v4420_v46, 0.0 }
 0x5bd   : > { %v4422_v48 = vpop.eup %4421 }
 0x5be   : > { %v1454_v50 = vsel %vm1256_vm5, %v4422_v48, 0.0 }
 0x5bf   : > { %1455 = vadd.xlane.f32.xlu1 %v1454_v50  ;;  %1452 = vadd.xlane.f32.xlu0 %v1451_v51 }
 0x5d0   : > { %1469 = vrot.lane.b32.xlu1 %v4904_v40, %s4565_s16 }
 0x5d4   : > { %1533 = vrot.lane.b32.xlu1 %v4830_v14, %s4566_s27 }
 0x5d5   : > { %1467 = vrot.lane.b32.xlu0 %v4896_v11, %s4565_s16 }
 0x5d8   : > { %1535 = vrot.lane.b32.xlu1 %v4838_v22, %s4566_s27 }
 0x5d9   : > { %1529 = vrot.lane.b32.xlu0 %v4828_v13, %s4566_s27 }
 0x5dc   : > { %1531 = vrot.lane.b32.xlu1 %v4852_v36, %s4566_s27 }
 0x648   : > { %v1450_v54 = vpop.xlane.xlu0 %1449 }
 0x649   : > { %4423 = vrcp.f32 %v1450_v54 }
 0x64c   : > { %v1453_v55 = vpop.xlane.xlu0 %1452  ;;  %v1456_v56 = vpop.xlane.xlu1 %1455 }
 0x64d   : > { %4425 = vrcp.f32 %v1453_v55 }
 0x64e   : > { %4427 = vrcp.f32 %v1456_v56 }
 0x650   : > { %v1468_v57 = vpop.permute.xlu0 %1467  ;;  %v1470_v58 = vpop.permute.xlu1 %1469 }
 0x651   : > { %4077 = vmatprep.subr.bf16.mxu1 %v1468_v57  ;;  %v1479_v60 = vsel %vm1300_vm6, %v1470_v58, 0 }
 0x652   : > { %4078 = vmatpush3.bf16.msra.mxu1 %v1468_v57 }
 0x653   : > { %4238 = vmatprep.subr.msk.bf16.mxu1 %vm1300_vm6, %v1470_v58  ;;  %v4424_v59 = vpop.eup %4423 }
 0x654   : > { %v1534_v61 = vpop.permute.xlu1 %1533  ;;  %v1460_v5 = vmul.f32 %v4424_v59, %v4418_v44  ;;  %v1530_v16 = vpop.permute.xlu0 %1529 }
 0x655   : > { %v1544_v17 = vsel %vm1189_vm2, %v1534_v61, 0 }
 0x656   : > { %4080 = vmatpush3.bf16.msra.mxu1 %v1479_v60 }
 0x657   : > { %v4426_v62 = vpop.eup %4425  ;;  %4239 = vmatprep.subr.msk.bf16.mxu1 %vm1189_vm2, %v1534_v61 }
 0x658   : > { %v4428_v3 = vpop.eup %4427  ;;  %v1461_v6 = vmul.f32 %v4426_v62, %v4420_v46  ;;  %v1536_v1 = vpop.permute.xlu1 %1535 }
 0x659   : > { %v1462_v9 = vmul.f32 %v4428_v3, %v4422_v48  ;;  %v1547_v18 = vsel %vm1189_vm2, %v1536_v1, 0 }
 0x65a   : > { %v1463_v12 = vpack.c.bf16 %v1461_v6, %v1460_v5 }
 0x65b   : > { %v1464_v15 = vpack.c.bf16 %v1462_v9, %v1462_v9 }
 0x65c   : > { %4081 = vmatprep.mubr.msk.bf16.mxu1 %vm1256_vm5, %v1463_v12  ;;  %v1532_v19 = vpop.permute.xlu1 %1531 }
 0x65d   : > { %4082 = vmatmul.mubr.msk.bf16.vlgmr.msra.gmra.mrb[12].mxu1 %vm1256_vm5, %v1464_v15 }
 0x65e   : > { %4089 = vmatprep.mubr.msk.bf16.mxu1 %vm1189_vm2, %v1530_v16 }
 0x65f   : > { %4086 = vmatpush3.bf16.xpose.msra.mxu1 %v1544_v17 }
 0x660   : > { %4240 = vmatprep.subr.msk.bf16.mxu1 %vm1189_vm2, %v1536_v1 }
 0x667   : > { %4088 = vmatpush3.bf16.xpose.msra.mxu1 %v1547_v18 }
 0x66e   : > { %4090 = vmatmul.mubr.msk.bf16.vlgmr.msra.gmra.mrb[16].mxu1 %vm1189_vm2, %v1532_v19 }
 0x730   : > { %v4969_v20 = vpop.f32.mrb[12].mxu1 }
 0x731   : > { %v4971_v21 = vpop.f32.mrb[13].mxu1 }
 0x732   : > { %v4084_v23 = vpop.f32.mrb[14].mxu1 }
 0x733   : > { %v4973_v24 = vpop.f32.mrb[15].mxu1 }
 0x734   : > { %v4280_v25 = vpack.i.bf16 %v4973_v24, %v4971_v21 }
 0x741   : > { %v4091_v26 = vpop.f32.mrb[16].mxu1 }
 0x742   : > { %v1583_v27 = vpop.f32.mrb[17].mxu1  ;;  %v1599_v28 = vmul.f32 0.17677669, %v4091_v26 }
 0x743   : > { %v1597_v29 = vmul.f32 0.17677669, %v1583_v27  ;;  %v4092_v30 = vpop.f32.mrb[18].mxu1 }
 0x744   : > { %v1586_v33 = vpop.f32.mrb[19].mxu1  ;;  %v1602_v44 = vadd.f32 %v1599_v28, %v4882_v49 }
 0x745   : > { %v1598_v37 = vmul.f32 0.17677669, %v1586_v33  ;;  %v1600_v41 = vadd.f32 %v1597_v29, %v4882_v49  ;;  %v1178_v33 = vadd.f32 %v4957_v52, %v4892_v4 }
 0x746   : > { %v1609_v46 = vsel %vm1256_vm5, %v1602_v44, -inf }
 0x747   : > { %v1603_v42 = vsel %vm1256_vm5, %v1600_v41, -inf  ;;  %v1601_v43 = vadd.f32 %v1598_v37, %v4882_v49 }
 0x748   : > { %1604 = vmax.xlane.f32.xlu0 %v1603_v42 }
 0x749   : > { %v1606_v45 = vsel %vm1256_vm5, %v1601_v43, -inf }
 0x74a   : > { %1607 = vmax.xlane.f32.xlu1 %v1606_v45 }
 0x74c   : > { %1610 = vmax.xlane.f32.xlu0 %v1609_v46 }
 0x7d5   : > { %v1605_v48 = vpop.xlane.xlu0 %1604 }
 0x7d6   : > { %v1612_v50 = vsub.f32 %v1600_v41, %v1605_v48  ;;  %v5010_v41 = vpack.c.bf16 %v1178_v33, %v1178_v33 }
 0x7d7   : > { %v1608_v51 = vpop.xlane.xlu1 %1607 }
 0x7d8   : > { %v1615_v53 = vmul.f32 1.442695, %v1612_v50  ;;  %v1613_v54 = vsub.f32 %v1601_v43, %v1608_v51  ;;  %v2032_v42 = vsel %vm1300_vm6, %v5010_v41, 0 }
 0x7d9   : > { %v1611_v55 = vpop.xlane.xlu0 %1610 }
 0x7da   : > { %4429 = vpow2.f32 %v1615_v53  ;;  %v1617_v56 = vmul.f32 1.442695, %v1613_v54  ;;  %v1614_v57 = vsub.f32 %v1602_v44, %v1611_v55 }
 0x7dc   : > { %4431 = vpow2.f32 %v1617_v56  ;;  %v1619_v58 = vmul.f32 1.442695, %v1614_v57 }
 0x7de   : > { %4433 = vpow2.f32 %v1619_v58 }
 0x7e4   : > { %v4430_v59 = vpop.eup %4429 }
 0x7e5   : > { %v1621_v60 = vsel %vm1256_vm5, %v4430_v59, 0.0 }
 0x7e6   : > { %v4432_v61 = vpop.eup %4431  ;;  %1622 = vadd.xlane.f32.xlu0 %v1621_v60 }
 0x7e7   : > { %v1624_v5 = vsel %vm1256_vm5, %v4432_v61, 0.0 }
 0x7e8   : > { %v4434_v62 = vpop.eup %4433 }
 0x7e9   : > { %v1627_v3 = vsel %vm1256_vm5, %v4434_v62, 0.0 }
 0x7ea   : > { %1628 = vadd.xlane.f32.xlu1 %v1627_v3  ;;  %1625 = vadd.xlane.f32.xlu0 %v1624_v5 }
 0x7fb   : > { %1640 = vrot.lane.b32.xlu1 %v4904_v40, %s4566_s27 }
 0x7ff   : > { %1704 = vrot.lane.b32.xlu1 %v4830_v14, %s4567_s17 }
 0x800   : > { %1638 = vrot.lane.b32.xlu0 %v4896_v11, %s4566_s27 }
 0x803   : > { %1706 = vrot.lane.b32.xlu1 %v4838_v22, %s4567_s17 }
 0x804   : > { %1700 = vrot.lane.b32.xlu0 %v4828_v13, %s4567_s17 }
 0x807   : > { %1702 = vrot.lane.b32.xlu1 %v4852_v36, %s4567_s17 }
 0x873   : > { %v1623_v6 = vpop.xlane.xlu0 %1622 }
 0x874   : > { %4435 = vrcp.f32 %v1623_v6 }
 0x877   : > { %v1626_v9 = vpop.xlane.xlu0 %1625  ;;  %v1629_v12 = vpop.xlane.xlu1 %1628 }
 0x878   : > { %4437 = vrcp.f32 %v1626_v9 }
 0x879   : > { %4439 = vrcp.f32 %v1629_v12 }
 0x87b   : > { %v1639_v15 = vpop.permute.xlu0 %1638  ;;  %v1641_v14 = vpop.permute.xlu1 %1640 }
 0x87c   : > { %4093 = vmatprep.subr.bf16.mxu0 %v1639_v15  ;;  %v1650_v22 = vsel %vm1300_vm6, %v1641_v14, 0 }
 0x87d   : > { %4094 = vmatpush3.bf16.msra.mxu0 %v1639_v15 }
 0x87e   : > { %4241 = vmatprep.subr.msk.bf16.mxu0 %vm1300_vm6, %v1641_v14  ;;  %v4436_v16 = vpop.eup %4435 }
 0x87f   : > { %v1705_v17 = vpop.permute.xlu1 %1704  ;;  %v1633_v1 = vmul.f32 %v4436_v16, %v4430_v59  ;;  %v1701_v27 = vpop.permute.xlu0 %1700 }
 0x880   : > { %v1715_v28 = vsel %vm1189_vm2, %v1705_v17, 0 }
 0x881   : > { %4096 = vmatpush3.bf16.msra.mxu0 %v1650_v22 }
 0x882   : > { %v4438_v13 = vpop.eup %4437  ;;  %4242 = vmatprep.subr.msk.bf16.mxu0 %vm1189_vm2, %v1705_v17 }
 0x883   : > { %v4440_v36 = vpop.eup %4439  ;;  %v1634_v18 = vmul.f32 %v4438_v13, %v4432_v61  ;;  %v1707_v29 = vpop.permute.xlu1 %1706 }
 0x884   : > { %v1635_v19 = vmul.f32 %v4440_v36, %v4434_v62  ;;  %v1718_v30 = vsel %vm1189_vm2, %v1707_v29, 0 }
 0x885   : > { %v1636_v23 = vpack.c.bf16 %v1634_v18, %v1633_v1 }
 0x886   : > { %v1637_v26 = vpack.c.bf16 %v1635_v19, %v1635_v19 }
 0x887   : > { %4097 = vmatprep.mubr.msk.bf16.mxu0 %vm1256_vm5, %v1636_v23  ;;  %v1703_v37 = vpop.permute.xlu1 %1702 }
 0x888   : > { %4098 = vmatmul.mubr.msk.bf16.vlgmr.msra.gmra.mrb[24].mxu0 %vm1256_vm5, %v1637_v26 }
 0x889   : > { %4105 = vmatprep.mubr.msk.bf16.mxu0 %vm1189_vm2, %v1701_v27 }
 0x88a   : > { %4102 = vmatpush3.bf16.xpose.msra.mxu0 %v1715_v28 }
 0x88b   : > { %4243 = vmatprep.subr.msk.bf16.mxu0 %vm1189_vm2, %v1707_v29 }
 0x892   : > { %4104 = vmatpush3.bf16.xpose.msra.mxu0 %v1718_v30 }
 0x893   : > { %4125 = vmatprep.subr.bf16.mxu0 %v4914_v47 }
 0x899   : > { %4106 = vmatmul.mubr.msk.bf16.vlgmr.msra.gmra.mrb[28].mxu0 %vm1189_vm2, %v1703_v37 }
 0x89a   : > { %4126 = vmatpush3.bf16.msra.mxu0 %v4914_v47 }
 0x89b   : > { %4247 = vmatprep.subr.msk.bf16.mxu0 %vm1300_vm6, %v5010_v41 }
 0x89e   : > { %4128 = vmatpush3.bf16.msra.mxu0 %v2032_v42 }
 0x95b   : > { %v5018_v43 = vpop.f32.mrb[24].mxu0 }
 0x95c   : > { %v5020_v44 = vpop.f32.mrb[25].mxu0 }
 0x95d   : > { %v4100_v45 = vpop.f32.mrb[26].mxu0 }
 0x95e   : > { %v5022_v4 = vpop.f32.mrb[27].mxu0 }
 0x95f   : > { %v4285_v52 = vpack.i.bf16 %v5022_v4, %v5020_v44 }
 0x96c   : > { %v4107_v46 = vpop.f32.mrb[28].mxu0 }
 0x96d   : > { %v1754_v48 = vpop.f32.mrb[29].mxu0  ;;  %v1770_v50 = vmul.f32 0.17677669, %v4107_v46 }
 0x96e   : > { %v1768_v51 = vmul.f32 0.17677669, %v1754_v48  ;;  %v4108_v53 = vpop.f32.mrb[30].mxu0  ;;  %v5047_v48 = vpack.c.bf16 %v4850_v35, %v4850_v35 }
 0x96f   : > { %v1757_v54 = vpop.f32.mrb[31].mxu0  ;;  %v1773_v59 = vadd.f32 %v1770_v50, %v4882_v49  ;;  %v1929_v50 = vsel %vm1189_vm2, %v4848_v34, 0  ;;  %v5059_v53 = vpack.c.bf16 %v4846_v32, %v4846_v32 }
 0x970   : > { %v1769_v55 = vmul.f32 0.17677669, %v1757_v54  ;;  %v1771_v56 = vadd.f32 %v1768_v51, %v4882_v49  ;;  %v1932_v51 = vsel %vm1189_vm2, %v5047_v48, 0 }
 0x971   : > { %v1780_v61 = vsel %vm1256_vm5, %v1773_v59, -inf }
 0x972   : > { %v1774_v57 = vsel %vm1256_vm5, %v1771_v56, -inf  ;;  %v1772_v58 = vadd.f32 %v1769_v55, %v4882_v49 }
 0x973   : > { %1775 = vmax.xlane.f32.xlu0 %v1774_v57 }
 0x974   : > { %v1777_v60 = vsel %vm1256_vm5, %v1772_v58, -inf }
 0x975   : > { %1778 = vmax.xlane.f32.xlu1 %v1777_v60 }
 0x977   : > { %1781 = vmax.xlane.f32.xlu0 %v1780_v61 }
 0xa00   : > { %v1776_v62 = vpop.xlane.xlu0 %1775 }
 0xa01   : > { %v1783_v3 = vsub.f32 %v1771_v56, %v1776_v62 }
 0xa02   : > { %v1779_v5 = vpop.xlane.xlu1 %1778 }
 0xa03   : > { %v1786_v6 = vmul.f32 1.442695, %v1783_v3  ;;  %v1784_v9 = vsub.f32 %v1772_v58, %v1779_v5 }
 0xa04   : > { %v1782_v12 = vpop.xlane.xlu0 %1781 }
 0xa05   : > { %4441 = vpow2.f32 %v1786_v6  ;;  %v1788_v15 = vmul.f32 1.442695, %v1784_v9  ;;  %v1785_v14 = vsub.f32 %v1773_v59, %v1782_v12 }
 0xa07   : > { %4443 = vpow2.f32 %v1788_v15  ;;  %v1790_v16 = vmul.f32 1.442695, %v1785_v14 }
 0xa09   : > { %4445 = vpow2.f32 %v1790_v16 }
 0xa0f   : > { %v4442_v22 = vpop.eup %4441 }
 0xa10   : > { %v1792_v17 = vsel %vm1256_vm5, %v4442_v22, 0.0 }
 0xa11   : > { %v4444_v13 = vpop.eup %4443  ;;  %1793 = vadd.xlane.f32.xlu0 %v1792_v17 }
 0xa12   : > { %v1795_v18 = vsel %vm1256_vm5, %v4444_v13, 0.0 }
 0xa13   : > { %v4446_v36 = vpop.eup %4445 }
 0xa14   : > { %v1798_v1 = vsel %vm1256_vm5, %v4446_v36, 0.0 }
 0xa15   : > { %1799 = vadd.xlane.f32.xlu1 %v1798_v1  ;;  %1796 = vadd.xlane.f32.xlu0 %v1795_v18 }
 0xa26   : > { %1811 = vrot.lane.b32.xlu1 %v4904_v40, %s4567_s17 }
 0xa2b   : > { %1809 = vrot.lane.b32.xlu0 %v4896_v11, %s4567_s17 }
 0xa9e   : > { %v1794_v19 = vpop.xlane.xlu0 %1793 }
 0xa9f   : > { %4447 = vrcp.f32 %v1794_v19 }
 0xaa2   : > { %v1797_v23 = vpop.xlane.xlu0 %1796  ;;  %v1800_v26 = vpop.xlane.xlu1 %1799 }
 0xaa3   : > { %4449 = vrcp.f32 %v1797_v23 }
 0xaa4   : > { %4451 = vrcp.f32 %v1800_v26 }
 0xaa6   : > { %v1810_v27 = vpop.permute.xlu0 %1809  ;;  %v1812_v28 = vpop.permute.xlu1 %1811 }
 0xaa7   : > { %4109 = vmatprep.subr.bf16.mxu1 %v1810_v27  ;;  %v1821_v30 = vsel %vm1300_vm6, %v1812_v28, 0 }
 0xaa8   : > { %4110 = vmatpush3.bf16.msra.mxu1 %v1810_v27 }
 0xaa9   : > { %4244 = vmatprep.subr.msk.bf16.mxu1 %vm1300_vm6, %v1812_v28  ;;  %v4448_v29 = vpop.eup %4447 }
 0xaaa   : > { %v1804_v33 = vmul.f32 %v4448_v29, %v4442_v22 }
 0xaac   : > { %4112 = vmatpush3.bf16.msra.mxu1 %v1821_v30 }
 0xaad   : > { %v4450_v40 = vpop.eup %4449  ;;  %4245 = vmatprep.subr.msk.bf16.mxu1 %vm1189_vm2, %v4848_v34 }
 0xaae   : > { %v4452_v11 = vpop.eup %4451  ;;  %v1805_v37 = vmul.f32 %v4450_v40, %v4444_v13 }
 0xaaf   : > { %v1806_v42 = vmul.f32 %v4452_v11, %v4446_v36 }
 0xab0   : > { %v1807_v45 = vpack.c.bf16 %v1805_v37, %v1804_v33 }
 0xab1   : > { %v1808_v46 = vpack.c.bf16 %v1806_v42, %v1806_v42 }
 0xab2   : > { %4113 = vmatprep.mubr.msk.bf16.mxu1 %vm1256_vm5, %v1807_v45 }
 0xab3   : > { %4114 = vmatmul.mubr.msk.bf16.vlgmr.msra.gmra.mrb[20].mxu1 %vm1256_vm5, %v1808_v46 }
 0xab4   : > { %4121 = vmatprep.mubr.msk.bf16.mxu1 %vm1189_vm2, %v4844_v31 }
 0xab5   : > { %4118 = vmatpush3.bf16.xpose.msra.mxu1 %v1929_v50 }
 0xab6   : > { %4246 = vmatprep.subr.msk.bf16.mxu1 %vm1189_vm2, %v5047_v48 }
 0xabd   : > { %4120 = vmatpush3.bf16.xpose.msra.mxu1 %v1932_v51 }
 0xac4   : > { %4122 = vmatmul.mubr.msk.bf16.vlgmr.msra.gmra.mrb[24].mxu1 %vm1189_vm2, %v5059_v53 }
 0xb86   : > { %v5063_v35 = vpop.f32.mrb[20].mxu1 }
 0xb87   : > { %v5065_v54 = vpop.f32.mrb[21].mxu1 }
 0xb88   : > { %v4116_v55 = vpop.f32.mrb[22].mxu1 }
 0xb89   : > { %v5067_v56 = vpop.f32.mrb[23].mxu1 }
 0xb8a   : > { %v4290_v57 = vpack.i.bf16 %v5067_v56, %v5065_v54 }
 0xb97   : > { %v4123_v58 = vpop.f32.mrb[24].mxu1 }
 0xb98   : > { %v1968_v59 = vpop.f32.mrb[25].mxu1  ;;  %v1984_v32 = vmul.f32 0.17677669, %v4123_v58 }
 0xb99   : > { %v1982_v60 = vmul.f32 0.17677669, %v1968_v59  ;;  %v4124_v61 = vpop.f32.mrb[26].mxu1 }
 0xb9a   : > { %v1971_v62 = vpop.f32.mrb[27].mxu1  ;;  %v1987_v15 = vadd.f32 %v1984_v32, %v4882_v49 }
 0xb9b   : > { %v1983_v3 = vmul.f32 0.17677669, %v1971_v62  ;;  %v1985_v5 = vadd.f32 %v1982_v60, %v4882_v49 }
 0xb9c   : > { %v1994_v14 = vsel %vm1256_vm5, %v1987_v15, -inf }
 0xb9d   : > { %v1988_v6 = vsel %vm1256_vm5, %v1985_v5, -inf  ;;  %v1986_v9 = vadd.f32 %v1983_v3, %v4882_v49 }
 0xb9e   : > { %1989 = vmax.xlane.f32.xlu1 %v1988_v6 }
 0xb9f   : > { %v1991_v12 = vsel %vm1256_vm5, %v1986_v9, -inf }
 0xba0   : > { %1992 = vmax.xlane.f32.xlu0 %v1991_v12 }
 0xba4   : > { %1995 = vmax.xlane.f32.xlu0 %v1994_v14 }
 0xc2b   : > { %v1990_v16 = vpop.xlane.xlu1 %1989 }
 0xc2c   : > { %v1997_v22 = vsub.f32 %v1985_v5, %v1990_v16 }
 0xc2d   : > { %v1993_v17 = vpop.xlane.xlu0 %1992 }
 0xc2e   : > { %v2000_v13 = vmul.f32 1.442695, %v1997_v22  ;;  %v1998_v36 = vsub.f32 %v1986_v9, %v1993_v17 }
 0xc30   : > { %4453 = vpow2.f32 %v2000_v13  ;;  %v2002_v1 = vmul.f32 1.442695, %v1998_v36 }
 0xc31   : > { %v1996_v18 = vpop.xlane.xlu0 %1995 }
 0xc32   : > { %4455 = vpow2.f32 %v2002_v1  ;;  %v1999_v19 = vsub.f32 %v1987_v15, %v1996_v18 }
 0xc34   : > { %v2004_v23 = vmul.f32 1.442695, %v1999_v19 }
 0xc36   : > { %4457 = vpow2.f32 %v2004_v23 }
 0xc3a   : > { %v4454_v26 = vpop.eup %4453 }
 0xc3b   : > { %v2006_v27 = vsel %vm1256_vm5, %v4454_v26, 0.0 }
 0xc3c   : > { %v4456_v28 = vpop.eup %4455  ;;  %2007 = vadd.xlane.f32.xlu1 %v2006_v27 }
 0xc3d   : > { %v2009_v29 = vsel %vm1256_vm5, %v4456_v28, 0.0 }
 0xc3e   : > { %2010 = vadd.xlane.f32.xlu0 %v2009_v29 }
 0xc40   : > { %v4458_v30 = vpop.eup %4457 }
 0xc41   : > { %v2012_v40 = vsel %vm1256_vm5, %v4458_v30, 0.0 }
 0xc42   : > { %2013 = vadd.xlane.f32.xlu1 %v2012_v40 }
 0xc53   : > { %2092 = vrot.lane.b32.xlu1 %v5047_v48, %s4565_s16 }
 0xc54   : > { %2090 = vrot.lane.b32.xlu0 %v4848_v34, %s4565_s16 }
 0xc57   : > { %2084 = vrot.lane.b32.xlu1 %v4844_v31, %s4565_s16 }
 0xc5b   : > { %2086 = vrot.lane.b32.xlu1 %v5059_v53, %s4565_s16 }
 0xcc9   : > { %v2008_v11 = vpop.xlane.xlu1 %2007 }
 0xcca   : > { %4459 = vrcp.f32 %v2008_v11 }
 0xccb   : > { %v2011_v33 = vpop.xlane.xlu0 %2010 }
 0xccc   : > { %4461 = vrcp.f32 %v2011_v33 }
 0xccf   : > { %v2014_v37 = vpop.xlane.xlu1 %2013  ;;  %v2091_v42 = vpop.permute.xlu0 %2090 }
 0xcd0   : > { %4463 = vrcp.f32 %v2014_v37  ;;  %4248 = vmatprep.subr.msk.bf16.mxu0 %vm1189_vm2, %v2091_v42  ;;  %v2101_v62 = vsel %vm1189_vm2, %v2091_v42, 0 }
 0xcd3   : > { %v2093_v55 = vpop.permute.xlu1 %2092 }
 0xcd4   : > { %v4460_v45 = vpop.eup %4459  ;;  %v2104_v3 = vsel %vm1189_vm2, %v2093_v55, 0 }
 0xcd5   : > { %v2018_v50 = vmul.f32 %v4460_v45, %v4454_v26 }
 0xcd6   : > { %v4462_v46 = vpop.eup %4461 }
 0xcd7   : > { %v2019_v51 = vmul.f32 %v4462_v46, %v4456_v28  ;;  %v2085_v32 = vpop.permute.xlu1 %2084 }
 0xcd9   : > { %v2021_v58 = vpack.c.bf16 %v2019_v51, %v2018_v50 }
 0xcda   : > { %v4464_v59 = vpop.eup %4463 }
 0xcdb   : > { %v2020_v60 = vmul.f32 %v4464_v59, %v4458_v30  ;;  %4129 = vmatprep.mubr.msk.bf16.mxu0 %vm1256_vm5, %v2021_v58  ;;  %v2087_v5 = vpop.permute.xlu1 %2086 }
 0xcdd   : > { %v2022_v61 = vpack.c.bf16 %v2020_v60, %v2020_v60 }
 0xcdf   : > { %4130 = vmatmul.mubr.msk.bf16.vlgmr.msra.gmra.mrb[32].mxu0 %vm1256_vm5, %v2022_v61 }
 0xce0   : > { %4134 = vmatpush3.bf16.xpose.msra.mxu0 %v2101_v62  ;;  %4137 = vmatprep.mubr.msk.bf16.mxu0 %vm1189_vm2, %v2085_v32 }
 0xce1   : > { %4249 = vmatprep.subr.msk.bf16.mxu0 %vm1189_vm2, %v2093_v55 }
 0xce8   : > { %4136 = vmatpush3.bf16.xpose.msra.mxu0 %v2104_v3 }
 0xcef   : > { %4138 = vmatmul.mubr.msk.bf16.vlgmr.msra.gmra.mrb[36].mxu0 %vm1189_vm2, %v2087_v5 }
 0xdb2   : > { %v5096_v6 = vpop.f32.mrb[32].mxu0 }
 0xdb3   : > { %v5098_v9 = vpop.f32.mrb[33].mxu0 }
 0xdb4   : > { %v4132_v12 = vpop.f32.mrb[34].mxu0 }
 0xdb5   : > { %v5100_v15 = vpop.f32.mrb[35].mxu0 }
 0xdc2   : > { %v4139_v14 = vpop.f32.mrb[36].mxu0 }
 0xdc3   : > { %v2140_v16 = vpop.f32.mrb[37].mxu0  ;;  %v2156_v22 = vmul.f32 0.17677669, %v4139_v14 }
 0xdc4   : > { %v2154_v17 = vmul.f32 0.17677669, %v2140_v16  ;;  %v4140_v13 = vpop.f32.mrb[38].mxu0 }
 0xdc5   : > { %v2143_v36 = vpop.f32.mrb[39].mxu0  ;;  %v2159_v26 = vadd.f32 %v2156_v22, %v4882_v49 }
 0xdc6   : > { %v2155_v1 = vmul.f32 0.17677669, %v2143_v36  ;;  %v2157_v18 = vadd.f32 %v2154_v17, %v4882_v49 }
 0xdc7   : > { %v2166_v28 = vsel %vm1256_vm5, %v2159_v26, -inf }
 0xdc8   : > { %v2160_v19 = vsel %vm1256_vm5, %v2157_v18, -inf  ;;  %v2158_v23 = vadd.f32 %v2155_v1, %v4882_v49 }
 0xdc9   : > { %2161 = vmax.xlane.f32.xlu0 %v2160_v19 }
 0xdca   : > { %v2163_v27 = vsel %vm1256_vm5, %v2158_v23, -inf }
 0xdcb   : > { %2164 = vmax.xlane.f32.xlu1 %v2163_v27 }
 0xdcd   : > { %2167 = vmax.xlane.f32.xlu0 %v2166_v28 }
 0xe56   : > { %v2162_v29 = vpop.xlane.xlu0 %2161 }
 0xe57   : > { %v2169_v30 = vsub.f32 %v2157_v18, %v2162_v29 }
 0xe58   : > { %v2165_v40 = vpop.xlane.xlu1 %2164 }
 0xe59   : > { %v2172_v11 = vmul.f32 1.442695, %v2169_v30  ;;  %v2170_v33 = vsub.f32 %v2158_v23, %v2165_v40 }
 0xe5a   : > { %v2168_v37 = vpop.xlane.xlu0 %2167 }
 0xe5b   : > { %4465 = vpow2.f32 %v2172_v11  ;;  %v2174_v42 = vmul.f32 1.442695, %v2170_v33  ;;  %v2171_v45 = vsub.f32 %v2159_v26, %v2168_v37 }
 0xe5d   : > { %4467 = vpow2.f32 %v2174_v42  ;;  %v2176_v46 = vmul.f32 1.442695, %v2171_v45 }
 0xe5f   : > { %4469 = vpow2.f32 %v2176_v46 }
 0xe65   : > { %v4466_v50 = vpop.eup %4465 }
 0xe66   : > { %v2178_v51 = vsel %vm1256_vm5, %v4466_v50, 0.0 }
 0xe67   : > { %v4468_v55 = vpop.eup %4467  ;;  %2179 = vadd.xlane.f32.xlu0 %v2178_v51 }
 0xe68   : > { %v2181_v60 = vsel %vm1256_vm5, %v4468_v55, 0.0 }
 0xe69   : > { %v4470_v58 = vpop.eup %4469 }
 0xe6a   : > { %v2184_v59 = vsel %vm1256_vm5, %v4470_v58, 0.0 }
 0xe6b   : > { %2185 = vadd.xlane.f32.xlu1 %v2184_v59  ;;  %2182 = vadd.xlane.f32.xlu0 %v2181_v60 }
 0xe7c   : > { %2199 = vrot.lane.b32.xlu1 %v5010_v41, %s4565_s16 }
 0xe80   : > { %2263 = vrot.lane.b32.xlu1 %v4848_v34, %s4566_s27 }
 0xe81   : > { %2197 = vrot.lane.b32.xlu0 %v4914_v47, %s4565_s16 }
 0xe84   : > { %2265 = vrot.lane.b32.xlu1 %v5047_v48, %s4566_s27 }
 0xe85   : > { %2259 = vrot.lane.b32.xlu0 %v4844_v31, %s4566_s27 }
 0xe88   : > { %2261 = vrot.lane.b32.xlu1 %v5059_v53, %s4566_s27 }
 0xef4   : > { %v2180_v61 = vpop.xlane.xlu0 %2179 }
 0xef5   : > { %4471 = vrcp.f32 %v2180_v61 }
 0xef8   : > { %v2183_v62 = vpop.xlane.xlu0 %2182  ;;  %v2186_v32 = vpop.xlane.xlu1 %2185 }
 0xef9   : > { %4473 = vrcp.f32 %v2183_v62 }
 0xefa   : > { %4475 = vrcp.f32 %v2186_v32 }
 0xefc   : > { %v2198_v3 = vpop.permute.xlu0 %2197  ;;  %v2200_v5 = vpop.permute.xlu1 %2199 }
 0xefd   : > { %4141 = vmatprep.subr.bf16.mxu1 %v2198_v3  ;;  %v2209_v14 = vsel %vm1300_vm6, %v2200_v5, 0 }
 0xefe   : > { %4142 = vmatpush3.bf16.msra.mxu1 %v2198_v3 }
 0xeff   : > { %4250 = vmatprep.subr.msk.bf16.mxu1 %vm1300_vm6, %v2200_v5  ;;  %v4472_v12 = vpop.eup %4471 }
 0xf00   : > { %v2264_v16 = vpop.permute.xlu1 %2263  ;;  %v2190_v13 = vmul.f32 %v4472_v12, %v4466_v50  ;;  %v2260_v23 = vpop.permute.xlu0 %2259 }
 0xf01   : > { %v2274_v26 = vsel %vm1189_vm2, %v2264_v16, 0 }
 0xf02   : > { %4144 = vmatpush3.bf16.msra.mxu1 %v2209_v14 }
 0xf03   : > { %v4474_v22 = vpop.eup %4473  ;;  %4251 = vmatprep.subr.msk.bf16.mxu1 %vm1189_vm2, %v2264_v16 }
 0xf04   : > { %v4476_v17 = vpop.eup %4475  ;;  %v2191_v36 = vmul.f32 %v4474_v22, %v4468_v55  ;;  %v2266_v27 = vpop.permute.xlu1 %2265 }
 0xf05   : > { %v2192_v1 = vmul.f32 %v4476_v17, %v4470_v58  ;;  %v2277_v28 = vsel %vm1189_vm2, %v2266_v27, 0 }
 0xf06   : > { %v2193_v18 = vpack.c.bf16 %v2191_v36, %v2190_v13 }
 0xf07   : > { %v2194_v19 = vpack.c.bf16 %v2192_v1, %v2192_v1 }
 0xf08   : > { %4145 = vmatprep.mubr.msk.bf16.mxu1 %vm1256_vm5, %v2193_v18  ;;  %v2262_v29 = vpop.permute.xlu1 %2261 }
 0xf09   : > { %4146 = vmatmul.mubr.msk.bf16.vlgmr.msra.gmra.mrb[28].mxu1 %vm1256_vm5, %v2194_v19 }
 0xf0a   : > { %4153 = vmatprep.mubr.msk.bf16.mxu1 %vm1189_vm2, %v2260_v23 }
 0xf0b   : > { %4150 = vmatpush3.bf16.xpose.msra.mxu1 %v2274_v26 }
 0xf0c   : > { %4252 = vmatprep.subr.msk.bf16.mxu1 %vm1189_vm2, %v2266_v27 }
 0xf13   : > { %4152 = vmatpush3.bf16.xpose.msra.mxu1 %v2277_v28 }
 0xf1a   : > { %4154 = vmatmul.mubr.msk.bf16.vlgmr.msra.gmra.mrb[32].mxu1 %vm1189_vm2, %v2262_v29 }
 0xfdc   : > { %v5133_v30 = vpop.f32.mrb[28].mxu1 }
 0xfdd   : > { %v5135_v40 = vpop.f32.mrb[29].mxu1 }
 0xfde   : > { %v4295_v11 = vpack.i.bf16 %v5135_v40, %v4969_v20  ;;  %v4148_v33 = vpop.f32.mrb[30].mxu1 }
 0xfdf   : > { %v5139_v37 = vpop.f32.mrb[31].mxu1 }
 0xfe0   : > { %v4310_v42 = vpack.i.bf16 %v5133_v30, %v5139_v37 }
 0xfed   : > { %v4155_v45 = vpop.f32.mrb[32].mxu1 }
 0xfee   : > { %v2313_v46 = vpop.f32.mrb[33].mxu1  ;;  %v2329_v50 = vmul.f32 0.17677669, %v4155_v45 }
 0xfef   : > { %v2327_v51 = vmul.f32 0.17677669, %v2313_v46  ;;  %v4156_v55 = vpop.f32.mrb[34].mxu1 }
 0xff0   : > { %v2316_v58 = vpop.f32.mrb[35].mxu1  ;;  %v2332_v32 = vadd.f32 %v2329_v50, %v4882_v49 }
 0xff1   : > { %v2328_v59 = vmul.f32 0.17677669, %v2316_v58  ;;  %v2330_v60 = vadd.f32 %v2327_v51, %v4882_v49 }
 0xff2   : > { %v2339_v5 = vsel %vm1256_vm5, %v2332_v32, -inf }
 0xff3   : > { %v2333_v61 = vsel %vm1256_vm5, %v2330_v60, -inf  ;;  %v2331_v62 = vadd.f32 %v2328_v59, %v4882_v49 }
 0xff4   : > { %2334 = vmax.xlane.f32.xlu0 %v2333_v61 }
 0xff5   : > { %v2336_v3 = vsel %vm1256_vm5, %v2331_v62, -inf }
 0xff6   : > { %2337 = vmax.xlane.f32.xlu1 %v2336_v3 }
 0xff8   : > { %2340 = vmax.xlane.f32.xlu0 %v2339_v5 }
0x1081   : > { %v2335_v12 = vpop.xlane.xlu0 %2334 }
0x1082   : > { %v2342_v14 = vsub.f32 %v2330_v60, %v2335_v12 }
0x1083   : > { %v2338_v16 = vpop.xlane.xlu1 %2337 }
0x1084   : > { %v2345_v22 = vmul.f32 1.442695, %v2342_v14  ;;  %v2343_v17 = vsub.f32 %v2331_v62, %v2338_v16 }
0x1085   : > { %v2341_v13 = vpop.xlane.xlu0 %2340 }
0x1086   : > { %4477 = vpow2.f32 %v2345_v22  ;;  %v2347_v36 = vmul.f32 1.442695, %v2343_v17  ;;  %v2344_v1 = vsub.f32 %v2332_v32, %v2341_v13 }
0x1088   : > { %4479 = vpow2.f32 %v2347_v36  ;;  %v2349_v18 = vmul.f32 1.442695, %v2344_v1 }
0x108a   : > { %4481 = vpow2.f32 %v2349_v18 }
0x1090   : > { %v4478_v19 = vpop.eup %4477 }
0x1091   : > { %v2351_v23 = vsel %vm1256_vm5, %v4478_v19, 0.0 }
0x1092   : > { %v4480_v26 = vpop.eup %4479  ;;  %2352 = vadd.xlane.f32.xlu0 %v2351_v23 }
0x1093   : > { %v2354_v29 = vsel %vm1256_vm5, %v4480_v26, 0.0 }
0x1094   : > { %v4482_v27 = vpop.eup %4481 }
0x1095   : > { %v2357_v28 = vsel %vm1256_vm5, %v4482_v27, 0.0 }
0x1096   : > { %2358 = vadd.xlane.f32.xlu1 %v2357_v28  ;;  %2355 = vadd.xlane.f32.xlu0 %v2354_v29 }
0x10a7   : > { %2370 = vrot.lane.b32.xlu1 %v5010_v41, %s4566_s27 }
0x10ab   : > { %2434 = vrot.lane.b32.xlu1 %v4848_v34, %s4567_s17 }
0x10ac   : > { %2368 = vrot.lane.b32.xlu0 %v4914_v47, %s4566_s27 }
0x10af   : > { %2436 = vrot.lane.b32.xlu1 %v5047_v48, %s4567_s17 }
0x10b0   : > { %2430 = vrot.lane.b32.xlu0 %v4844_v31, %s4567_s17 }
0x10b3   : > { %2432 = vrot.lane.b32.xlu1 %v5059_v53, %s4567_s17 }
0x111f   : > { %v2353_v33 = vpop.xlane.xlu0 %2352 }
0x1120   : > { %4483 = vrcp.f32 %v2353_v33 }
0x1123   : > { %v2356_v45 = vpop.xlane.xlu0 %2355  ;;  %v2359_v46 = vpop.xlane.xlu1 %2358 }
0x1124   : > { %4485 = vrcp.f32 %v2356_v45 }
0x1125   : > { %4487 = vrcp.f32 %v2359_v46 }
0x1127   : > { %v2369_v50 = vpop.permute.xlu0 %2368  ;;  %v2371_v34 = vpop.permute.xlu1 %2370 }
0x1128   : > { %4157 = vmatprep.subr.bf16.mxu0 %v2369_v50  ;;  %v2380_v48 = vsel %vm1300_vm6, %v2371_v34, 0 }
0x1129   : > { %4158 = vmatpush3.bf16.msra.mxu0 %v2369_v50 }
0x112a   : > { %4253 = vmatprep.subr.msk.bf16.mxu0 %vm1300_vm6, %v2371_v34  ;;  %v4484_v51 = vpop.eup %4483 }
0x112b   : > { %v2435_v55 = vpop.permute.xlu1 %2434  ;;  %v2363_v58 = vmul.f32 %v4484_v51, %v4478_v19  ;;  %v2431_v32 = vpop.permute.xlu0 %2430 }
0x112c   : > { %v2445_v3 = vsel %vm1189_vm2, %v2435_v55, 0 }
0x112d   : > { %4160 = vmatpush3.bf16.msra.mxu0 %v2380_v48 }
0x112e   : > { %v4486_v31 = vpop.eup %4485  ;;  %4254 = vmatprep.subr.msk.bf16.mxu0 %vm1189_vm2, %v2435_v55 }
0x112f   : > { %v4488_v53 = vpop.eup %4487  ;;  %v2364_v59 = vmul.f32 %v4486_v31, %v4480_v26  ;;  %v2437_v5 = vpop.permute.xlu1 %2436 }
0x1130   : > { %v2365_v60 = vmul.f32 %v4488_v53, %v4482_v27  ;;  %v2448_v12 = vsel %vm1189_vm2, %v2437_v5, 0 }
0x1131   : > { %v2366_v61 = vpack.c.bf16 %v2364_v59, %v2363_v58 }
0x1132   : > { %v2367_v62 = vpack.c.bf16 %v2365_v60, %v2365_v60 }
0x1133   : > { %4161 = vmatprep.mubr.msk.bf16.mxu0 %vm1256_vm5, %v2366_v61  ;;  %v2433_v14 = vpop.permute.xlu1 %2432 }
0x1134   : > { %4162 = vmatmul.mubr.msk.bf16.vlgmr.msra.gmra.mrb[40].mxu0 %vm1256_vm5, %v2367_v62 }
0x1135   : > { %4169 = vmatprep.mubr.msk.bf16.mxu0 %vm1189_vm2, %v2431_v32 }
0x1136   : > { %4166 = vmatpush3.bf16.xpose.msra.mxu0 %v2445_v3 }
0x1137   : > { %4255 = vmatprep.subr.msk.bf16.mxu0 %vm1189_vm2, %v2437_v5 }
0x113e   : > { %4168 = vmatpush3.bf16.xpose.msra.mxu0 %v2448_v12 }
0x1145   : > { %4170 = vmatmul.mubr.msk.bf16.vlgmr.msra.gmra.mrb[44].mxu0 %vm1189_vm2, %v2433_v14 }
0x1146   : > { %3019 = vmatprep.mubr.bf16.mxu0 %v4561_v38 }
0x1207   : > { %v5175_v16 = vpop.f32.mrb[40].mxu0 }
0x1208   : > { %v2416_v22 = vpop.f32.mrb[41].mxu0 }
0x1209   : > { %v4300_v17 = vpack.i.bf16 %v2416_v22, %v5018_v43  ;;  %v4164_v13 = vpop.f32.mrb[42].mxu0 }
0x120a   : > { %v5178_v36 = vpop.f32.mrb[43].mxu0 }
0x120b   : > { %v4315_v1 = vpack.i.bf16 %v5175_v16, %v5178_v36  ;;  %v4526_v16 = vld [vmem:[#allocation2] sm:$0xff] }
0x1218   : > { %v4171_v18 = vpop.f32.mrb[44].mxu0 }
0x1219   : > { %v2484_v19 = vpop.f32.mrb[45].mxu0  ;;  %v2500_v23 = vmul.f32 0.17677669, %v4171_v18  ;;  %v4357_v18 = vld [vmem:[%s4690_s24] sm:$0xff]  }
0x121a   : > { %v2498_v26 = vmul.f32 0.17677669, %v2484_v19  ;;  %v4172_v27 = vpop.f32.mrb[46].mxu0 }
0x121b   : > { %v2487_v28 = vpop.f32.mrb[47].mxu0  ;;  %v2503_v43 = vadd.f32 %v2500_v23, %v4882_v49 }
0x121c   : > { %v2499_v29 = vmul.f32 0.17677669, %v2487_v28  ;;  %v2501_v33 = vadd.f32 %v2498_v26, %v4882_v49 }
0x121d   : > { %v2510_v34 = vsel %vm1256_vm5, %v2503_v43, -inf }
0x121e   : > { %v2504_v45 = vsel %vm1256_vm5, %v2501_v33, -inf  ;;  %v2502_v46 = vadd.f32 %v2499_v29, %v4882_v49 }
0x121f   : > { %2505 = vmax.xlane.f32.xlu0 %v2504_v45 }
0x1220   : > { %v2507_v50 = vsel %vm1256_vm5, %v2502_v46, -inf }
0x1221   : > { %2508 = vmax.xlane.f32.xlu1 %v2507_v50  ;;  %v4361_v50 = vld [vmem:[%s4690_s24 + $0x20] sm:$0xff]  }
0x1223   : > { %2511 = vmax.xlane.f32.xlu0 %v2510_v34  ;;  %v4362_v34 = vld [vmem:[%s4690_s24 + $0x28] sm:$0xff]  }
0x12ac   : > { %v2506_v51 = vpop.xlane.xlu0 %2505 }
0x12ad   : > { %v2513_v48 = vsub.f32 %v2501_v33, %v2506_v51  ;;  %v4358_v33 = vld [vmem:[%s4690_s24 + $0x8] sm:$0xff]   ;;  %v4363_v51 = vld [vmem:[%s4690_s24 + $0x30] sm:$0xff]  }
0x12ae   : > { %v2509_v55 = vpop.xlane.xlu1 %2508 }
0x12af   : > { %v2516_v31 = vmul.f32 1.442695, %v2513_v48  ;;  %v2514_v53 = vsub.f32 %v2502_v46, %v2509_v55  ;;  %v4359_v46 = vld [vmem:[%s4690_s24 + $0x10] sm:$0xff]   ;;  %v4364_v48 = vld [vmem:[%s4690_s24 + $0x38] sm:$0xff]  }
0x12b0   : > { %v2512_v58 = vpop.xlane.xlu0 %2511 }
0x12b1   : > { %4489 = vpow2.f32 %v2516_v31  ;;  %v2518_v59 = vmul.f32 1.442695, %v2514_v53  ;;  %v2515_v60 = vsub.f32 %v2503_v43, %v2512_v58  ;;  %v4360_v43 = vld [vmem:[%s4690_s24 + $0x18] sm:$0xff]  }
0x12b3   : > { %4491 = vpow2.f32 %v2518_v59  ;;  %v2520_v61 = vmul.f32 1.442695, %v2515_v60 }
0x12b5   : > { %4493 = vpow2.f32 %v2520_v61 }
0x12bb   : > { %v4490_v49 = vpop.eup %4489 }
0x12bc   : > { %v2522_v62 = vsel %vm1256_vm5, %v4490_v49, 0.0 }
0x12bd   : > { %v4492_v32 = vpop.eup %4491  ;;  %2523 = vadd.xlane.f32.xlu0 %v2522_v62  ;;  %v5260_v62 = vld [vmem:[%s5542_s0] ss:$0 sm:$0xff]  ;;  %s5549_s0 = sld [smem:[#allocation14_spill]] (!%p3858_p5) }
0x12be   : > { %v2525_v12 = vsel %vm1256_vm5, %v4492_v32, 0.0 }
0x12bf   : > { %v4494_v3 = vpop.eup %4493 }
0x12c0   : > { %v2528_v5 = vsel %vm1256_vm5, %v4494_v3, 0.0 }
0x12c1   : > { %2529 = vadd.xlane.f32.xlu1 %v2528_v5  ;;  %2526 = vadd.xlane.f32.xlu0 %v2525_v12  ;;  %v4525_v5 = vld [vmem:[#allocation2 + $0x8] sm:$0xff] }
0x12d2   : > { %2541 = vrot.lane.b32.xlu1 %v5010_v41, %s4567_s17 }
0x12d6   : > { %4281 = vrot.lane.b32.xlu1 %v4280_v25, %s4567_s17 }
0x12d7   : > { %2539 = vrot.lane.b32.xlu0 %v4914_v47, %s4567_s17 }
0x12da   : > { %4286 = vrot.lane.b32.xlu1 %v4285_v52, %s4566_s27 }
0x12db   : > { %4291 = vrot.lane.b32.xlu0 %v4290_v57, %s4565_s16 }
0x12de   : > { %4296 = vrot.lane.b32.xlu1 %v4295_v11, %s4567_s17 }
0x12df   : > { %4301 = vrot.lane.b32.xlu0 %v4300_v17, %s4566_s27 }
0x12e3   : > { %4311 = vrot.lane.b32.xlu0 %v4310_v42, %s4567_s17  ;;  %s5548_s17 = sld [smem:[#allocation12_spill]] (!%p3858_p5) }
0x134a   : > { %v2524_v47 = vpop.xlane.xlu0 %2523 }
0x134b   : > { %4495 = vrcp.f32 %v2524_v47 }
0x134e   : > { %v2527_v21 = vpop.xlane.xlu0 %2526  ;;  %v2530_v24 = vpop.xlane.xlu1 %2529 }
0x134f   : > { %4497 = vrcp.f32 %v2527_v21 }
0x1350   : > { %4499 = vrcp.f32 %v2530_v24 }
0x1352   : > { %v2540_v25 = vpop.permute.xlu0 %2539  ;;  %v2542_v41 = vpop.permute.xlu1 %2541 }
0x1353   : > { %4173 = vmatprep.subr.bf16.mxu1 %v2540_v25  ;;  %v2551_v4 = vsel %vm1300_vm6, %v2542_v41, 0 }
0x1354   : > { %4174 = vmatpush3.bf16.msra.mxu1 %v2540_v25 }
0x1355   : > { %4256 = vmatprep.subr.msk.bf16.mxu1 %vm1300_vm6, %v2542_v41  ;;  %v4496_v44 = vpop.eup %4495 }
0x1356   : > { %v4282_v20 = vpop.permute.xlu1 %4281  ;;  %v4292_v30 = vpop.permute.xlu0 %4291  ;;  %v2534_v11 = vmul.f32 %v4496_v44, %v4490_v49 }
0x1357   : > { %v4284_v52 = vunpack.i.h.bf16 %v4282_v20  ;;  %v4283_v56 = vunpack.i.l.bf16 %v4282_v20  ;;  %v4294_v19 = vunpack.i.h.bf16 %v4292_v30  ;;  %v4293_v28 = vunpack.i.l.bf16 %v4292_v30 }
0x1358   : > { %4176 = vmatpush3.bf16.msra.mxu1 %v2551_v4 }
0x1359   : > { %v4498_v54 = vpop.eup %4497  ;;  %4181 = vmatprep.subr.bf16.mxu1 %v4562_v39  ;;  %v1908_v22 = vsel %vm1189_vm2, %v4934_v10, %v4284_v52  ;;  %v1907_v23 = vsel %vm1189_vm2, %v4932_v8, %v4283_v56 }
0x135a   : > { %v4500_v57 = vpop.eup %4499  ;;  %v4287_v40 = vpop.permute.xlu1 %4286  ;;  %v2535_v37 = vmul.f32 %v4498_v54, %v4492_v32 }
0x135b   : > { %v2536_v42 = vmul.f32 %v4500_v57, %v4494_v3  ;;  %v4289_v14 = vunpack.i.h.bf16 %v4287_v40  ;;  %v4288_v17 = vunpack.i.l.bf16 %v4287_v40  ;;  %v4302_v21 = vpop.permute.xlu0 %4301 }
0x135c   : > { %v2537_v13 = vpack.c.bf16 %v2535_v37, %v2534_v11  ;;  %v4304_v4 = vunpack.i.h.bf16 %v4302_v21  ;;  %v4303_v52 = vunpack.i.l.bf16 %v4302_v21  ;;  %v4365_v21 = vld [vmem:[%s4718_s26] ss:$8 sps:$4 sm:$0xff]  }
0x135d   : > { %v1912_v26 = vsel %vm1910_vm7, %v1908_v22, %v4289_v14  ;;  %v2538_v27 = vpack.c.bf16 %v2536_v42, %v2536_v42  ;;  %v1911_v29 = vsel %vm1910_vm7, %v1907_v23, %v4288_v17 }
0x135e   : > { %4177 = vmatprep.mubr.msk.bf16.mxu1 %vm1256_vm5, %v2537_v13  ;;  %v1916_v10 = vsel %vm1914_vm8, %v1912_v26, %v4294_v19  ;;  %v1915_v8 = vsel %vm1914_vm8, %v1911_v29, %v4293_v28 }
0x135f   : > { %4178 = vmatmul.mubr.msk.bf16.vlgmr.msra.gmra.mrb[36].mxu1 %vm1256_vm5, %v2538_v27  ;;  %v2646_v45 = vpack.c.bf16 %v1916_v10, %v1915_v8  ;;  %v4312_v41 = vpop.permute.xlu0 %4311 }
0x1360   : > { %4182 = vmatpush3.bf16.msra.mxu1 %v4357_v18  ;;  %4197 = vmatprep.mubr.msk.bf16.mxu1 %vm4563_vm3, %v4562_v39  ;;  %v4314_v30 = vunpack.i.h.bf16 %v4312_v41  ;;  %v4313_v40 = vunpack.i.l.bf16 %v4312_v41  ;;  %v4373_v41 = vld [vmem:[%s4718_s26 + $0x24] ss:$8 sps:$4 sm:$0xff]  }
0x1361   : > { %4183 = vmatprep.subr.bf16.mxu1 %v4562_v39 }
0x1362   : > { %v2639_v18 = vsel %vm1189_vm2, %v5096_v6, %v4314_v30  ;;  %v2638_v19 = vsel %vm1189_vm2, %v5100_v15, %v4313_v40  ;;  %v4383_v30 = vld [vmem:[%s4718_s26 + $0x60] ss:$8 sps:$4 sm:$0xff]   ;;  %v4385_v40 = vld [vmem:[%s4718_s26 + $0x64] ss:$8 sps:$4 sm:$0xff]  }
0x1364   : > { %4184 = vmatpush3.bf16.msra.mxu1 %v4358_v33 }
0x1365   : > { %4185 = vmatprep.subr.bf16.mxu1 %v4562_v39 }
0x1368   : > { %4186 = vmatpush3.bf16.msra.mxu1 %v4359_v46 }
0x1369   : > { %4187 = vmatprep.subr.bf16.mxu1 %v4562_v39 }
0x136c   : > { %4188 = vmatpush3.bf16.msra.mxu1 %v4360_v43 }
0x136d   : > { %4189 = vmatprep.subr.bf16.mxu1 %v4562_v39 }
0x1370   : > { %4190 = vmatpush3.bf16.msra.mxu1 %v4361_v50  ;;  %v4527_v50 = vld [vmem:[#allocation2 + $0x10] sm:$0xff] }
0x1371   : > { %4191 = vmatprep.subr.bf16.mxu1 %v4562_v39 }
0x1374   : > { %4192 = vmatpush3.bf16.msra.mxu1 %v4362_v34 }
0x1375   : > { %4193 = vmatprep.subr.bf16.mxu1 %v4562_v39 }
0x1378   : > { %4194 = vmatpush3.bf16.msra.mxu1 %v4363_v51 }
0x1379   : > { %4195 = vmatprep.subr.bf16.mxu1 %v4562_v39 }
0x137c   : > { %4196 = vmatpush3.bf16.msra.mxu1 %v4364_v48 }
0x137f   : > { %4198 = vmatmul.mubr.bf16.vlgmr.msra.gmra.mrb[40].mxu1 %v2646_v45 }
0x1380   : > { %4201 = vmatprep.mubr.msk.bf16.mxu1 %vm4563_vm3, %v4562_v39 }
0x1432   : > { %v4179_v55 = vpop.f32.mrb[36].mxu1 }
0x1433   : > { %v2587_v31 = vpop.f32.mrb[37].mxu1 }
0x1434   : > { %v4305_v53 = vpack.i.bf16 %v2587_v31, %v5063_v35  ;;  %v4180_v58 = vpop.f32.mrb[38].mxu1 }
0x1435   : > { %v2590_v59 = vpop.f32.mrb[39].mxu1 }
0x1436   : > { %v4320_v60 = vpack.i.bf16 %v4179_v55, %v2590_v59  ;;  %4306 = vrot.lane.b32.xlu1 %v4305_v53, %s4565_s16  ;;  %v4528_v55 = vld [vmem:[#allocation2 + $0x18] sm:$0xff] }
0x1438   : > { %4321 = vrot.lane.b32.xlu0 %v4320_v60, %s4565_s16 }
0x143a   : > { %4316 = vrot.lane.b32.xlu1 %v4315_v1, %s4566_s27  ;;  %v4297_v1 = vpop.permute.xlu1 %4296  ;;  %s5545_s27 = scalar_lea.vmem %s5511_s14, %s4682_s20 }
0x143b   : > { %v4299_v24 = vunpack.i.h.bf16 %v4297_v1  ;;  %v4298_v25 = vunpack.i.l.bf16 %v4297_v1 }
0x143d   : > { %v2637_v20 = vsel %vm1189_vm2, %v5098_v9, %v4299_v24  ;;  %v1909_v44 = vsel %vm1189_vm2, %v4930_v7, %v4298_v25  ;;  %v4368_v24 = vld [vmem:[%s4718_s26 + $0x10] ss:$8 sps:$4 sm:$0xff]   ;;  %v4370_v25 = vld [vmem:[%s4718_s26 + $0x14] ss:$8 sps:$4 sm:$0xff]  }
0x143e   : > { %v1913_v11 = vsel %vm1910_vm7, %v1909_v44, %v4303_v52  ;;  %v2640_v37 = vsel %vm1910_vm7, %v2637_v20, %v4304_v4  ;;  %v4371_v20 = vld [vmem:[%s4718_s26 + $0x20] ss:$8 sps:$4 sm:$0xff]   ;;  %v4376_v44 = vld [vmem:[%s4718_s26 + $0x34] ss:$8 sps:$4 sm:$0xff]   ;;  %v4374_v4 = vld [vmem:[%s4718_s26 + $0x30] ss:$8 sps:$4 sm:$0xff]  }
0x143f   : > { %v4379_v52 = vld [vmem:[%s4718_s26 + $0x44] ss:$8 sps:$4 sm:$0xff]  }
0x1452   : > { %v2754_v61 = vpop.f32.mrb[40].mxu1 }
0x1453   : > { %v4199_v49 = vpop.f32.mrb[41].mxu1  ;;  %v2755_v47 = vadd.f32 %v5260_v62, %v2754_v61 }
0x1454   : > { %v2757_v35 = vpop.f32.mrb[42].mxu1 }
0x1455   : > { %v2758_v32 = vadd.f32 %v5260_v62, %v2757_v35  ;;  %v4200_v3 = vpop.f32.mrb[43].mxu1  ;;  %v2777_v36 = vadd.f32 %v4526_v16, %v2755_v47  ;;  %v4530_v16 = vld [vmem:[#allocation2 + $0x28] sm:$0xff] }
0x1456   : > { %v4529_v3 = vld [vmem:[#allocation2 + $0x20] sm:$0xff] }
0x1457   : > { %v5263_v12 = vadd.f32 %v4525_v5, %v2758_v32 }
0x1459   : > { %2787 = vadd.xlane.f32.xlu0 %v5263_v12 }
0x145e   : > { %2785 = vadd.xlane.f32.xlu1 %v2777_v36 }
0x14a8   : > { %v4307_v54 = vpop.permute.xlu1 %4306 }
0x14a9   : > { %v4309_v56 = vunpack.i.h.bf16 %v4307_v54  ;;  %v4308_v57 = vunpack.i.l.bf16 %v4307_v54  ;;  %v4377_v54 = vld [vmem:[%s4718_s26 + $0x40] ss:$8 sps:$4 sm:$0xff]  }
0x14aa   : > { %v4322_v42 = vpop.permute.xlu0 %4321 }
0x14ab   : > { %v1917_v14 = vsel %vm1914_vm8, %v1913_v11, %v4308_v57  ;;  %v2643_v22 = vsel %vm1914_vm8, %v2640_v37, %v4309_v56  ;;  %v4324_v23 = vunpack.i.h.bf16 %v4322_v42  ;;  %v4323_v26 = vunpack.i.l.bf16 %v4322_v42  ;;  %v4382_v56 = vld [vmem:[%s4718_s26 + $0x54] ss:$8 sps:$4 sm:$0xff]   ;;  %v4380_v57 = vld [vmem:[%s4718_s26 + $0x50] ss:$8 sps:$4 sm:$0xff]  }
0x14ac   : > { %v4317_v9 = vpop.permute.xlu1 %4316  ;;  %v2647_v17 = vpack.c.bf16 %v2643_v22, %v1917_v14  ;;  %v4388_v11 = vld [vmem:[%s4718_s26 + $0x74] ss:$8 sps:$4 sm:$0xff]   ;;  %v4386_v37 = vld [vmem:[%s4718_s26 + $0x70] ss:$8 sps:$4 sm:$0xff]  }
0x14ad   : > { %v4319_v13 = vunpack.i.h.bf16 %v4317_v9  ;;  %v4318_v7 = vunpack.i.l.bf16 %v4317_v9 }
0x14ae   : > { %4202 = vmatmul.mubr.bf16.gmra.mrb[44].mxu1 %v2647_v17 }
0x14af   : > { %v2642_v27 = vsel %vm1910_vm7, %v2639_v18, %v4319_v13  ;;  %v2641_v28 = vsel %vm1910_vm7, %v2638_v19, %v4318_v7  ;;  %4205 = vmatprep.mubr.msk.bf16.mxu1 %vm4563_vm3, %v4562_v39 }
0x14b0   : > { %v2644_v29 = vsel %vm1914_vm8, %v2641_v28, %v4323_v26  ;;  %v2645_v10 = vsel %vm1914_vm8, %v2642_v27, %v4324_v23 }
0x14b1   : > { %v2648_v33 = vpack.c.bf16 %v2645_v10, %v2644_v29 }
0x14b6   : > { %4206 = vmatmul.mubr.bf16.gmra.mrb[48].mxu1 %v2648_v33 }
0x14e6   : > { %v2788_v48 = vpop.xlane.xlu0 %2787 }
0x14e7   : > { %v2799_v58 = vmul.f32 0.0078125, %v2788_v48 }
0x14e9   : > { %v5292_v47 = vsub.f32 %v5263_v12, %v2799_v58  ;;  %v4367_v12 = vld [vmem:[%s4718_s26 + $0x4] ss:$8 sps:$4 sm:$0xff]  }
0x14ea   : > { %2987 = vmatprep.subr.bf16.mxu0 %v4367_v12  ;;  %v4401_v12 = vld [vmem:[%s4729_s15 + $0x70] sm:$0xff]  }
0x14eb   : > { %v2786_v51 = vpop.xlane.xlu1 %2785  ;;  %2988 = vmatpush1.bf16.msra.mxu0 %v4365_v21  ;;  %v4400_v21 = vld [vmem:[%s4729_s15 + $0x28] sm:$0xff]  }
0x14ec   : > { %v2798_v39 = vmul.f32 0.0078125, %v2786_v51  ;;  %2989 = vmatprep.subr.bf16.mxu0 %v4370_v25  ;;  %v4403_v25 = vld [vmem:[%s4729_s15 + $0x78] sm:$0xff]  }
0x14ee   : > { %v5288_v49 = vsub.f32 %v2777_v36, %v2798_v39 }
0x14ef   : > { %2990 = vmatpush1.bf16.msra.mxu0 %v4368_v24  ;;  %v4402_v24 = vld [vmem:[%s4729_s15 + $0x30] sm:$0xff]  }
0x14f0   : > { %v2810_v36 = vmul.f32 %v5288_v49, %v5288_v49  ;;  %2991 = vmatprep.subr.bf16.mxu0 %v4373_v41  ;;  %v4404_v41 = vld [vmem:[%s4729_s15 + $0x38] sm:$0xff]  }
0x14f3   : > { %2992 = vmatpush1.bf16.msra.mxu0 %v4371_v20 }
0x14f4   : > { %2993 = vmatprep.subr.bf16.mxu0 %v4376_v44 }
0x14f7   : > { %2994 = vmatpush1.bf16.msra.mxu0 %v4374_v4 }
0x14f8   : > { %2995 = vmatprep.subr.bf16.mxu0 %v4379_v52 }
0x14fb   : > { %2996 = vmatpush1.bf16.msra.mxu0 %v4377_v54 }
0x14fc   : > { %2997 = vmatprep.subr.bf16.mxu0 %v4382_v56 }
0x14ff   : > { %2998 = vmatpush1.bf16.msra.mxu0 %v4380_v57 }
0x1500   : > { %2999 = vmatprep.subr.bf16.mxu0 %v4385_v40 }
0x1503   : > { %3000 = vmatpush1.bf16.msra.mxu0 %v4383_v30 }
0x1504   : > { %3001 = vmatprep.subr.bf16.mxu0 %v4388_v11 }
0x1507   : > { %3002 = vmatpush1.bf16.msra.mxu0 %v4386_v37 }
0x1581   : > { %v2762_v6 = vpop.f32.mrb[44].mxu1 }
0x1582   : > { %v2763_v8 = vadd.f32 %v5260_v62, %v2762_v6  ;;  %v4203_v15 = vpop.f32.mrb[45].mxu1 }
0x1583   : > { %v2765_v45 = vpop.f32.mrb[46].mxu1 }
0x1584   : > { %v2766_v46 = vadd.f32 %v5260_v62, %v2765_v45  ;;  %v4204_v43 = vpop.f32.mrb[47].mxu1  ;;  %v2779_v34 = vadd.f32 %v4527_v50, %v2763_v8 }
0x1586   : > { %2789 = vadd.xlane.f32.xlu0 %v2779_v34  ;;  %v2780_v31 = vadd.f32 %v4528_v55, %v2766_v46 }
0x1589   : > { %v2770_v53 = vpop.f32.mrb[48].mxu1 }
0x158a   : > { %v2771_v59 = vadd.f32 %v5260_v62, %v2770_v53  ;;  %2791 = vadd.xlane.f32.xlu0 %v2780_v31  ;;  %v4207_v60 = vpop.f32.mrb[49].mxu1 }
0x158b   : > { %v2773_v61 = vpop.f32.mrb[50].mxu1 }
0x158c   : > { %v2774_v35 = vadd.f32 %v5260_v62, %v2773_v61  ;;  %v4208_v32 = vpop.f32.mrb[51].mxu1  ;;  %v2781_v5 = vadd.f32 %v4529_v3, %v2771_v59  ;;  %v2811_v62 = vmul.f32 %v5292_v47, %v5292_v47  ;;  %v4389_v61 = vld [vmem:[%s4729_s15 + $0x40] sm:$0xff]   ;;  %v4393_v3 = vld [vmem:[%s4729_s15 + $0x50] sm:$0xff]  }
0x158d   : > { %3966 = vmatprep.subr.bf16.mxu1 %v4389_v61  ;;  %v4392_v32 = vld [vmem:[%s4729_s15 + $0x8] sm:$0xff]  }
0x158e   : > { %v2782_v1 = vadd.f32 %v4530_v16, %v2774_v35  ;;  %2793 = vadd.xlane.f32.xlu1 %v2781_v5  ;;  %v4391_v35 = vld [vmem:[%s4729_s15 + $0x48] sm:$0xff]   ;;  %v4396_v16 = vld [vmem:[%s4729_s15 + $0x18] sm:$0xff]  }
0x1590   : > { %2795 = vadd.xlane.f32.xlu0 %v2782_v1 }
0x1592   : > { %2816 = vadd.xlane.f32.xlu1 %v2810_v36  ;;  %v4398_v36 = vld [vmem:[%s4729_s15 + $0x20] sm:$0xff]  }
0x1594   : > { %2818 = vadd.xlane.f32.xlu0 %v2811_v62  ;;  %v4399_v62 = vld [vmem:[%s4729_s15 + $0x68] sm:$0xff]  }
0x1613   : > { %v2790_v42 = vpop.xlane.xlu0 %2789 }
0x1614   : > { %v2800_v14 = vmul.f32 0.0078125, %v2790_v42 }
0x1616   : > { %v5314_v22 = vsub.f32 %v2779_v34, %v2800_v14  ;;  %v5335_v34 = vld [vmem:[%s5543_s25] ss:$0 sm:$0xff]  ;;  %s5550_s25 = sld [smem:[#allocation15_spill]] (!%p3858_p5) }
0x1617   : > { %v2792_v9 = vpop.xlane.xlu0 %2791 }
0x1618   : > { %v2801_v17 = vmul.f32 0.0078125, %v2792_v9  ;;  %v2812_v13 = vmul.f32 %v5314_v22, %v5314_v22 }
0x161a   : > { %v5318_v7 = vsub.f32 %v2780_v31, %v2801_v17  ;;  %2820 = vadd.xlane.f32.xlu1 %v2812_v13  ;;  %v5345_v31 = vld [vmem:[%s5544_s5] ss:$0 sm:$0xff] }
0x161b   : > { %v2794_v18 = vpop.xlane.xlu1 %2793 }
0x161c   : > { %v2802_v19 = vmul.f32 0.0078125, %v2794_v18  ;;  %v2813_v23 = vmul.f32 %v5318_v7, %v5318_v7 }
0x161d   : > { %v2796_v26 = vpop.xlane.xlu0 %2795 }
0x161e   : > { %v5322_v27 = vsub.f32 %v2781_v5, %v2802_v19  ;;  %v2803_v28 = vmul.f32 0.0078125, %v2796_v26  ;;  %2822 = vadd.xlane.f32.xlu0 %v2813_v23  ;;  %v4394_v5 = vld [vmem:[%s4729_s15 + $0x10] sm:$0xff]  }
0x161f   : > { %v2817_v29 = vpop.xlane.xlu1 %2816 }
0x1620   : > { %v5324_v10 = vsub.f32 %v2782_v1, %v2803_v28  ;;  %v2828_v33 = vmul.f32 0.0078125, %v2817_v29  ;;  %v2814_v6 = vmul.f32 %v5322_v27, %v5322_v27  ;;  %v4397_v1 = vld [vmem:[%s4729_s15 + $0x60] sm:$0xff]  }
0x1621   : > { %v2819_v8 = vpop.xlane.xlu0 %2818 }
0x1622   : > { %v2834_v15 = vadd.f32 1e-05, %v2828_v33  ;;  %v2829_v45 = vmul.f32 0.0078125, %v2819_v8  ;;  %2824 = vadd.xlane.f32.xlu1 %v2814_v6  ;;  %v2815_v46 = vmul.f32 %v5324_v10, %v5324_v10 }
0x1624   : > { %4501 = vrsqrt.f32 %v2834_v15  ;;  %v2835_v43 = vadd.f32 1e-05, %v2829_v45  ;;  %2826 = vadd.xlane.f32.xlu0 %v2815_v46  ;;  %v2895_v46 = vld [vmem:[%s4724_s18] sm:$0x3] }
0x1626   : > { %4503 = vrsqrt.f32 %v2835_v43  ;;  %v2904_v43 = vrot.slane %v2895_v46, %v924_v2 }
0x162e   : > { %v4502_v50 = vpop.eup %4501 }
0x162f   : > { %v2846_v51 = vmul.f32 %v4502_v50, %v5288_v49  ;;  %v4390_v49 = vld [vmem:[%s4729_s15] sm:$0xff]  }
0x1630   : > { %v4504_v48 = vpop.eup %4503  ;;  %3967 = vmatpush3.bf16.msra.mxu1 %v4390_v49 }
0x1631   : > { %v2847_v39 = vmul.f32 %v4504_v48, %v5292_v47  ;;  %v2858_v55 = vmul.f32 %v5335_v34, %v2846_v51  ;;  %3968 = vmatprep.subr.bf16.mxu1 %v4391_v35  ;;  %v4395_v47 = vld [vmem:[%s4729_s15 + $0x58] sm:$0xff]  }
0x1633   : > { %v2859_v53 = vmul.f32 %v5335_v34, %v2847_v39  ;;  %v5349_v58 = vadd.f32 %v5345_v31, %v2858_v55 }
0x1634   : > { %3969 = vmatpush3.bf16.msra.mxu1 %v4392_v32 }
0x1635   : > { %v5352_v59 = vadd.f32 %v5345_v31, %v2859_v53  ;;  %3970 = vmatprep.subr.bf16.mxu1 %v4393_v3 }
0x1637   : > { %v2876_v60 = vpack.c.bf16 %v5352_v59, %v5349_v58 }
0x1638   : > { %3971 = vmatpush3.bf16.msra.mxu1 %v4394_v5 }
0x1639   : > { %3020 = vmatmul.mubr.bf16.vlgmr.msra.gmra.mrb[48].mxu0 %v2876_v60  ;;  %3972 = vmatprep.subr.bf16.mxu1 %v4395_v47 }
0x163a   : > { %3029 = vmatprep.mubr.bf16.mxu0 %v4561_v38 }
0x163c   : > { %3973 = vmatpush3.bf16.msra.mxu1 %v4396_v16 }
0x163d   : > { %3974 = vmatprep.subr.bf16.mxu1 %v4397_v1 }
0x1640   : > { %3975 = vmatpush3.bf16.msra.mxu1 %v4398_v36 }
0x1641   : > { %3976 = vmatprep.subr.bf16.mxu1 %v4399_v62 }
0x1644   : > { %3977 = vmatpush3.bf16.msra.mxu1 %v4400_v21 }
0x1645   : > { %3978 = vmatprep.subr.bf16.mxu1 %v4401_v12 }
0x1648   : > { %3979 = vmatpush3.bf16.msra.mxu1 %v4402_v24 }
0x1649   : > { %3980 = vmatprep.subr.bf16.mxu1 %v4403_v25 }
0x164c   : > { %3981 = vmatpush3.bf16.msra.mxu1 %v4404_v41 }
0x16a7   : > { %v2821_v20 = vpop.xlane.xlu1 %2820 }
0x16a8   : > { %v2830_v44 = vmul.f32 0.0078125, %v2821_v20 }
0x16aa   : > { %v2836_v4 = vadd.f32 1e-05, %v2830_v44 }
0x16ab   : > { %v2823_v52 = vpop.xlane.xlu0 %2822 }
0x16ac   : > { %4505 = vrsqrt.f32 %v2836_v4  ;;  %v2831_v54 = vmul.f32 0.0078125, %v2823_v52 }
0x16ae   : > { %v2837_v56 = vadd.f32 1e-05, %v2831_v54 }
0x16af   : > { %v2825_v57 = vpop.xlane.xlu1 %2824 }
0x16b0   : > { %4507 = vrsqrt.f32 %v2837_v56  ;;  %v2832_v30 = vmul.f32 0.0078125, %v2825_v57 }
0x16b1   : > { %v2827_v40 = vpop.xlane.xlu0 %2826 }
0x16b2   : > { %v2838_v11 = vadd.f32 1e-05, %v2832_v30  ;;  %v2833_v37 = vmul.f32 0.0078125, %v2827_v40 }
0x16b4   : > { %4509 = vrsqrt.f32 %v2838_v11  ;;  %v2839_v42 = vadd.f32 1e-05, %v2833_v37 }
0x16b6   : > { %v4506_v14 = vpop.eup %4505  ;;  %4511 = vrsqrt.f32 %v2839_v42 }
0x16b7   : > { %v2848_v9 = vmul.f32 %v4506_v14, %v5314_v22 }
0x16b9   : > { %v2860_v18 = vmul.f32 %v5335_v34, %v2848_v9 }
0x16ba   : > { %v4508_v17 = vpop.eup %4507 }
0x16bb   : > { %v2849_v13 = vmul.f32 %v4508_v17, %v5318_v7  ;;  %v5378_v26 = vadd.f32 %v5345_v31, %v2860_v18  ;;  %v3839_v17 = vld [vmem:[%s759_s23] ss:$0 sm:$0xff] }
0x16bd   : > { %v2861_v19 = vmul.f32 %v5335_v34, %v2849_v13 }
0x16be   : > { %v4510_v23 = vpop.eup %4509 }
0x16bf   : > { %v5381_v28 = vadd.f32 %v5345_v31, %v2861_v19  ;;  %v2850_v29 = vmul.f32 %v4510_v23, %v5322_v27 }
0x16c0   : > { %v4512_v33 = vpop.eup %4511 }
0x16c1   : > { %v2877_v22 = vpack.c.bf16 %v5381_v28, %v5378_v26  ;;  %v2851_v7 = vmul.f32 %v4512_v33, %v5324_v10  ;;  %v2862_v6 = vmul.f32 %v5335_v34, %v2850_v29  ;;  %v2900_v10 = vrot.slane %v2895_v46, %v920_v0 }
0x16c3   : > { %3030 = vmatmul.mubr.bf16.gmra.mrb[52].mxu0 %v2877_v22  ;;  %v2863_v8 = vmul.f32 %v5335_v34, %v2851_v7  ;;  %v5394_v45 = vadd.f32 %v5345_v31, %v2862_v6 }
0x16c4   : > { %3039 = vmatprep.mubr.bf16.mxu0 %v4561_v38 }
0x16c5   : > { %v5391_v15 = vadd.f32 %v5345_v31, %v2863_v8 }
0x16c7   : > { %v2878_v27 = vpack.c.bf16 %v5391_v15, %v5394_v45 }
0x16cb   : > { %3040 = vmatmul.mubr.bf16.gmra.mrb[56].mxu0 %v2878_v27 }
0x170c   : > { %v3021_v50 = vpop.f32.mrb[48].mxu0 }
0x170d   : > { %v3022_v34 = vadd.f32 %v3021_v50, %v2900_v10  ;;  %v3023_v38 = vpop.f32.mrb[49].mxu0 }
0x170e   : > { %v3024_v51 = vadd.f32 %v3023_v38, %v2904_v43  ;;  %v3025_v48 = vpop.f32.mrb[50].mxu0 }
0x170f   : > { %v3026_v39 = vadd.f32 %v3025_v48, %v2900_v10  ;;  %v3027_v55 = vpop.f32.mrb[51].mxu0  ;;  %v3050_v53 = vmax.f32 %v3022_v34, 0.0 }
0x1710   : > { %v3028_v31 = vadd.f32 %v3027_v55, %v2904_v43  ;;  %v3051_v61 = vmax.f32 %v3024_v51, 0.0 }
0x1711   : > { %v3052_v60 = vmax.f32 %v3026_v39, 0.0 }
0x1712   : > { %v3053_v49 = vmax.f32 %v3028_v31, 0.0 }
0x1713   : > { %v3062_v35 = vpack.c.bf16 %v3052_v60, %v3050_v53 }
0x1714   : > { %v3063_v32 = vpack.c.bf16 %v3053_v49, %v3051_v61 }
0x1716   : > { %3235 = vmatprep.mubr.bf16.mxu1 %v3063_v32 }
0x1717   : > { %3236 = vmatmul.mubr.bf16.vlgmr.msra.gmra.mrb[52].mxu1 %v3062_v35 }
0x1796   : > { %v3031_v0 = vpop.f32.mrb[52].mxu0 }
0x1797   : > { %v3032_v3 = vadd.f32 %v3031_v0, %v2900_v10  ;;  %v3033_v63 = vpop.f32.mrb[53].mxu0 }
0x1798   : > { %v3034_v2 = vadd.f32 %v3033_v63, %v2904_v43  ;;  %v3035_v5 = vpop.f32.mrb[54].mxu0 }
0x1799   : > { %v3036_v47 = vadd.f32 %v3035_v5, %v2900_v10  ;;  %v3037_v16 = vpop.f32.mrb[55].mxu0  ;;  %v3054_v36 = vmax.f32 %v3032_v3, 0.0 }
0x179a   : > { %v3038_v1 = vadd.f32 %v3037_v16, %v2904_v43  ;;  %v3055_v21 = vmax.f32 %v3034_v2, 0.0 }
0x179b   : > { %v3056_v62 = vmax.f32 %v3036_v47, 0.0 }
0x179c   : > { %v3057_v12 = vmax.f32 %v3038_v1, 0.0 }
0x179d   : > { %v3064_v24 = vpack.c.bf16 %v3056_v62, %v3054_v36 }
0x179e   : > { %v3065_v25 = vpack.c.bf16 %v3057_v12, %v3055_v21  ;;  %v3041_v41 = vpop.f32.mrb[56].mxu0 }
0x179f   : > { %v3042_v20 = vadd.f32 %v3041_v41, %v2900_v10  ;;  %v3043_v44 = vpop.f32.mrb[57].mxu0 }
0x17a0   : > { %v3044_v4 = vadd.f32 %v3043_v44, %v2904_v43  ;;  %v3045_v52 = vpop.f32.mrb[58].mxu0  ;;  %3243 = vmatprep.mubr.bf16.mxu1 %v3065_v25 }
0x17a1   : > { %v3046_v54 = vadd.f32 %v3045_v52, %v2900_v10  ;;  %v3047_v56 = vpop.f32.mrb[59].mxu0  ;;  %3244 = vmatmul.mubr.bf16.gmra.mrb[56].mxu1 %v3064_v24  ;;  %v3058_v30 = vmax.f32 %v3042_v20, 0.0 }
0x17a2   : > { %v3048_v57 = vadd.f32 %v3047_v56, %v2904_v43  ;;  %v3059_v11 = vmax.f32 %v3044_v4, 0.0 }
0x17a3   : > { %v3060_v40 = vmax.f32 %v3046_v54, 0.0 }
0x17a4   : > { %v3061_v37 = vmax.f32 %v3048_v57, 0.0 }
0x17a5   : > { %v3066_v42 = vpack.c.bf16 %v3060_v40, %v3058_v30 }
0x17a6   : > { %v3067_v14 = vpack.c.bf16 %v3061_v37, %v3059_v11 }
0x17a8   : > { %3251 = vmatprep.mubr.bf16.mxu1 %v3067_v14 }
0x17a9   : > { %3252 = vmatmul.mubr.bf16.gmra.mrb[60].mxu1 %v3066_v42  ;;  %v3856_v42 = vld [vmem:[%s762_s21] ss:$0 sm:$0xff]  ;;  %s5546_s21 = sld [smem:[#allocation13_spill]] (!%p3858_p5) }
0x17ea   : > { %v3982_v9 = vpop.f32.mrb[52].mxu1 }
0x17eb   : > { %v3983_v13 = vpop.f32.mrb[53].mxu1 }
0x17ec   : > { %v3984_v18 = vadd.f32 %v3983_v13, %v3982_v9  ;;  %v3985_v19 = vpop.f32.mrb[54].mxu1 }
0x17ed   : > { %v3986_v23 = vpop.f32.mrb[55].mxu1 }
0x17ee   : > { %v3238_v29 = vadd.f32 %v3984_v18, %v3839_v17  ;;  %v3987_v33 = vadd.f32 %v3986_v23, %v3985_v19 }
0x17f0   : > { %v3241_v22 = vadd.f32 %v3987_v33, %v3839_v17  ;;  %v3260_v7 = vadd.f32 %v3238_v29, %v5349_v58 }
0x17f2   : > { %3268 = vadd.xlane.f32.xlu1 %v3260_v7  ;;  %v3261_v6 = vadd.f32 %v3241_v22, %v5352_v59 }
0x17f4   : > { %3270 = vadd.xlane.f32.xlu0 %v3261_v6 }
0x1874   : > { %v3988_v8 = vpop.f32.mrb[56].mxu1 }
0x1875   : > { %v3989_v27 = vpop.f32.mrb[57].mxu1 }
0x1876   : > { %v3990_v46 = vadd.f32 %v3989_v27, %v3988_v8  ;;  %v3991_v10 = vpop.f32.mrb[58].mxu1 }
0x1877   : > { %v3992_v43 = vpop.f32.mrb[59].mxu1 }
0x1878   : > { %v3246_v50 = vadd.f32 %v3990_v46, %v3839_v17  ;;  %v3993_v34 = vadd.f32 %v3992_v43, %v3991_v10 }
0x187a   : > { %v3249_v38 = vadd.f32 %v3993_v34, %v3839_v17  ;;  %v3262_v51 = vadd.f32 %v3246_v50, %v5378_v26 }
0x187c   : > { %v3994_v48 = vpop.f32.mrb[60].mxu1  ;;  %3272 = vadd.xlane.f32.xlu1 %v3262_v51  ;;  %v3263_v39 = vadd.f32 %v3249_v38, %v5381_v28 }
0x187d   : > { %v3995_v55 = vpop.f32.mrb[61].mxu1 }
0x187e   : > { %v3996_v58 = vadd.f32 %v3995_v55, %v3994_v48  ;;  %v3997_v31 = vpop.f32.mrb[62].mxu1  ;;  %3274 = vadd.xlane.f32.xlu0 %v3263_v39 }
0x187f   : > { %v3998_v59 = vpop.f32.mrb[63].mxu1  ;;  %v3269_v53 = vpop.xlane.xlu1 %3268 }
0x1880   : > { %v3254_v60 = vadd.f32 %v3996_v58, %v3839_v17  ;;  %v3999_v61 = vadd.f32 %v3998_v59, %v3997_v31  ;;  %v3280_v49 = vmul.f32 0.0078125, %v3269_v53 }
0x1881   : > { %v3271_v35 = vpop.xlane.xlu0 %3270 }
0x1882   : > { %v3257_v32 = vadd.f32 %v3999_v61, %v3839_v17  ;;  %v3286_v0 = vsub.f32 %v3260_v7, %v3280_v49  ;;  %v3281_v3 = vmul.f32 0.0078125, %v3271_v35  ;;  %v3264_v63 = vadd.f32 %v3254_v60, %v5394_v45  ;;  %v3857_v17 = vld [vmem:[%s5545_s27] ss:$0 sm:$0xff]  ;;  %s5547_s27 = sld [smem:[#allocation11_spill]] (!%p3858_p5) }
0x1884   : > { %v3287_v26 = vsub.f32 %v3261_v6, %v3281_v3  ;;  %3276 = vadd.xlane.f32.xlu1 %v3264_v63  ;;  %v3265_v2 = vadd.f32 %v3257_v32, %v5391_v15  ;;  %v3292_v28 = vmul.f32 %v3286_v0, %v3286_v0 }
0x1886   : > { %3278 = vadd.xlane.f32.xlu0 %v3265_v2  ;;  %v3293_v5 = vmul.f32 %v3287_v26, %v3287_v26 }
0x1888   : > { %3298 = vadd.xlane.f32.xlu1 %v3292_v28 }
0x188a   : > { %3300 = vadd.xlane.f32.xlu0 %v3293_v5 }
0x1909   : > { %v3273_v47 = vpop.xlane.xlu1 %3272 }
0x190a   : > { %v3282_v16 = vmul.f32 0.0078125, %v3273_v47 }
0x190b   : > { %v3275_v1 = vpop.xlane.xlu0 %3274 }
0x190c   : > { %v3288_v36 = vsub.f32 %v3262_v51, %v3282_v16  ;;  %v3283_v62 = vmul.f32 0.0078125, %v3275_v1 }
0x190e   : > { %v3289_v21 = vsub.f32 %v3263_v39, %v3283_v62  ;;  %v3294_v12 = vmul.f32 %v3288_v36, %v3288_v36 }
0x1910   : > { %3302 = vadd.xlane.f32.xlu1 %v3294_v12  ;;  %v3295_v24 = vmul.f32 %v3289_v21, %v3289_v21 }
0x1911   : > { %v3277_v25 = vpop.xlane.xlu1 %3276 }
0x1912   : > { %v3284_v45 = vmul.f32 0.0078125, %v3277_v25  ;;  %3304 = vadd.xlane.f32.xlu0 %v3295_v24 }
0x1913   : > { %v3279_v41 = vpop.xlane.xlu0 %3278 }
0x1914   : > { %v3290_v20 = vsub.f32 %v3264_v63, %v3284_v45  ;;  %v3285_v15 = vmul.f32 0.0078125, %v3279_v41 }
0x1915   : > { %v3299_v44 = vpop.xlane.xlu1 %3298 }
0x1916   : > { %v3291_v4 = vsub.f32 %v3265_v2, %v3285_v15  ;;  %v3310_v52 = vmul.f32 0.0078125, %v3299_v44  ;;  %v3296_v54 = vmul.f32 %v3290_v20, %v3290_v20 }
0x1917   : > { %v3301_v56 = vpop.xlane.xlu0 %3300 }
0x1918   : > { %v3316_v57 = vadd.f32 1e-05, %v3310_v52  ;;  %v3311_v30 = vmul.f32 0.0078125, %v3301_v56  ;;  %3306 = vadd.xlane.f32.xlu1 %v3296_v54  ;;  %v3297_v40 = vmul.f32 %v3291_v4, %v3291_v4 }
0x191a   : > { %4513 = vrsqrt.f32 %v3316_v57  ;;  %v3317_v11 = vadd.f32 1e-05, %v3311_v30  ;;  %3308 = vadd.xlane.f32.xlu0 %v3297_v40  ;;  %v4531_v40 = vld [vmem:[%s5546_s21] sm:$0xff] (!%p3858_p5)  }
0x191c   : > { %4515 = vrsqrt.f32 %v3317_v11  ;;  %v4568_v11 = vmov (!%p3858_p5), 0.0  }
0x191d   : > { %4209 = vmatprep.subr.bf16.mxu0 (!%p3858_p5), %v4568_v11  ;;  %4225 = vmatprep.mubr.msk.bf16.mxu0 (!%p3858_p5), %vm4569_vm9, %v4568_v11 }
0x191e   : > { %4210 = vmatpush3.bf16.msra.mxu0 (!%p3858_p5), %v4531_v40 }
0x191f   : > { %4211 = vmatprep.subr.bf16.mxu0 (!%p3858_p5), %v4568_v11 }
0x1924   : > { %v4514_v37 = vpop.eup %4513 }
0x1925   : > { %v3328_v14 = vmul.f32 %v4514_v37, %v3286_v0  ;;  %v4532_v37 = vld [vmem:[%s5546_s21 + $0x8] sm:$0xff] (!%p3858_p5)  }
0x1926   : > { %v4516_v9 = vpop.eup %4515  ;;  %4212 = vmatpush3.bf16.msra.mxu0 (!%p3858_p5), %v4532_v37 }
0x1927   : > { %v3340_v13 = vmul.f32 %v3856_v42, %v3328_v14  ;;  %v3329_v18 = vmul.f32 %v4516_v9, %v3287_v26  ;;  %4213 = vmatprep.subr.bf16.mxu0 (!%p3858_p5), %v4568_v11  ;;  %v4534_v14 = vld [vmem:[%s5546_s21 + $0x18] sm:$0xff] (!%p3858_p5)   ;;  %v4535_v9 = vld [vmem:[%s5546_s21 + $0x20] sm:$0xff] (!%p3858_p5)  }
0x1929   : > { %v3352_v19 = vadd.f32 %v3857_v17, %v3340_v13  ;;  %v3341_v23 = vmul.f32 %v3856_v42, %v3329_v18  ;;  %v4537_v13 = vld [vmem:[%s5546_s21 + $0x30] sm:$0xff] (!%p3858_p5)   ;;  %v4538_v18 = vld [vmem:[%s5546_s21 + $0x38] sm:$0xff] (!%p3858_p5)  }
0x192b   : > { %3358 = vst [vmem:[#allocation2] sm:$0xff] %v3352_v19  ;;  %v3353_v29 = vadd.f32 %v3857_v17, %v3341_v23  ;;  %3370 = vadd.xlane.f32.xlu0 (!%p3858_p5), %v3352_v19 }
0x192d   : > { %3359 = vst [vmem:[#allocation2 + $0x8] sm:$0xff] %v3353_v29 }
0x192f   : > { %3372 = vadd.xlane.f32.xlu0 (!%p3858_p5), %v3353_v29 }
0x199d   : > { %v3303_v33 = vpop.xlane.xlu1 %3302 }
0x199e   : > { %v3312_v22 = vmul.f32 0.0078125, %v3303_v33 }
0x199f   : > { %v3305_v7 = vpop.xlane.xlu0 %3304 }
0x19a0   : > { %v3318_v6 = vadd.f32 1e-05, %v3312_v22  ;;  %v3313_v8 = vmul.f32 0.0078125, %v3305_v7 }
0x19a2   : > { %4517 = vrsqrt.f32 %v3318_v6  ;;  %v3319_v27 = vadd.f32 1e-05, %v3313_v8 }
0x19a4   : > { %4519 = vrsqrt.f32 %v3319_v27 }
0x19a5   : > { %v3307_v46 = vpop.xlane.xlu1 %3306 }
0x19a6   : > { %v3314_v10 = vmul.f32 0.0078125, %v3307_v46 }
0x19a7   : > { %v3309_v43 = vpop.xlane.xlu0 %3308 }
0x19a8   : > { %v3320_v50 = vadd.f32 1e-05, %v3314_v10  ;;  %v3315_v34 = vmul.f32 0.0078125, %v3309_v43 }
0x19aa   : > { %4521 = vrsqrt.f32 %v3320_v50  ;;  %v3321_v38 = vadd.f32 1e-05, %v3315_v34 }
0x19ac   : > { %v4518_v51 = vpop.eup %4517  ;;  %4523 = vrsqrt.f32 %v3321_v38 }
0x19ad   : > { %v3330_v48 = vmul.f32 %v4518_v51, %v3288_v36 }
0x19ae   : > { %v4520_v39 = vpop.eup %4519 }
0x19af   : > { %v3342_v55 = vmul.f32 %v3856_v42, %v3330_v48  ;;  %v3331_v58 = vmul.f32 %v4520_v39, %v3289_v21 }
0x19b1   : > { %v3354_v31 = vadd.f32 %v3857_v17, %v3342_v55  ;;  %v3343_v59 = vmul.f32 %v3856_v42, %v3331_v58 }
0x19b3   : > { %3360 = vst [vmem:[#allocation2 + $0x10] sm:$0xff] %v3354_v31  ;;  %v3355_v53 = vadd.f32 %v3857_v17, %v3343_v59  ;;  %3374 = vadd.xlane.f32.xlu0 (!%p3858_p5), %v3354_v31 }
0x19b4   : > { %v4522_v60 = vpop.eup %4521 }
0x19b5   : > { %3361 = vst [vmem:[#allocation2 + $0x18] sm:$0xff] %v3355_v53  ;;  %v3332_v61 = vmul.f32 %v4522_v60, %v3290_v20  ;;  %3376 = vadd.xlane.f32.xlu1 (!%p3858_p5), %v3355_v53  ;;  %v3859_v60 = vld [vmem:[%s5547_s27] ss:$0 sm:$0xff] (!%p3858_p5) }
0x19b6   : > { %v4524_v49 = vpop.eup %4523 }
0x19b7   : > { %v3344_v35 = vmul.f32 %v3856_v42, %v3332_v61  ;;  %v3333_v32 = vmul.f32 %v4524_v49, %v3291_v4  ;;  %3367 = sbr.rel (%p3858_p5) target bundleno = 7139 (0x1be3), region = 104 }
0x19b8   : > { %v3371_v26 = vpop.xlane.xlu0 (!%p3858_p5), %3370 }
0x19b9   : > { %v3356_v0 = vadd.f32 %v3857_v17, %v3344_v35  ;;  %v3345_v3 = vmul.f32 %v3856_v42, %v3333_v32  ;;  %v3382_v28 = vmul.f32 (!%p3858_p5), 0.0078125, %v3371_v26  ;;  %v4533_v42 = vld [vmem:[%s5546_s21 + $0x10] sm:$0xff] (!%p3858_p5)   ;;  %v3860_v26 = vld [vmem:[%s5548_s17] ss:$0 sm:$0xff] (!%p3858_p5) }
0x19ba   : > { %4214 = vmatpush3.bf16.msra.mxu0 (!%p3858_p5), %v4533_v42 }
0x19bb   : > { %3362 = vst [vmem:[#allocation2 + $0x20] sm:$0xff] %v3356_v0  ;;  %v3357_v63 = vadd.f32 %v3857_v17, %v3345_v3  ;;  %3378 = vadd.xlane.f32.xlu1 (!%p3858_p5), %v3356_v0  ;;  %v5425_v47 = vsub.f32 (!%p3858_p5), %v3352_v19, %v3382_v28  ;;  %4215 = vmatprep.subr.bf16.mxu0 (!%p3858_p5), %v4568_v11  ;;  %v4536_v17 = vld [vmem:[%s5546_s21 + $0x28] sm:$0xff] (!%p3858_p5)  }
0x19bc   : > { %v3373_v1 = vpop.xlane.xlu0 (!%p3858_p5), %3372 }
0x19bd   : > { %3363 = vst [vmem:[#allocation2 + $0x28] sm:$0xff] %v3357_v63  ;;  %v3383_v62 = vmul.f32 (!%p3858_p5), 0.0078125, %v3373_v1  ;;  %v3394_v21 = vmul.f32 (!%p3858_p5), %v5425_v47, %v5425_v47 }
0x19be   : > { %4216 = vmatpush3.bf16.msra.mxu0 %v4534_v14 }
0x19bf   : > { %3380 = vadd.xlane.f32.xlu1 %v3357_v63  ;;  %v5431_v24 = vsub.f32 %v3353_v29, %v3383_v62  ;;  %3400 = vadd.xlane.f32.xlu0 %v3394_v21 }
0x19c0   : > { %4217 = vmatprep.subr.bf16.mxu0 %v4568_v11 }
0x19c1   : > { %v3395_v44 = vmul.f32 %v5431_v24, %v5431_v24 }
0x19c2   : > { %4218 = vmatpush3.bf16.msra.mxu0 %v4535_v9 }
0x19c3   : > { %3402 = vadd.xlane.f32.xlu1 %v3395_v44  ;;  %4219 = vmatprep.subr.bf16.mxu0 %v4568_v11 }
0x19c6   : > { %4220 = vmatpush3.bf16.msra.mxu0 %v4536_v17 }
0x19c7   : > { %4221 = vmatprep.subr.bf16.mxu0 %v4568_v11 }
0x19ca   : > { %4222 = vmatpush3.bf16.msra.mxu0 %v4537_v13 }
0x19cb   : > { %4223 = vmatprep.subr.bf16.mxu0 %v4568_v11 }
0x19ce   : > { %4224 = vmatpush3.bf16.msra.mxu0 %v4538_v18 }
0x1a40   : > { %v3375_v41 = vpop.xlane.xlu0 %3374 }
0x1a41   : > { %v3384_v15 = vmul.f32 0.0078125, %v3375_v41 }
0x1a42   : > { %v3377_v2 = vpop.xlane.xlu1 %3376 }
0x1a43   : > { %v3385_v5 = vmul.f32 0.0078125, %v3377_v2  ;;  %v5439_v52 = vsub.f32 %v3354_v31, %v3384_v15 }
0x1a45   : > { %v5427_v16 = vsub.f32 %v3355_v53, %v3385_v5  ;;  %v3396_v57 = vmul.f32 %v5439_v52, %v5439_v52 }
0x1a47   : > { %v3397_v45 = vmul.f32 %v5427_v16, %v5427_v16 }
0x1a48   : > { %v3379_v36 = vpop.xlane.xlu1 %3378 }
0x1a49   : > { %v3386_v12 = vmul.f32 0.0078125, %v3379_v36  ;;  %3406 = vadd.xlane.f32.xlu0 %v3397_v45 }
0x1a4b   : > { %v5433_v25 = vsub.f32 %v3356_v0, %v3386_v12 }
0x1a4c   : > { %v3381_v20 = vpop.xlane.xlu1 %3380  ;;  %v3401_v19 = vpop.xlane.xlu0 %3400 }
0x1a4d   : > { %v3387_v4 = vmul.f32 0.0078125, %v3381_v20  ;;  %v3398_v56 = vmul.f32 %v5433_v25, %v5433_v25  ;;  %3404 = vadd.xlane.f32.xlu0 %v3396_v57  ;;  %v3412_v23 = vmul.f32 0.0078125, %v3401_v19 }
0x1a4f   : > { %v5441_v54 = vsub.f32 %v3357_v63, %v3387_v4  ;;  %3408 = vadd.xlane.f32.xlu1 %v3398_v56  ;;  %v3418_v29 = vadd.f32 1e-05, %v3412_v23 }
0x1a50   : > { %v3403_v33 = vpop.xlane.xlu1 %3402 }
0x1a51   : > { %v3399_v30 = vmul.f32 %v5441_v54, %v5441_v54  ;;  %v3413_v7 = vmul.f32 0.0078125, %v3403_v33  ;;  %4539 = vrsqrt.f32 %v3418_v29  ;;  %v3861_v29 = vld [vmem:[%s5549_s0] ss:$0 sm:$0xff] }
0x1a53   : > { %3410 = vadd.xlane.f32.xlu1 %v3399_v30  ;;  %v3419_v8 = vadd.f32 1e-05, %v3413_v7 }
0x1a55   : > { %4541 = vrsqrt.f32 %v3419_v8 }
0x1a5b   : > { %v4540_v55 = vpop.eup %4539 }
0x1a5c   : > { %v3430_v59 = vmul.f32 %v4540_v55, %v5425_v47 }
0x1a5e   : > { %v3442_v0 = vmul.f32 %v3859_v60, %v3430_v59 }
0x1a5f   : > { %v4542_v58 = vpop.eup %4541 }
0x1a60   : > { %v3431_v53 = vmul.f32 %v4542_v58, %v5431_v24  ;;  %v3454_v62 = vadd.f32 %v3860_v26, %v3442_v0 }
0x1a62   : > { %v3443_v61 = vmul.f32 %v3859_v60, %v3431_v53 }
0x1a64   : > { %v3455_v28 = vadd.f32 %v3860_v26, %v3443_v61 }
0x1a66   : > { %v3460_v24 = vadd.f32 %v3455_v28, %v3454_v62 }
0x1ad6   : > { %v3407_v22 = vpop.xlane.xlu0 %3406 }
0x1ad7   : > { %v3415_v6 = vmul.f32 0.0078125, %v3407_v22 }
0x1ad9   : > { %v3421_v27 = vadd.f32 1e-05, %v3415_v6 }
0x1ada   : > { %v3405_v10 = vpop.xlane.xlu0 %3404 }
0x1adb   : > { %v3414_v50 = vmul.f32 0.0078125, %v3405_v10  ;;  %4543 = vrsqrt.f32 %v3421_v27 }
0x1adc   : > { %v3409_v46 = vpop.xlane.xlu1 %3408 }
0x1add   : > { %v3416_v43 = vmul.f32 0.0078125, %v3409_v46  ;;  %v3420_v38 = vadd.f32 1e-05, %v3414_v50 }
0x1adf   : > { %v3422_v34 = vadd.f32 1e-05, %v3416_v43 }
0x1ae0   : > { %v3411_v51 = vpop.xlane.xlu1 %3410 }
0x1ae1   : > { %4545 = vrsqrt.f32 %v3422_v34  ;;  %v3417_v48 = vmul.f32 0.0078125, %v3411_v51 }
0x1ae2   : > { %4547 = vrsqrt.f32 %v3420_v38 }
0x1ae3   : > { %v3423_v39 = vadd.f32 1e-05, %v3417_v48 }
0x1ae5   : > { %4549 = vrsqrt.f32 %v3423_v39  ;;  %v4544_v31 = vpop.eup %4543 }
0x1ae6   : > { %v3433_v35 = vmul.f32 %v4544_v31, %v5427_v16 }
0x1ae8   : > { %v3445_v47 = vmul.f32 %v3859_v60, %v3433_v35 }
0x1aeb   : > { %v4546_v49 = vpop.eup %4545 }
0x1aec   : > { %v4548_v32 = vpop.eup %4547  ;;  %v3434_v3 = vmul.f32 %v4546_v49, %v5433_v25  ;;  %v3457_v25 = vadd.f32 %v3860_v26, %v3445_v47 }
0x1aed   : > { %v3432_v63 = vmul.f32 %v4548_v32, %v5439_v52 }
0x1aee   : > { %v3446_v2 = vmul.f32 %v3859_v60, %v3434_v3 }
0x1aef   : > { %v4550_v5 = vpop.eup %4549  ;;  %v3444_v1 = vmul.f32 %v3859_v60, %v3432_v63 }
0x1af0   : > { %v3435_v36 = vmul.f32 %v4550_v5, %v5441_v54  ;;  %v3458_v21 = vadd.f32 %v3860_v26, %v3446_v2 }
0x1af1   : > { %v3456_v16 = vadd.f32 %v3860_v26, %v3444_v1 }
0x1af2   : > { %v3447_v12 = vmul.f32 %v3859_v60, %v3435_v36  ;;  %v3471_v15 = vadd.f32 %v3458_v21, %v3457_v25 }
0x1af3   : > { %v3462_v45 = vsel %vm3461_vm10, %v3456_v16, 0.0 }
0x1af4   : > { %v3459_v41 = vadd.f32 %v3860_v26, %v3447_v12  ;;  %v3463_v20 = vadd.f32 %v3462_v45, %v3460_v24 }
0x1af6   : > { %v3464_v44 = vrot.slane %v3463_v20, 4  ;;  %v3472_v4 = vsel %vm3461_vm10, %v3459_v41, 0.0 }
0x1af7   : > { %v3473_v52 = vadd.f32 %v3472_v4, %v3471_v15 }
0x1af8   : > { %v3465_v56 = vadd.f32 %v3464_v44, %v3463_v20 }
0x1af9   : > { %v3474_v57 = vrot.slane %v3473_v52, 4 }
0x1afa   : > { %v3466_v30 = vrot.slane %v3465_v56, 2 }
0x1afb   : > { %v3475_v54 = vadd.f32 %v3474_v57, %v3473_v52 }
0x1afc   : > { %v3467_v40 = vadd.f32 %v3466_v30, %v3465_v56 }
0x1afd   : > { %v3476_v11 = vrot.slane %v3475_v54, 2 }
0x1afe   : > { %v3468_v37 = vrot.slane %v3467_v40, 1 }
0x1aff   : > { %v3477_v42 = vadd.f32 %v3476_v11, %v3475_v54 }
0x1b00   : > { %v3469_v14 = vadd.f32 %v3468_v37, %v3467_v40 }
0x1b01   : > { %v3478_v9 = vrot.slane %v3477_v42, 1 }
0x1b02   : > { %v3470_v13 = vmul.f32 0.05882353, %v3469_v14 }
0x1b03   : > { %v3479_v17 = vadd.f32 %v3478_v9, %v3477_v42 }
0x1b05   : > { %v3480_v18 = vmul.f32 0.05882353, %v3479_v17 }
0x1b07   : > { %v3481_v19 = vsel %vm3461_vm10, %v3470_v13, %v3480_v18 }
0x1b08   : > { %v3482_v23 = vpack.c.bf16 %v3481_v19, %v3481_v19 }
0x1b0a   : > { %4226 = vmatmul.mubr.bf16.vlgmr.msra.gmra.mrb[0].mxu0 %v3482_v23 }
0x1bdd   : > { %v3588_v33 = vpop.f32.mrb[0].mxu0 }
0x1bde   : > { %v3589_v22 = vadd.f32 %v3861_v29, %v3588_v33  ;;  %v4227_v7 = vpop.f32.mrb[1].mxu0 }
0x1bdf   : > { %v3591_v6 = vpop.f32.mrb[2].mxu0 }
0x1be0   : > { %v3594_v8 = vmax.f32 %v3589_v22, 0.0  ;;  %v4228_v27 = vpop.f32.mrb[3].mxu0 }
0x1be2   : > { %3595 = vst [vmem:[%s5550_s25] sm:$0x3] %v3594_v8 }
0x1be3 PF: > { %s5551_s19 = sld [smem:[#allocation3_spill]] }
0x1be9   : > { %s29_s0 = sadd.s32 1, %s5551_s19  }
0x1bea   : > { %p26_p6 = scmp.ge.s32.totalorder %s29_s0, 4  }
0x1bec   :  { %28 = sbr.rel (!%p26_p6) target bundleno = 13 (0xd), region = 163 }

</bundles_post_ra>
